<compile_context>
chip_gen: v7x
topology: tpu7x:2x2x1
jax: 0.10.0
libtpu: 0.0.40
codegen_flags: <defaults>
</compile_context>

<pallas_src>
import jax
import jax.numpy as jnp
from jax import lax
from jax.experimental import pallas as pl
from jax.experimental.pallas import tpu as pltpu


# ---------------------------------------------------------------------------
# Kernel 1: fused conv1 + ReLU + conv2 + bias + 2x2 max-pool  (one image/step)
# ---------------------------------------------------------------------------
def _conv_stack_kernel(x_ref, w1_ref, b1_ref, w2_ref, b2_ref, o_ref,
                       c1_ref, row_ref):
    # ---- conv1 (1->32, 3x3, VALID) + ReLU -> bf16 VMEM scratch (HWC) -------
    def conv1_row(h, carry):
        acc = jnp.zeros((26, 32), jnp.float32)
        for di in range(3):
            col = x_ref[h + di]                       # (28, 1) f32, W on sublanes
            for dj in range(3):
                # (26,1) * (1,32) broadcast multiply-accumulate on the VPU
                acc = acc + col[dj:dj + 26, :] * w1_ref[di * 3 + dj]
        acc = jnp.maximum(acc + b1_ref[...], 0.0)
        c1_ref[h] = acc.astype(c1_ref.dtype)          # (26, 32) bf16
        return carry

    lax.fori_loop(0, 26, conv1_row, 0)

    # ---- conv2 (32->64, 3x3, VALID) + bias, 2x2 max-pool fused -------------
    def conv2_row(h):
        acc = jnp.zeros((24, 64), jnp.float32)
        for di in range(3):
            src = c1_ref[h + di]                      # (26, 32) bf16
            for dj in range(3):
                acc = acc + jnp.dot(src[dj:dj + 24, :], w2_ref[di * 3 + dj],
                                    preferred_element_type=jnp.float32)
        return acc + b2_ref[...]                      # (24, 64) f32

    def pooled_row(p, carry):
        m = jnp.maximum(conv2_row(2 * p), conv2_row(2 * p + 1))   # pool along H
        row_ref[...] = m
        pooled = jnp.maximum(row_ref[pl.ds(0, 12, stride=2), :],  # pool along W
                             row_ref[pl.ds(1, 12, stride=2), :])
        o_ref[p] = pooled.astype(o_ref.dtype)         # (12, 64) lane-dense store
        return carry

    lax.fori_loop(0, 12, pooled_row, 0)


def conv_stack(x_nhwc, w1_taps, b1, w2_taps, b2):
    b = x_nhwc.shape[0]
    flops = b * (2 * 26 * 26 * 9 * 1 * 32 + 2 * 24 * 24 * 9 * 32 * 64)
    bytes_accessed = (x_nhwc.size * x_nhwc.dtype.itemsize
                      + w1_taps.size * 4 + b1.size * 4
                      + w2_taps.size * 2 + b2.size * 4
                      + b * 12 * 12 * 64 * 2)
    return pl.pallas_call(
        _conv_stack_kernel,
        out_shape=jax.ShapeDtypeStruct((b, 12, 12, 64), jnp.bfloat16),
        grid_spec=pltpu.PrefetchScalarGridSpec(
            num_scalar_prefetch=0,
            grid=(b,),
            in_specs=[
                pl.BlockSpec((None, 28, 28, 1), lambda i: (i, 0, 0, 0)),  # image
                pl.BlockSpec((9, 1, 32), lambda i: (0, 0, 0)),            # w1 taps
                pl.BlockSpec((1, 32), lambda i: (0, 0)),                  # b1
                pl.BlockSpec((9, 32, 64), lambda i: (0, 0, 0)),           # w2 taps
                pl.BlockSpec((1, 64), lambda i: (0, 0)),                  # b2
            ],
            out_specs=pl.BlockSpec((None, 12, 12, 64), lambda i: (i, 0, 0, 0)),
            scratch_shapes=[
                pltpu.VMEM((26, 26, 32), jnp.bfloat16),   # conv1 activations
                pltpu.VMEM((24, 64), jnp.float32),        # H-pooled conv2 row
            ],
        ),
        compiler_params=pltpu.CompilerParams(
            dimension_semantics=("parallel",),
            vmem_limit_bytes=32 * 1024 * 1024),
        cost_estimate=pl.CostEstimate(flops=flops, transcendentals=0,
                                      bytes_accessed=bytes_accessed),
    )(x_nhwc, w1_taps, b1, w2_taps, b2)


# ---------------------------------------------------------------------------
# Kernel 2: fused fc1 + ReLU + fc2 (padded to 128 lanes) + log_softmax
# ---------------------------------------------------------------------------
def _fc_kernel(x_ref, w1_ref, b1_ref, w2_ref, b2_ref, o_ref):
    h = jnp.dot(x_ref[...], w1_ref[...], preferred_element_type=jnp.float32)
    h = jnp.maximum(h + b1_ref[...], 0.0)                       # fc1 + ReLU
    y = jnp.dot(h.astype(jnp.bfloat16), w2_ref[...],
                preferred_element_type=jnp.float32)
    y = y + b2_ref[...]                                         # pads get -1e30
    m = jnp.max(y, axis=-1, keepdims=True)
    z = y - m
    o_ref[...] = (z - jnp.log(jnp.sum(jnp.exp(z), axis=-1, keepdims=True))
                  ).astype(o_ref.dtype)


def fc_stack(feats, w1, b1, w2p, b2p, tile_m):
    bp, k = feats.shape
    n1 = w1.shape[1]
    n2 = w2p.shape[1]
    flops = 2 * bp * (k * n1 + n1 * n2)
    bytes_accessed = (feats.size * 2 + w1.size * 2 + w2p.size * 2
                      + b1.size * 4 + b2p.size * 4 + bp * n2 * 4)
    return pl.pallas_call(
        _fc_kernel,
        out_shape=jax.ShapeDtypeStruct((bp, n2), jnp.float32),
        grid_spec=pltpu.PrefetchScalarGridSpec(
            num_scalar_prefetch=0,
            grid=(bp // tile_m,),
            in_specs=[
                pl.BlockSpec((tile_m, k), lambda i: (i, 0)),  # activations (tiled M)
                pl.BlockSpec((k, n1), lambda i: (0, 0)),      # fc1 weight (resident)
                pl.BlockSpec((1, n1), lambda i: (0, 0)),
                pl.BlockSpec((n1, n2), lambda i: (0, 0)),     # fc2 weight (padded)
                pl.BlockSpec((1, n2), lambda i: (0, 0)),
            ],
            out_specs=pl.BlockSpec((tile_m, n2), lambda i: (i, 0)),
        ),
        compiler_params=pltpu.CompilerParams(
            dimension_semantics=("parallel",),
            vmem_limit_bytes=32 * 1024 * 1024),
        cost_estimate=pl.CostEstimate(flops=flops, transcendentals=bp * n2,
                                      bytes_accessed=bytes_accessed),
    )(feats, w1, b1, w2p, b2p)


# ---------------------------------------------------------------------------
# Parameters (deterministic synthetic init; shapes match nn.Module __init__)
# ---------------------------------------------------------------------------
def init_params(key):
    ks = jax.random.split(key, 8)
    rnd = lambda k, s, sc: jax.random.normal(k, s, dtype=jnp.float32) * sc
    return {
        "conv1_w": rnd(ks[0], (32, 1, 3, 3), 0.10),   # (out_c, in_c, kh, kw)
        "conv1_b": rnd(ks[1], (32,), 0.10),
        "conv2_w": rnd(ks[2], (64, 32, 3, 3), 0.05),
        "conv2_b": rnd(ks[3], (64,), 0.05),
        "fc1_w":   rnd(ks[4], (128, 9216), 0.01),     # (out, in) like nn.Linear
        "fc1_b":   rnd(ks[5], (128,), 0.01),
        "fc2_w":   rnd(ks[6], (10, 128), 0.05),
        "fc2_b":   rnd(ks[7], (10,), 0.05),
    }


def prepare_params(p):
    """One-time (outside jit) weight re-layout / casts for the kernels."""
    w1_taps = jnp.transpose(p["conv1_w"], (2, 3, 1, 0)).reshape(9, 1, 32)
    w2_taps = jnp.transpose(p["conv2_w"], (2, 3, 1, 0)).reshape(9, 32, 64)
    # fc1 permuted so it contracts against the kernel's (h, w, c) flatten order
    # (numerically identical to PyTorch's NCHW flatten of the pooled tensor).
    fc1_w = jnp.transpose(p["fc1_w"].reshape(128, 64, 12, 12),
                          (2, 3, 1, 0)).reshape(9216, 128)
    # fc2 padded to 128 output lanes; pad bias = -1e30 so log_softmax ignores it.
    fc2_w = jnp.zeros((128, 128), jnp.float32).at[:, :10].set(p["fc2_w"].T)
    fc2_b = jnp.full((1, 128), -1e30, jnp.float32).at[0, :10].set(p["fc2_b"])
    return {
        "w1_taps": w1_taps.astype(jnp.float32),
        "b1": p["conv1_b"].reshape(1, 32).astype(jnp.float32),
        "w2_taps": w2_taps.astype(jnp.bfloat16),
        "b2": p["conv2_b"].reshape(1, 64).astype(jnp.float32),
        "fc1_w": fc1_w.astype(jnp.bfloat16),
        "fc1_b": p["fc1_b"].reshape(1, 128).astype(jnp.float32),
        "fc2_w": fc2_w.astype(jnp.bfloat16),
        "fc2_b": fc2_b,
    }


def _round_up(x, m):
    return (x + m - 1) // m * m


# ---------------------------------------------------------------------------
# Forward pass (matches Net.forward eval semantics)
# ---------------------------------------------------------------------------
@jax.jit
def net_forward(prepped, x_nchw):
    b = x_nchw.shape[0]
    # NCHW (B,1,28,28) -> NHWC (B,28,28,1); a free reshape because C == 1.
    x_nhwc = x_nchw.reshape(b, 28, 28, 1)

    pooled = conv_stack(x_nhwc, prepped["w1_taps"], prepped["b1"],
                        prepped["w2_taps"], prepped["b2"])     # (B,12,12,64) bf16
    feats = pooled.reshape(b, 12 * 12 * 64)                    # (B, 9216)

    # TODO(synk): dropout1/dropout2 are training-mode ops; identity in eval.

    tile_m = min(128, _round_up(b, 8))
    bp = _round_up(b, tile_m)
    if bp != b:
        feats = jnp.pad(feats, ((0, bp - b), (0, 0)))
    logp = fc_stack(feats, prepped["fc1_w"], prepped["fc1_b"],
                    prepped["fc2_w"], prepped["fc2_b"], tile_m)  # (Bp, 128) f32
    return logp[:b, :10]


# ---------------------------------------------------------------------------
# Pure-JAX f32 reference (for validation only)
# ---------------------------------------------------------------------------
def reference_forward(p, x_nchw):
    dn = ("NCHW", "OIHW", "NCHW")
    x = lax.conv_general_dilated(x_nchw, p["conv1_w"], (1, 1), "VALID",
                                 dimension_numbers=dn)
    x = jnp.maximum(x + p["conv1_b"][None, :, None, None], 0.0)
    x = lax.conv_general_dilated(x, p["conv2_w"], (1, 1), "VALID",
                                 dimension_numbers=dn)
    x = x + p["conv2_b"][None, :, None, None]
    b = x.shape[0]
    x = x.reshape(b, 64, 12, 2, 12, 2).max(axis=(3, 5))
    x = x.reshape(b, 9216)
    x = jnp.maximum(x @ p["fc1_w"].T + p["fc1_b"], 0.0)
    x = x @ p["fc2_w"].T + p["fc2_b"]
    return jax.nn.log_softmax(x, axis=1)


if __name__ == "__main__":
    key = jax.random.PRNGKey(0)
    kp, kx = jax.random.split(key)
    params = init_params(kp)
    prepped = prepare_params(params)

    # 28x28 single-channel input is required by the 9216-wide fc1 (MNIST-like).
    x = jax.random.normal(kx, (2, 1, 28, 28), dtype=jnp.float32)

    out = jax.block_until_ready(net_forward(prepped, x))
    assert out.shape == (2, 10), out.shape

    # log_softmax rows must (log-)sum to ~0.
    assert bool(jnp.all(jnp.abs(jax.scipy.special.logsumexp(out, axis=1)) < 1e-3))

    # Check against the pure-JAX f32 reference (generous tol for bf16 matmuls).
    ref = reference_forward(params, x)
    assert float(jnp.max(jnp.abs(out - ref))) < 0.1

    print("KERNEL_OK")
</pallas_src>

<mosaic_0001>
module attributes {stable_mosaic.version = 11 : i64} {
  func.func @_conv_stack_kernel(%arg0: i32, %arg1: memref<1x28x28x1xf32, #tpu.memory_space<vmem>>, %arg2: memref<9x1x32xf32, #tpu.memory_space<vmem>>, %arg3: memref<1x32xf32, #tpu.memory_space<vmem>>, %arg4: memref<9x32x64xbf16, #tpu.memory_space<vmem>>, %arg5: memref<1x64xf32, #tpu.memory_space<vmem>>, %arg6: memref<1x12x12x64xbf16, #tpu.memory_space<vmem>>, %arg7: memref<26x26x32xbf16, #tpu.memory_space<vmem>>, %arg8: memref<24x64xf32, #tpu.memory_space<vmem>>) attributes {dimension_semantics = [#tpu.dimension_semantics<parallel>], iteration_bounds = array<i64: 2>, scalar_prefetch = 0 : i64, scratch_operands = 2 : i64, tpu.core_type = #tpu.core_type<tc>, window_params = [{transform_indices = @transform_0, window_bounds = array<i64: 1, 28, 28, 1>}, {pipeline_mode = #tpu.pipeline_mode<synchronous>, transform_indices = @transform_1, window_bounds = array<i64: 9, 1, 32>}, {pipeline_mode = #tpu.pipeline_mode<synchronous>, transform_indices = @transform_2, window_bounds = array<i64: 1, 32>}, {pipeline_mode = #tpu.pipeline_mode<synchronous>, transform_indices = @transform_3, window_bounds = array<i64: 9, 32, 64>}, {pipeline_mode = #tpu.pipeline_mode<synchronous>, transform_indices = @transform_4, window_bounds = array<i64: 1, 64>}, {transform_indices = @transform_5, window_bounds = array<i64: 1, 12, 12, 64>}]} {
    %c0_i32 = arith.constant 0 : i32
    %c26_i32 = arith.constant 26 : i32
    %0 = arith.addi %c0_i32, %c26_i32 : i32
    %c1_i32 = arith.constant 1 : i32
    scf.for %arg9 = %c0_i32 to %0 step %c1_i32  : i32 {
      %cst = arith.constant 0.000000e+00 : f32
      %2 = vector.broadcast %cst : f32 to vector<26x32xf32>
      %c0_i32_4 = arith.constant 0 : i32
      %3 = arith.addi %arg9, %c0_i32_4 : i32
      %c0 = arith.constant 0 : index
      %4 = arith.index_cast %3 : i32 to index
      %c0_5 = arith.constant 0 : index
      %c0_6 = arith.constant 0 : index
      %5 = vector.load %arg1[%c0, %4, %c0_5, %c0_6] : memref<1x28x28x1xf32, #tpu.memory_space<vmem>>, vector<1x1x28x1xf32>
      %6 = vector.shape_cast %5 : vector<1x1x28x1xf32> to vector<28x1xf32>
      %7 = vector.extract_strided_slice %6 {offsets = [0, 0], sizes = [26, 1], strides = [1, 1]} : vector<28x1xf32> to vector<26x1xf32>
      %c0_7 = arith.constant 0 : index
      %c0_8 = arith.constant 0 : index
      %c0_9 = arith.constant 0 : index
      %8 = vector.load %arg2[%c0_7, %c0_8, %c0_9] : memref<9x1x32xf32, #tpu.memory_space<vmem>>, vector<1x1x32xf32>
      %9 = vector.shape_cast %8 : vector<1x1x32xf32> to vector<1x32xf32>
      %10 = vector.broadcast %7 : vector<26x1xf32> to vector<26x32xf32>
      %11 = vector.broadcast %9 : vector<1x32xf32> to vector<26x32xf32>
      %12 = arith.mulf %10, %11 : vector<26x32xf32>
      %13 = arith.addf %2, %12 : vector<26x32xf32>
      %14 = vector.extract_strided_slice %6 {offsets = [1, 0], sizes = [26, 1], strides = [1, 1]} : vector<28x1xf32> to vector<26x1xf32>
      %c1 = arith.constant 1 : index
      %c0_10 = arith.constant 0 : index
      %c0_11 = arith.constant 0 : index
      %15 = vector.load %arg2[%c1, %c0_10, %c0_11] : memref<9x1x32xf32, #tpu.memory_space<vmem>>, vector<1x1x32xf32>
      %16 = vector.shape_cast %15 : vector<1x1x32xf32> to vector<1x32xf32>
      %17 = vector.broadcast %14 : vector<26x1xf32> to vector<26x32xf32>
      %18 = vector.broadcast %16 : vector<1x32xf32> to vector<26x32xf32>
      %19 = arith.mulf %17, %18 : vector<26x32xf32>
      %20 = arith.addf %13, %19 : vector<26x32xf32>
      %21 = vector.extract_strided_slice %6 {offsets = [2, 0], sizes = [26, 1], strides = [1, 1]} : vector<28x1xf32> to vector<26x1xf32>
      %c2 = arith.constant 2 : index
      %c0_12 = arith.constant 0 : index
      %c0_13 = arith.constant 0 : index
      %22 = vector.load %arg2[%c2, %c0_12, %c0_13] : memref<9x1x32xf32, #tpu.memory_space<vmem>>, vector<1x1x32xf32>
      %23 = vector.shape_cast %22 : vector<1x1x32xf32> to vector<1x32xf32>
      %24 = vector.broadcast %21 : vector<26x1xf32> to vector<26x32xf32>
      %25 = vector.broadcast %23 : vector<1x32xf32> to vector<26x32xf32>
      %26 = arith.mulf %24, %25 : vector<26x32xf32>
      %27 = arith.addf %20, %26 : vector<26x32xf32>
      %c1_i32_14 = arith.constant 1 : i32
      %28 = arith.addi %arg9, %c1_i32_14 : i32
      %c0_15 = arith.constant 0 : index
      %29 = arith.index_cast %28 : i32 to index
      %c0_16 = arith.constant 0 : index
      %c0_17 = arith.constant 0 : index
      %30 = vector.load %arg1[%c0_15, %29, %c0_16, %c0_17] : memref<1x28x28x1xf32, #tpu.memory_space<vmem>>, vector<1x1x28x1xf32>
      %31 = vector.shape_cast %30 : vector<1x1x28x1xf32> to vector<28x1xf32>
      %32 = vector.extract_strided_slice %31 {offsets = [0, 0], sizes = [26, 1], strides = [1, 1]} : vector<28x1xf32> to vector<26x1xf32>
      %c3 = arith.constant 3 : index
      %c0_18 = arith.constant 0 : index
      %c0_19 = arith.constant 0 : index
      %33 = vector.load %arg2[%c3, %c0_18, %c0_19] : memref<9x1x32xf32, #tpu.memory_space<vmem>>, vector<1x1x32xf32>
      %34 = vector.shape_cast %33 : vector<1x1x32xf32> to vector<1x32xf32>
      %35 = vector.broadcast %32 : vector<26x1xf32> to vector<26x32xf32>
      %36 = vector.broadcast %34 : vector<1x32xf32> to vector<26x32xf32>
      %37 = arith.mulf %35, %36 : vector<26x32xf32>
      %38 = arith.addf %27, %37 : vector<26x32xf32>
      %39 = vector.extract_strided_slice %31 {offsets = [1, 0], sizes = [26, 1], strides = [1, 1]} : vector<28x1xf32> to vector<26x1xf32>
      %c4 = arith.constant 4 : index
      %c0_20 = arith.constant 0 : index
      %c0_21 = arith.constant 0 : index
      %40 = vector.load %arg2[%c4, %c0_20, %c0_21] : memref<9x1x32xf32, #tpu.memory_space<vmem>>, vector<1x1x32xf32>
      %41 = vector.shape_cast %40 : vector<1x1x32xf32> to vector<1x32xf32>
      %42 = vector.broadcast %39 : vector<26x1xf32> to vector<26x32xf32>
      %43 = vector.broadcast %41 : vector<1x32xf32> to vector<26x32xf32>
      %44 = arith.mulf %42, %43 : vector<26x32xf32>
      %45 = arith.addf %38, %44 : vector<26x32xf32>
      %46 = vector.extract_strided_slice %31 {offsets = [2, 0], sizes = [26, 1], strides = [1, 1]} : vector<28x1xf32> to vector<26x1xf32>
      %c5 = arith.constant 5 : index
      %c0_22 = arith.constant 0 : index
      %c0_23 = arith.constant 0 : index
      %47 = vector.load %arg2[%c5, %c0_22, %c0_23] : memref<9x1x32xf32, #tpu.memory_space<vmem>>, vector<1x1x32xf32>
      %48 = vector.shape_cast %47 : vector<1x1x32xf32> to vector<1x32xf32>
      %49 = vector.broadcast %46 : vector<26x1xf32> to vector<26x32xf32>
      %50 = vector.broadcast %48 : vector<1x32xf32> to vector<26x32xf32>
      %51 = arith.mulf %49, %50 : vector<26x32xf32>
      %52 = arith.addf %45, %51 : vector<26x32xf32>
      %c2_i32 = arith.constant 2 : i32
      %53 = arith.addi %arg9, %c2_i32 : i32
      %c0_24 = arith.constant 0 : index
      %54 = arith.index_cast %53 : i32 to index
      %c0_25 = arith.constant 0 : index
      %c0_26 = arith.constant 0 : index
      %55 = vector.load %arg1[%c0_24, %54, %c0_25, %c0_26] : memref<1x28x28x1xf32, #tpu.memory_space<vmem>>, vector<1x1x28x1xf32>
      %56 = vector.shape_cast %55 : vector<1x1x28x1xf32> to vector<28x1xf32>
      %57 = vector.extract_strided_slice %56 {offsets = [0, 0], sizes = [26, 1], strides = [1, 1]} : vector<28x1xf32> to vector<26x1xf32>
      %c6 = arith.constant 6 : index
      %c0_27 = arith.constant 0 : index
      %c0_28 = arith.constant 0 : index
      %58 = vector.load %arg2[%c6, %c0_27, %c0_28] : memref<9x1x32xf32, #tpu.memory_space<vmem>>, vector<1x1x32xf32>
      %59 = vector.shape_cast %58 : vector<1x1x32xf32> to vector<1x32xf32>
      %60 = vector.broadcast %57 : vector<26x1xf32> to vector<26x32xf32>
      %61 = vector.broadcast %59 : vector<1x32xf32> to vector<26x32xf32>
      %62 = arith.mulf %60, %61 : vector<26x32xf32>
      %63 = arith.addf %52, %62 : vector<26x32xf32>
      %64 = vector.extract_strided_slice %56 {offsets = [1, 0], sizes = [26, 1], strides = [1, 1]} : vector<28x1xf32> to vector<26x1xf32>
      %c7 = arith.constant 7 : index
      %c0_29 = arith.constant 0 : index
      %c0_30 = arith.constant 0 : index
      %65 = vector.load %arg2[%c7, %c0_29, %c0_30] : memref<9x1x32xf32, #tpu.memory_space<vmem>>, vector<1x1x32xf32>
      %66 = vector.shape_cast %65 : vector<1x1x32xf32> to vector<1x32xf32>
      %67 = vector.broadcast %64 : vector<26x1xf32> to vector<26x32xf32>
      %68 = vector.broadcast %66 : vector<1x32xf32> to vector<26x32xf32>
      %69 = arith.mulf %67, %68 : vector<26x32xf32>
      %70 = arith.addf %63, %69 : vector<26x32xf32>
      %71 = vector.extract_strided_slice %56 {offsets = [2, 0], sizes = [26, 1], strides = [1, 1]} : vector<28x1xf32> to vector<26x1xf32>
      %c8 = arith.constant 8 : index
      %c0_31 = arith.constant 0 : index
      %c0_32 = arith.constant 0 : index
      %72 = vector.load %arg2[%c8, %c0_31, %c0_32] : memref<9x1x32xf32, #tpu.memory_space<vmem>>, vector<1x1x32xf32>
      %73 = vector.shape_cast %72 : vector<1x1x32xf32> to vector<1x32xf32>
      %74 = vector.broadcast %71 : vector<26x1xf32> to vector<26x32xf32>
      %75 = vector.broadcast %73 : vector<1x32xf32> to vector<26x32xf32>
      %76 = arith.mulf %74, %75 : vector<26x32xf32>
      %77 = arith.addf %70, %76 : vector<26x32xf32>
      %c0_33 = arith.constant 0 : index
      %c0_34 = arith.constant 0 : index
      %78 = vector.load %arg3[%c0_33, %c0_34] : memref<1x32xf32, #tpu.memory_space<vmem>>, vector<1x32xf32>
      %79 = vector.broadcast %78 : vector<1x32xf32> to vector<26x32xf32>
      %80 = arith.addf %77, %79 : vector<26x32xf32>
      %cst_35 = arith.constant 0.000000e+00 : f32
      %81 = vector.broadcast %cst_35 : f32 to vector<26x32xf32>
      %82 = arith.maximumf %80, %81 : vector<26x32xf32>
      %83 = arith.truncf %82 : vector<26x32xf32> to vector<26x32xbf16>
      %84 = arith.index_cast %arg9 : i32 to index
      %c0_36 = arith.constant 0 : index
      %c0_37 = arith.constant 0 : index
      %85 = vector.load %arg7[%84, %c0_36, %c0_37] : memref<26x26x32xbf16, #tpu.memory_space<vmem>>, vector<1x26x32xbf16>
      %86 = vector.shape_cast %85 : vector<1x26x32xbf16> to vector<26x32xbf16>
      %87 = vector.shape_cast %83 : vector<26x32xbf16> to vector<1x26x32xbf16>
      tpu.vector_store %arg7[%84, %c0_36, %c0_37], %87 {strides = array<i32>} : memref<26x26x32xbf16, #tpu.memory_space<vmem>>, vector<1x26x32xbf16>,
    }
    %c26_i32_0 = arith.constant 26 : i32
    %c0_i32_1 = arith.constant 0 : i32
    %c12_i32 = arith.constant 12 : i32
    %1 = arith.addi %c0_i32_1, %c12_i32 : i32
    %c1_i32_2 = arith.constant 1 : i32
    scf.for %arg9 = %c0_i32_1 to %1 step %c1_i32_2  : i32 {
      %c2_i32 = arith.constant 2 : i32
      %2 = arith.muli %c2_i32, %arg9 : i32
      %cst = arith.constant 0.000000e+00 : f32
      %3 = vector.broadcast %cst : f32 to vector<24x64xf32>
      %c0_i32_4 = arith.constant 0 : i32
      %4 = arith.addi %2, %c0_i32_4 : i32
      %5 = arith.index_cast %4 : i32 to index
      %c0 = arith.constant 0 : index
      %c0_5 = arith.constant 0 : index
      %6 = vector.load %arg7[%5, %c0, %c0_5] : memref<26x26x32xbf16, #tpu.memory_space<vmem>>, vector<1x26x32xbf16>
      %7 = vector.shape_cast %6 : vector<1x26x32xbf16> to vector<26x32xbf16>
      %8 = vector.extract_strided_slice %7 {offsets = [0, 0], sizes = [24, 32], strides = [1, 1]} : vector<26x32xbf16> to vector<24x32xbf16>
      %c0_6 = arith.constant 0 : index
      %c0_7 = arith.constant 0 : index
      %c0_8 = arith.constant 0 : index
      %9 = vector.load %arg4[%c0_6, %c0_7, %c0_8] : memref<9x32x64xbf16, #tpu.memory_space<vmem>>, vector<1x32x64xbf16>
      %10 = vector.shape_cast %9 : vector<1x32x64xbf16> to vector<32x64xbf16>
      %cst_9 = arith.constant dense<0.000000e+00> : vector<24x64xf32>
      %11 = tpu.matmul %8, %10, %cst_9 {dimension_numbers = #tpu.dot_dimension_numbers<[1], [0], [0], [1], [0, 0, 1, 1], [], []>} : vector<24x32xbf16>, vector<32x64xbf16>, vector<24x64xf32> -> vector<24x64xf32>
      %12 = arith.addf %3, %11 : vector<24x64xf32>
      %13 = vector.extract_strided_slice %7 {offsets = [1, 0], sizes = [24, 32], strides = [1, 1]} : vector<26x32xbf16> to vector<24x32xbf16>
      %c1 = arith.constant 1 : index
      %c0_10 = arith.constant 0 : index
      %c0_11 = arith.constant 0 : index
      %14 = vector.load %arg4[%c1, %c0_10, %c0_11] : memref<9x32x64xbf16, #tpu.memory_space<vmem>>, vector<1x32x64xbf16>
      %15 = vector.shape_cast %14 : vector<1x32x64xbf16> to vector<32x64xbf16>
      %cst_12 = arith.constant dense<0.000000e+00> : vector<24x64xf32>
      %16 = tpu.matmul %13, %15, %cst_12 {dimension_numbers = #tpu.dot_dimension_numbers<[1], [0], [0], [1], [0, 0, 1, 1], [], []>} : vector<24x32xbf16>, vector<32x64xbf16>, vector<24x64xf32> -> vector<24x64xf32>
      %17 = arith.addf %12, %16 : vector<24x64xf32>
      %18 = vector.extract_strided_slice %7 {offsets = [2, 0], sizes = [24, 32], strides = [1, 1]} : vector<26x32xbf16> to vector<24x32xbf16>
      %c2 = arith.constant 2 : index
      %c0_13 = arith.constant 0 : index
      %c0_14 = arith.constant 0 : index
      %19 = vector.load %arg4[%c2, %c0_13, %c0_14] : memref<9x32x64xbf16, #tpu.memory_space<vmem>>, vector<1x32x64xbf16>
      %20 = vector.shape_cast %19 : vector<1x32x64xbf16> to vector<32x64xbf16>
      %cst_15 = arith.constant dense<0.000000e+00> : vector<24x64xf32>
      %21 = tpu.matmul %18, %20, %cst_15 {dimension_numbers = #tpu.dot_dimension_numbers<[1], [0], [0], [1], [0, 0, 1, 1], [], []>} : vector<24x32xbf16>, vector<32x64xbf16>, vector<24x64xf32> -> vector<24x64xf32>
      %22 = arith.addf %17, %21 : vector<24x64xf32>
      %c1_i32_16 = arith.constant 1 : i32
      %23 = arith.addi %2, %c1_i32_16 : i32
      %24 = arith.index_cast %23 : i32 to index
      %c0_17 = arith.constant 0 : index
      %c0_18 = arith.constant 0 : index
      %25 = vector.load %arg7[%24, %c0_17, %c0_18] : memref<26x26x32xbf16, #tpu.memory_space<vmem>>, vector<1x26x32xbf16>
      %26 = vector.shape_cast %25 : vector<1x26x32xbf16> to vector<26x32xbf16>
      %27 = vector.extract_strided_slice %26 {offsets = [0, 0], sizes = [24, 32], strides = [1, 1]} : vector<26x32xbf16> to vector<24x32xbf16>
      %c3 = arith.constant 3 : index
      %c0_19 = arith.constant 0 : index
      %c0_20 = arith.constant 0 : index
      %28 = vector.load %arg4[%c3, %c0_19, %c0_20] : memref<9x32x64xbf16, #tpu.memory_space<vmem>>, vector<1x32x64xbf16>
      %29 = vector.shape_cast %28 : vector<1x32x64xbf16> to vector<32x64xbf16>
      %cst_21 = arith.constant dense<0.000000e+00> : vector<24x64xf32>
      %30 = tpu.matmul %27, %29, %cst_21 {dimension_numbers = #tpu.dot_dimension_numbers<[1], [0], [0], [1], [0, 0, 1, 1], [], []>} : vector<24x32xbf16>, vector<32x64xbf16>, vector<24x64xf32> -> vector<24x64xf32>
      %31 = arith.addf %22, %30 : vector<24x64xf32>
      %32 = vector.extract_strided_slice %26 {offsets = [1, 0], sizes = [24, 32], strides = [1, 1]} : vector<26x32xbf16> to vector<24x32xbf16>
      %c4 = arith.constant 4 : index
      %c0_22 = arith.constant 0 : index
      %c0_23 = arith.constant 0 : index
      %33 = vector.load %arg4[%c4, %c0_22, %c0_23] : memref<9x32x64xbf16, #tpu.memory_space<vmem>>, vector<1x32x64xbf16>
      %34 = vector.shape_cast %33 : vector<1x32x64xbf16> to vector<32x64xbf16>
      %cst_24 = arith.constant dense<0.000000e+00> : vector<24x64xf32>
      %35 = tpu.matmul %32, %34, %cst_24 {dimension_numbers = #tpu.dot_dimension_numbers<[1], [0], [0], [1], [0, 0, 1, 1], [], []>} : vector<24x32xbf16>, vector<32x64xbf16>, vector<24x64xf32> -> vector<24x64xf32>
      %36 = arith.addf %31, %35 : vector<24x64xf32>
      %37 = vector.extract_strided_slice %26 {offsets = [2, 0], sizes = [24, 32], strides = [1, 1]} : vector<26x32xbf16> to vector<24x32xbf16>
      %c5 = arith.constant 5 : index
      %c0_25 = arith.constant 0 : index
      %c0_26 = arith.constant 0 : index
      %38 = vector.load %arg4[%c5, %c0_25, %c0_26] : memref<9x32x64xbf16, #tpu.memory_space<vmem>>, vector<1x32x64xbf16>
      %39 = vector.shape_cast %38 : vector<1x32x64xbf16> to vector<32x64xbf16>
      %cst_27 = arith.constant dense<0.000000e+00> : vector<24x64xf32>
      %40 = tpu.matmul %37, %39, %cst_27 {dimension_numbers = #tpu.dot_dimension_numbers<[1], [0], [0], [1], [0, 0, 1, 1], [], []>} : vector<24x32xbf16>, vector<32x64xbf16>, vector<24x64xf32> -> vector<24x64xf32>
      %41 = arith.addf %36, %40 : vector<24x64xf32>
      %c2_i32_28 = arith.constant 2 : i32
      %42 = arith.addi %2, %c2_i32_28 : i32
      %43 = arith.index_cast %42 : i32 to index
      %c0_29 = arith.constant 0 : index
      %c0_30 = arith.constant 0 : index
      %44 = vector.load %arg7[%43, %c0_29, %c0_30] : memref<26x26x32xbf16, #tpu.memory_space<vmem>>, vector<1x26x32xbf16>
      %45 = vector.shape_cast %44 : vector<1x26x32xbf16> to vector<26x32xbf16>
      %46 = vector.extract_strided_slice %45 {offsets = [0, 0], sizes = [24, 32], strides = [1, 1]} : vector<26x32xbf16> to vector<24x32xbf16>
      %c6 = arith.constant 6 : index
      %c0_31 = arith.constant 0 : index
      %c0_32 = arith.constant 0 : index
      %47 = vector.load %arg4[%c6, %c0_31, %c0_32] : memref<9x32x64xbf16, #tpu.memory_space<vmem>>, vector<1x32x64xbf16>
      %48 = vector.shape_cast %47 : vector<1x32x64xbf16> to vector<32x64xbf16>
      %cst_33 = arith.constant dense<0.000000e+00> : vector<24x64xf32>
      %49 = tpu.matmul %46, %48, %cst_33 {dimension_numbers = #tpu.dot_dimension_numbers<[1], [0], [0], [1], [0, 0, 1, 1], [], []>} : vector<24x32xbf16>, vector<32x64xbf16>, vector<24x64xf32> -> vector<24x64xf32>
      %50 = arith.addf %41, %49 : vector<24x64xf32>
      %51 = vector.extract_strided_slice %45 {offsets = [1, 0], sizes = [24, 32], strides = [1, 1]} : vector<26x32xbf16> to vector<24x32xbf16>
      %c7 = arith.constant 7 : index
      %c0_34 = arith.constant 0 : index
      %c0_35 = arith.constant 0 : index
      %52 = vector.load %arg4[%c7, %c0_34, %c0_35] : memref<9x32x64xbf16, #tpu.memory_space<vmem>>, vector<1x32x64xbf16>
      %53 = vector.shape_cast %52 : vector<1x32x64xbf16> to vector<32x64xbf16>
      %cst_36 = arith.constant dense<0.000000e+00> : vector<24x64xf32>
      %54 = tpu.matmul %51, %53, %cst_36 {dimension_numbers = #tpu.dot_dimension_numbers<[1], [0], [0], [1], [0, 0, 1, 1], [], []>} : vector<24x32xbf16>, vector<32x64xbf16>, vector<24x64xf32> -> vector<24x64xf32>
      %55 = arith.addf %50, %54 : vector<24x64xf32>
      %56 = vector.extract_strided_slice %45 {offsets = [2, 0], sizes = [24, 32], strides = [1, 1]} : vector<26x32xbf16> to vector<24x32xbf16>
      %c8 = arith.constant 8 : index
      %c0_37 = arith.constant 0 : index
      %c0_38 = arith.constant 0 : index
      %57 = vector.load %arg4[%c8, %c0_37, %c0_38] : memref<9x32x64xbf16, #tpu.memory_space<vmem>>, vector<1x32x64xbf16>
      %58 = vector.shape_cast %57 : vector<1x32x64xbf16> to vector<32x64xbf16>
      %cst_39 = arith.constant dense<0.000000e+00> : vector<24x64xf32>
      %59 = tpu.matmul %56, %58, %cst_39 {dimension_numbers = #tpu.dot_dimension_numbers<[1], [0], [0], [1], [0, 0, 1, 1], [], []>} : vector<24x32xbf16>, vector<32x64xbf16>, vector<24x64xf32> -> vector<24x64xf32>
      %60 = arith.addf %55, %59 : vector<24x64xf32>
      %c0_40 = arith.constant 0 : index
      %c0_41 = arith.constant 0 : index
      %61 = vector.load %arg5[%c0_40, %c0_41] : memref<1x64xf32, #tpu.memory_space<vmem>>, vector<1x64xf32>
      %62 = vector.broadcast %61 : vector<1x64xf32> to vector<24x64xf32>
      %63 = arith.addf %60, %62 : vector<24x64xf32>
      %c2_i32_42 = arith.constant 2 : i32
      %64 = arith.muli %c2_i32_42, %arg9 : i32
      %c1_i32_43 = arith.constant 1 : i32
      %65 = arith.addi %64, %c1_i32_43 : i32
      %cst_44 = arith.constant 0.000000e+00 : f32
      %66 = vector.broadcast %cst_44 : f32 to vector<24x64xf32>
      %c0_i32_45 = arith.constant 0 : i32
      %67 = arith.addi %65, %c0_i32_45 : i32
      %68 = arith.index_cast %67 : i32 to index
      %c0_46 = arith.constant 0 : index
      %c0_47 = arith.constant 0 : index
      %69 = vector.load %arg7[%68, %c0_46, %c0_47] : memref<26x26x32xbf16, #tpu.memory_space<vmem>>, vector<1x26x32xbf16>
      %70 = vector.shape_cast %69 : vector<1x26x32xbf16> to vector<26x32xbf16>
      %71 = vector.extract_strided_slice %70 {offsets = [0, 0], sizes = [24, 32], strides = [1, 1]} : vector<26x32xbf16> to vector<24x32xbf16>
      %c0_48 = arith.constant 0 : index
      %c0_49 = arith.constant 0 : index
      %c0_50 = arith.constant 0 : index
      %72 = vector.load %arg4[%c0_48, %c0_49, %c0_50] : memref<9x32x64xbf16, #tpu.memory_space<vmem>>, vector<1x32x64xbf16>
      %73 = vector.shape_cast %72 : vector<1x32x64xbf16> to vector<32x64xbf16>
      %cst_51 = arith.constant dense<0.000000e+00> : vector<24x64xf32>
      %74 = tpu.matmul %71, %73, %cst_51 {dimension_numbers = #tpu.dot_dimension_numbers<[1], [0], [0], [1], [0, 0, 1, 1], [], []>} : vector<24x32xbf16>, vector<32x64xbf16>, vector<24x64xf32> -> vector<24x64xf32>
      %75 = arith.addf %66, %74 : vector<24x64xf32>
      %76 = vector.extract_strided_slice %70 {offsets = [1, 0], sizes = [24, 32], strides = [1, 1]} : vector<26x32xbf16> to vector<24x32xbf16>
      %c1_52 = arith.constant 1 : index
      %c0_53 = arith.constant 0 : index
      %c0_54 = arith.constant 0 : index
      %77 = vector.load %arg4[%c1_52, %c0_53, %c0_54] : memref<9x32x64xbf16, #tpu.memory_space<vmem>>, vector<1x32x64xbf16>
      %78 = vector.shape_cast %77 : vector<1x32x64xbf16> to vector<32x64xbf16>
      %cst_55 = arith.constant dense<0.000000e+00> : vector<24x64xf32>
      %79 = tpu.matmul %76, %78, %cst_55 {dimension_numbers = #tpu.dot_dimension_numbers<[1], [0], [0], [1], [0, 0, 1, 1], [], []>} : vector<24x32xbf16>, vector<32x64xbf16>, vector<24x64xf32> -> vector<24x64xf32>
      %80 = arith.addf %75, %79 : vector<24x64xf32>
      %81 = vector.extract_strided_slice %70 {offsets = [2, 0], sizes = [24, 32], strides = [1, 1]} : vector<26x32xbf16> to vector<24x32xbf16>
      %c2_56 = arith.constant 2 : index
      %c0_57 = arith.constant 0 : index
      %c0_58 = arith.constant 0 : index
      %82 = vector.load %arg4[%c2_56, %c0_57, %c0_58] : memref<9x32x64xbf16, #tpu.memory_space<vmem>>, vector<1x32x64xbf16>
      %83 = vector.shape_cast %82 : vector<1x32x64xbf16> to vector<32x64xbf16>
      %cst_59 = arith.constant dense<0.000000e+00> : vector<24x64xf32>
      %84 = tpu.matmul %81, %83, %cst_59 {dimension_numbers = #tpu.dot_dimension_numbers<[1], [0], [0], [1], [0, 0, 1, 1], [], []>} : vector<24x32xbf16>, vector<32x64xbf16>, vector<24x64xf32> -> vector<24x64xf32>
      %85 = arith.addf %80, %84 : vector<24x64xf32>
      %c1_i32_60 = arith.constant 1 : i32
      %86 = arith.addi %65, %c1_i32_60 : i32
      %87 = arith.index_cast %86 : i32 to index
      %c0_61 = arith.constant 0 : index
      %c0_62 = arith.constant 0 : index
      %88 = vector.load %arg7[%87, %c0_61, %c0_62] : memref<26x26x32xbf16, #tpu.memory_space<vmem>>, vector<1x26x32xbf16>
      %89 = vector.shape_cast %88 : vector<1x26x32xbf16> to vector<26x32xbf16>
      %90 = vector.extract_strided_slice %89 {offsets = [0, 0], sizes = [24, 32], strides = [1, 1]} : vector<26x32xbf16> to vector<24x32xbf16>
      %c3_63 = arith.constant 3 : index
      %c0_64 = arith.constant 0 : index
      %c0_65 = arith.constant 0 : index
      %91 = vector.load %arg4[%c3_63, %c0_64, %c0_65] : memref<9x32x64xbf16, #tpu.memory_space<vmem>>, vector<1x32x64xbf16>
      %92 = vector.shape_cast %91 : vector<1x32x64xbf16> to vector<32x64xbf16>
      %cst_66 = arith.constant dense<0.000000e+00> : vector<24x64xf32>
      %93 = tpu.matmul %90, %92, %cst_66 {dimension_numbers = #tpu.dot_dimension_numbers<[1], [0], [0], [1], [0, 0, 1, 1], [], []>} : vector<24x32xbf16>, vector<32x64xbf16>, vector<24x64xf32> -> vector<24x64xf32>
      %94 = arith.addf %85, %93 : vector<24x64xf32>
      %95 = vector.extract_strided_slice %89 {offsets = [1, 0], sizes = [24, 32], strides = [1, 1]} : vector<26x32xbf16> to vector<24x32xbf16>
      %c4_67 = arith.constant 4 : index
      %c0_68 = arith.constant 0 : index
      %c0_69 = arith.constant 0 : index
      %96 = vector.load %arg4[%c4_67, %c0_68, %c0_69] : memref<9x32x64xbf16, #tpu.memory_space<vmem>>, vector<1x32x64xbf16>
      %97 = vector.shape_cast %96 : vector<1x32x64xbf16> to vector<32x64xbf16>
      %cst_70 = arith.constant dense<0.000000e+00> : vector<24x64xf32>
      %98 = tpu.matmul %95, %97, %cst_70 {dimension_numbers = #tpu.dot_dimension_numbers<[1], [0], [0], [1], [0, 0, 1, 1], [], []>} : vector<24x32xbf16>, vector<32x64xbf16>, vector<24x64xf32> -> vector<24x64xf32>
      %99 = arith.addf %94, %98 : vector<24x64xf32>
      %100 = vector.extract_strided_slice %89 {offsets = [2, 0], sizes = [24, 32], strides = [1, 1]} : vector<26x32xbf16> to vector<24x32xbf16>
      %c5_71 = arith.constant 5 : index
      %c0_72 = arith.constant 0 : index
      %c0_73 = arith.constant 0 : index
      %101 = vector.load %arg4[%c5_71, %c0_72, %c0_73] : memref<9x32x64xbf16, #tpu.memory_space<vmem>>, vector<1x32x64xbf16>
      %102 = vector.shape_cast %101 : vector<1x32x64xbf16> to vector<32x64xbf16>
      %cst_74 = arith.constant dense<0.000000e+00> : vector<24x64xf32>
      %103 = tpu.matmul %100, %102, %cst_74 {dimension_numbers = #tpu.dot_dimension_numbers<[1], [0], [0], [1], [0, 0, 1, 1], [], []>} : vector<24x32xbf16>, vector<32x64xbf16>, vector<24x64xf32> -> vector<24x64xf32>
      %104 = arith.addf %99, %103 : vector<24x64xf32>
      %c2_i32_75 = arith.constant 2 : i32
      %105 = arith.addi %65, %c2_i32_75 : i32
      %106 = arith.index_cast %105 : i32 to index
      %c0_76 = arith.constant 0 : index
      %c0_77 = arith.constant 0 : index
      %107 = vector.load %arg7[%106, %c0_76, %c0_77] : memref<26x26x32xbf16, #tpu.memory_space<vmem>>, vector<1x26x32xbf16>
      %108 = vector.shape_cast %107 : vector<1x26x32xbf16> to vector<26x32xbf16>
      %109 = vector.extract_strided_slice %108 {offsets = [0, 0], sizes = [24, 32], strides = [1, 1]} : vector<26x32xbf16> to vector<24x32xbf16>
      %c6_78 = arith.constant 6 : index
      %c0_79 = arith.constant 0 : index
      %c0_80 = arith.constant 0 : index
      %110 = vector.load %arg4[%c6_78, %c0_79, %c0_80] : memref<9x32x64xbf16, #tpu.memory_space<vmem>>, vector<1x32x64xbf16>
      %111 = vector.shape_cast %110 : vector<1x32x64xbf16> to vector<32x64xbf16>
      %cst_81 = arith.constant dense<0.000000e+00> : vector<24x64xf32>
      %112 = tpu.matmul %109, %111, %cst_81 {dimension_numbers = #tpu.dot_dimension_numbers<[1], [0], [0], [1], [0, 0, 1, 1], [], []>} : vector<24x32xbf16>, vector<32x64xbf16>, vector<24x64xf32> -> vector<24x64xf32>
      %113 = arith.addf %104, %112 : vector<24x64xf32>
      %114 = vector.extract_strided_slice %108 {offsets = [1, 0], sizes = [24, 32], strides = [1, 1]} : vector<26x32xbf16> to vector<24x32xbf16>
      %c7_82 = arith.constant 7 : index
      %c0_83 = arith.constant 0 : index
      %c0_84 = arith.constant 0 : index
      %115 = vector.load %arg4[%c7_82, %c0_83, %c0_84] : memref<9x32x64xbf16, #tpu.memory_space<vmem>>, vector<1x32x64xbf16>
      %116 = vector.shape_cast %115 : vector<1x32x64xbf16> to vector<32x64xbf16>
      %cst_85 = arith.constant dense<0.000000e+00> : vector<24x64xf32>
      %117 = tpu.matmul %114, %116, %cst_85 {dimension_numbers = #tpu.dot_dimension_numbers<[1], [0], [0], [1], [0, 0, 1, 1], [], []>} : vector<24x32xbf16>, vector<32x64xbf16>, vector<24x64xf32> -> vector<24x64xf32>
      %118 = arith.addf %113, %117 : vector<24x64xf32>
      %119 = vector.extract_strided_slice %108 {offsets = [2, 0], sizes = [24, 32], strides = [1, 1]} : vector<26x32xbf16> to vector<24x32xbf16>
      %c8_86 = arith.constant 8 : index
      %c0_87 = arith.constant 0 : index
      %c0_88 = arith.constant 0 : index
      %120 = vector.load %arg4[%c8_86, %c0_87, %c0_88] : memref<9x32x64xbf16, #tpu.memory_space<vmem>>, vector<1x32x64xbf16>
      %121 = vector.shape_cast %120 : vector<1x32x64xbf16> to vector<32x64xbf16>
      %cst_89 = arith.constant dense<0.000000e+00> : vector<24x64xf32>
      %122 = tpu.matmul %119, %121, %cst_89 {dimension_numbers = #tpu.dot_dimension_numbers<[1], [0], [0], [1], [0, 0, 1, 1], [], []>} : vector<24x32xbf16>, vector<32x64xbf16>, vector<24x64xf32> -> vector<24x64xf32>
      %123 = arith.addf %118, %122 : vector<24x64xf32>
      %c0_90 = arith.constant 0 : index
      %c0_91 = arith.constant 0 : index
      %124 = vector.load %arg5[%c0_90, %c0_91] : memref<1x64xf32, #tpu.memory_space<vmem>>, vector<1x64xf32>
      %125 = vector.broadcast %124 : vector<1x64xf32> to vector<24x64xf32>
      %126 = arith.addf %123, %125 : vector<24x64xf32>
      %127 = arith.maximumf %63, %126 : vector<24x64xf32>
      %c0_92 = arith.constant 0 : index
      %c0_93 = arith.constant 0 : index
      %128 = vector.load %arg8[%c0_92, %c0_93] : memref<24x64xf32, #tpu.memory_space<vmem>>, vector<24x64xf32>
      tpu.vector_store %arg8[%c0_92, %c0_93], %127 {strides = array<i32>} : memref<24x64xf32, #tpu.memory_space<vmem>>, vector<24x64xf32>,
      %c0_94 = arith.constant 0 : index
      %c0_95 = arith.constant 0 : index
      %129 = tpu.strided_load %arg8[%c0_94, %c0_95] {strides = array<i32: 2, 1>} : memref<24x64xf32, #tpu.memory_space<vmem>>, vector<12x64xf32>
      %c1_96 = arith.constant 1 : index
      %c0_97 = arith.constant 0 : index
      %130 = tpu.strided_load %arg8[%c1_96, %c0_97] {strides = array<i32: 2, 1>} : memref<24x64xf32, #tpu.memory_space<vmem>>, vector<12x64xf32>
      %131 = arith.maximumf %129, %130 : vector<12x64xf32>
      %132 = arith.truncf %131 : vector<12x64xf32> to vector<12x64xbf16>
      %c0_98 = arith.constant 0 : index
      %133 = arith.index_cast %arg9 : i32 to index
      %c0_99 = arith.constant 0 : index
      %c0_100 = arith.constant 0 : index
      %134 = vector.load %arg6[%c0_98, %133, %c0_99, %c0_100] : memref<1x12x12x64xbf16, #tpu.memory_space<vmem>>, vector<1x1x12x64xbf16>
      %135 = vector.shape_cast %134 : vector<1x1x12x64xbf16> to vector<12x64xbf16>
      %136 = vector.shape_cast %132 : vector<12x64xbf16> to vector<1x1x12x64xbf16>
      tpu.vector_store %arg6[%c0_98, %133, %c0_99, %c0_100], %136 {strides = array<i32>} : memref<1x12x12x64xbf16, #tpu.memory_space<vmem>>, vector<1x1x12x64xbf16>,
    }
    %c12_i32_3 = arith.constant 12 : i32
    return
  }
  func.func @transform_0(%arg0: i32) -> (i32, i32, i32, i32) {
    %c0_i32 = arith.constant 0 : i32
    %c0_i32_0 = arith.constant 0 : i32
    %c0_i32_1 = arith.constant 0 : i32
    %c0_i32_2 = arith.constant 0 : i32
    return %arg0, %c0_i32, %c0_i32_0, %c0_i32_1 : i32, i32, i32, i32
  }
  func.func @transform_1(%arg0: i32) -> (i32, i32, i32) {
    %c0_i32 = arith.constant 0 : i32
    %c0_i32_0 = arith.constant 0 : i32
    %c0_i32_1 = arith.constant 0 : i32
    %c0_i32_2 = arith.constant 0 : i32
    return %c0_i32, %c0_i32_0, %c0_i32_1 : i32, i32, i32
  }
  func.func @transform_2(%arg0: i32) -> (i32, i32) {
    %c0_i32 = arith.constant 0 : i32
    %c0_i32_0 = arith.constant 0 : i32
    %c0_i32_1 = arith.constant 0 : i32
    return %c0_i32, %c0_i32_0 : i32, i32
  }
  func.func @transform_3(%arg0: i32) -> (i32, i32, i32) {
    %c0_i32 = arith.constant 0 : i32
    %c0_i32_0 = arith.constant 0 : i32
    %c0_i32_1 = arith.constant 0 : i32
    %c0_i32_2 = arith.constant 0 : i32
    return %c0_i32, %c0_i32_0, %c0_i32_1 : i32, i32, i32
  }
  func.func @transform_4(%arg0: i32) -> (i32, i32) {
    %c0_i32 = arith.constant 0 : i32
    %c0_i32_0 = arith.constant 0 : i32
    %c0_i32_1 = arith.constant 0 : i32
    return %c0_i32, %c0_i32_0 : i32, i32
  }
  func.func @transform_5(%arg0: i32) -> (i32, i32, i32, i32) {
    %c0_i32 = arith.constant 0 : i32
    %c0_i32_0 = arith.constant 0 : i32
    %c0_i32_1 = arith.constant 0 : i32
    %c0_i32_2 = arith.constant 0 : i32
    return %arg0, %c0_i32, %c0_i32_0, %c0_i32_1 : i32, i32, i32, i32
  }
}

module attributes {stable_mosaic.version = 11 : i64} {
  func.func @_fc_kernel(%arg0: i32, %arg1: memref<8x9216xbf16, #tpu.memory_space<vmem>>, %arg2: memref<9216x128xbf16, #tpu.memory_space<vmem>>, %arg3: memref<1x128xf32, #tpu.memory_space<vmem>>, %arg4: memref<128x128xbf16, #tpu.memory_space<vmem>>, %arg5: memref<1x128xf32, #tpu.memory_space<vmem>>, %arg6: memref<8x128xf32, #tpu.memory_space<vmem>>) attributes {dimension_semantics = [#tpu.dimension_semantics<parallel>], iteration_bounds = array<i64: 1>, scalar_prefetch = 0 : i64, scratch_operands = 0 : i64, tpu.core_type = #tpu.core_type<tc>, window_params = [{transform_indices = @transform_0, window_bounds = array<i64: 8, 9216>}, {pipeline_mode = #tpu.pipeline_mode<synchronous>, transform_indices = @transform_1, window_bounds = array<i64: 9216, 128>}, {pipeline_mode = #tpu.pipeline_mode<synchronous>, transform_indices = @transform_2, window_bounds = array<i64: 1, 128>}, {pipeline_mode = #tpu.pipeline_mode<synchronous>, transform_indices = @transform_3, window_bounds = array<i64: 128, 128>}, {pipeline_mode = #tpu.pipeline_mode<synchronous>, transform_indices = @transform_4, window_bounds = array<i64: 1, 128>}, {transform_indices = @transform_5, window_bounds = array<i64: 8, 128>}]} {
    %c0 = arith.constant 0 : index
    %c0_0 = arith.constant 0 : index
    %0 = vector.load %arg1[%c0, %c0_0] : memref<8x9216xbf16, #tpu.memory_space<vmem>>, vector<8x9216xbf16>
    %c0_1 = arith.constant 0 : index
    %c0_2 = arith.constant 0 : index
    %1 = vector.load %arg2[%c0_1, %c0_2] : memref<9216x128xbf16, #tpu.memory_space<vmem>>, vector<9216x128xbf16>
    %cst = arith.constant dense<0.000000e+00> : vector<8x128xf32>
    %2 = tpu.matmul %0, %1, %cst {dimension_numbers = #tpu.dot_dimension_numbers<[1], [0], [0], [1], [0, 0, 1, 1], [], []>} : vector<8x9216xbf16>, vector<9216x128xbf16>, vector<8x128xf32> -> vector<8x128xf32>
    %c0_3 = arith.constant 0 : index
    %c0_4 = arith.constant 0 : index
    %3 = vector.load %arg3[%c0_3, %c0_4] : memref<1x128xf32, #tpu.memory_space<vmem>>, vector<1x128xf32>
    %4 = vector.broadcast %3 : vector<1x128xf32> to vector<8x128xf32>
    %5 = arith.addf %2, %4 : vector<8x128xf32>
    %cst_5 = arith.constant 0.000000e+00 : f32
    %6 = vector.broadcast %cst_5 : f32 to vector<8x128xf32>
    %7 = arith.maximumf %5, %6 : vector<8x128xf32>
    %8 = arith.truncf %7 : vector<8x128xf32> to vector<8x128xbf16>
    %c0_6 = arith.constant 0 : index
    %c0_7 = arith.constant 0 : index
    %9 = vector.load %arg4[%c0_6, %c0_7] : memref<128x128xbf16, #tpu.memory_space<vmem>>, vector<128x128xbf16>
    %cst_8 = arith.constant dense<0.000000e+00> : vector<8x128xf32>
    %10 = tpu.matmul %8, %9, %cst_8 {dimension_numbers = #tpu.dot_dimension_numbers<[1], [0], [0], [1], [0, 0, 1, 1], [], []>} : vector<8x128xbf16>, vector<128x128xbf16>, vector<8x128xf32> -> vector<8x128xf32>
    %c0_9 = arith.constant 0 : index
    %c0_10 = arith.constant 0 : index
    %11 = vector.load %arg5[%c0_9, %c0_10] : memref<1x128xf32, #tpu.memory_space<vmem>>, vector<1x128xf32>
    %12 = vector.broadcast %11 : vector<1x128xf32> to vector<8x128xf32>
    %13 = arith.addf %10, %12 : vector<8x128xf32>
    %cst_11 = arith.constant dense<0xFF800000> : vector<8xf32>
    %14 = vector.multi_reduction <maximumf>, %13, %cst_11 [1] : vector<8x128xf32> to vector<8xf32>
    %15 = vector.shape_cast %14 : vector<8xf32> to vector<8x1xf32>
    %16 = vector.broadcast %15 : vector<8x1xf32> to vector<8x128xf32>
    %17 = arith.subf %13, %16 : vector<8x128xf32>
    %18 = math.exp %17 : vector<8x128xf32>
    %cst_12 = arith.constant dense<0.000000e+00> : vector<8xf32>
    %19 = vector.multi_reduction <add>, %18, %cst_12 [1] : vector<8x128xf32> to vector<8xf32>
    %20 = vector.shape_cast %19 : vector<8xf32> to vector<8x1xf32>
    %21 = math.log %20 : vector<8x1xf32>
    %22 = vector.broadcast %21 : vector<8x1xf32> to vector<8x128xf32>
    %23 = arith.subf %17, %22 : vector<8x128xf32>
    %c0_13 = arith.constant 0 : index
    %c0_14 = arith.constant 0 : index
    %24 = vector.load %arg6[%c0_13, %c0_14] : memref<8x128xf32, #tpu.memory_space<vmem>>, vector<8x128xf32>
    tpu.vector_store %arg6[%c0_13, %c0_14], %23 {strides = array<i32>} : memref<8x128xf32, #tpu.memory_space<vmem>>, vector<8x128xf32>,
    return
  }
  func.func @transform_0(%arg0: i32) -> (i32, i32) {
    %c0_i32 = arith.constant 0 : i32
    %c0_i32_0 = arith.constant 0 : i32
    return %arg0, %c0_i32 : i32, i32
  }
  func.func @transform_1(%arg0: i32) -> (i32, i32) {
    %c0_i32 = arith.constant 0 : i32
    %c0_i32_0 = arith.constant 0 : i32
    %c0_i32_1 = arith.constant 0 : i32
    return %c0_i32, %c0_i32_0 : i32, i32
  }
  func.func @transform_2(%arg0: i32) -> (i32, i32) {
    %c0_i32 = arith.constant 0 : i32
    %c0_i32_0 = arith.constant 0 : i32
    %c0_i32_1 = arith.constant 0 : i32
    return %c0_i32, %c0_i32_0 : i32, i32
  }
  func.func @transform_3(%arg0: i32) -> (i32, i32) {
    %c0_i32 = arith.constant 0 : i32
    %c0_i32_0 = arith.constant 0 : i32
    %c0_i32_1 = arith.constant 0 : i32
    return %c0_i32, %c0_i32_0 : i32, i32
  }
  func.func @transform_4(%arg0: i32) -> (i32, i32) {
    %c0_i32 = arith.constant 0 : i32
    %c0_i32_0 = arith.constant 0 : i32
    %c0_i32_1 = arith.constant 0 : i32
    return %c0_i32, %c0_i32_0 : i32, i32
  }
  func.func @transform_5(%arg0: i32) -> (i32, i32) {
    %c0_i32 = arith.constant 0 : i32
    %c0_i32_0 = arith.constant 0 : i32
    return %arg0, %c0_i32 : i32, i32
  }
}

</mosaic_0001>

<bundles_post_ra>
// kernel: net_forward.2
= control target key start
LH: loop header
LB: loop body
LE: loop exit
PB: predicated region body
PF: predicated region fallthrough
CT: control target
= control target key end

     0   :  { %10 = vsyncpa [#allocation5], 0  ;;  %s3140_s0 = inlined_call_operand.vmem [shape: f32[2,28,28,1], index: 0, kind: input, shape index: {}]   ;;  %s3141_s1 = inlined_call_operand.hbm [shape: f32[9,1,32], index: 1, kind: input, shape index: {}]   ;;  %s3142_s2 = inlined_call_operand.hbm [shape: f32[1,32], index: 2, kind: input, shape index: {}]   ;;  %s3143_s3 = inlined_call_operand.hbm [shape: bf16[9,32,64], index: 3, kind: input, shape index: {}]   ;;  %s3144_s4 = inlined_call_operand.hbm [shape: f32[1,64], index: 4, kind: input, shape index: {}]   ;;  %s3145_s5 = inlined_call_operand.vmem [shape: bf16[2,12,12,64], index: 5, kind: output, shape index: {}]  }
   0x1   :  { %11 = vsyncpa [#allocation7], 0 }
   0x2   :  { %12 = vsyncpa [#allocation10], 0  ;;  %s2755_s18 = smov 0  }
   0x3 LB: > { %s2716_s19 = smov [#allocation6]   ;;  %s2761_s21 = sadd.s32 4294967295, %s2706_s18   ;;  %s2706_s18 = sphi %s2755_s18, %s18_s18  }
   0x4   : > { %s185_s20 = sshll.u32 %s2716_s19, 4  ;;  %p2102_p0 = scmp.ge.s32.totalorder %s2706_s18, 1  ;;  %s186_s20 = int_to_ptr.vmem [resolvable:$true] %s185_s20 }
   0x5   : > { %p159_p1 = scmp.lt.s32.totalorder %s2706_s18, 3  ;;  %p3146_p2 = scmp.eq.s32.totalorder %s2761_s21, 0 }
   0x6   : > { %s2717_s23 = smov [#allocation4]   ;;  %s2718_s26 = smov [#allocation8]  }
   0x7   : > { %p2766_p3 = pnand %p2102_p0, %p159_p1  ;;  %s171_s24 = sshll.u32 %s2717_s23, 4  ;;  %s2772_s24 = int_to_ptr.vmem [resolvable:$true] %s171_s24 }
   0x8   : > { %s195_s27 = sshll.u32 %s2718_s26, 4  ;;  %s2568_s30 = scalar_lea.hbm %s3142_s2, 16  ;;  %s2780_s27 = int_to_ptr.vmem [resolvable:$true] %s195_s27 }
   0x9   : > { %s3148_s22 = scalar_select %p2766_p3, 1, 0 }
   0xa   : > { %p2482_p4 = pneg %p2766_p3  ;;  %p2569_p6 = scmp.ne.s32.totalorder %s3142_s2, %s2568_s30 }
   0xb   : > { %p2575_p10 = scmp.lt.u32.totalorder %s2568_s30, %s3142_s2 }
   0xc   : > { %p2776_p5 = pnand %p3146_p2, %p2482_p4 }
   0xe   : > { %p2790_p7 = pneg %p2776_p5 }
  0x10   : > { %p2571_p8 = pnand %p2790_p7, %p2569_p6 }
  0x12   : > { %p2572_p9 = pneg %p2571_p8 }
  0x14   : > { %p2577_p11 = pnand %p2575_p10, %p2572_p9 }
  0x16   : > { %2580 = shalt.err (!%p2577_p11)
}
  0x17   : > { %s2581_s11 = scalar_lea.vmem %s186_s20, 16  ;;  %s2588_s12 = scalar_lea.vmem %s186_s20, 32 }
  0x18   : > { %p2582_p12 = scmp.ne.s32.totalorder %s186_s20, %s2581_s11  ;;  %p2589_p1 = scmp.lt.s32.totalorder %s186_s20, %s186_s20 }
  0x19   : > { %p2590_p4 = scmp.lt.s32.totalorder %s2588_s12, %s2581_s11 }
  0x1a   : > { %p2584_p13 = pnand %p2582_p12, %p2790_p7 }
  0x1b   : > { %p2591_p2 = por %p2590_p4, %p2589_p1 }
  0x1c   : > { %p2585_p0 = pneg %p2584_p13 }
  0x1e   : > { %p2592_p3 = pnand %p2591_p2, %p2585_p0 }
  0x20   : > { %2595 = shalt.err (!%p2592_p3)
}
  0x21   : > { %2488 = dma.hbm_to_vmem [thread:$0]  (!%p2776_p5), %s3142_s2, 16, %s186_s20, [#allocation7]  }
  0x22   : > { %s2596_s17 = scalar_lea.hbm %s3141_s1, 144 }
  0x23   : > { %p2597_p6 = scmp.ne.s32.totalorder %s3141_s1, %s2596_s17  ;;  %p2603_p2 = scmp.lt.u32.totalorder %s2596_s17, %s3141_s1 }
  0x25   : > { %p2599_p8 = pnand %p2597_p6, %p2790_p7 }
  0x27   : > { %p2600_p9 = pneg %p2599_p8 }
  0x29   : > { %p2605_p3 = pnand %p2603_p2, %p2600_p9 }
  0x2b   : > { %2608 = shalt.err (!%p2605_p3)
}
  0x2c   : > { %s2609_s20 = scalar_lea.vmem %s2772_s24, 144  ;;  %s2616_s29 = scalar_lea.vmem %s2772_s24, 160 }
  0x2d   : > { %p2610_p10 = scmp.ne.s32.totalorder %s2772_s24, %s2609_s20  ;;  %p2617_p13 = scmp.lt.s32.totalorder %s2772_s24, %s2772_s24 }
  0x2e   : > { %p2618_p0 = scmp.lt.s32.totalorder %s2616_s29, %s2609_s20 }
  0x2f   : > { %p2612_p11 = pnand %p2610_p10, %p2790_p7 }
  0x30   : > { %p2619_p1 = por %p2618_p0, %p2617_p13 }
  0x31   : > { %p2613_p12 = pneg %p2612_p11 }
  0x33   : > { %p2620_p4 = pnand %p2619_p1, %p2613_p12 }
  0x35   : > { %2623 = shalt.err (!%p2620_p4)
}
  0x36   : > { %s2719_s30 = smov 16   ;;  %s2720_s6 = smov 1  }
  0x37   : > { %2485 = dma.hbm_to_vmem [thread:$0]  (!%p2776_p5), %s3141_s1, 144, %s2772_s24, [#allocation5], %s2719_s30, %s2719_s30, %s2720_s6  }
  0x38   : > { %s2624_s12 = scalar_lea.hbm %s3143_s3, 2304 }
  0x39   : > { %p2625_p6 = scmp.ne.s32.totalorder %s3143_s3, %s2624_s12  ;;  %p2631_p2 = scmp.lt.u32.totalorder %s2624_s12, %s3143_s3 }
  0x3b   : > { %p2627_p8 = pnand %p2625_p6, %p2790_p7 }
  0x3d   : > { %p2628_p9 = pneg %p2627_p8 }
  0x3f   : > { %p2633_p3 = pnand %p2631_p2, %p2628_p9 }
  0x41   : > { %2636 = shalt.err (!%p2633_p3)
}
  0x42   : > { %s2637_s24 = scalar_lea.vmem %s2780_s27, 2304  ;;  %p2645_p13 = scmp.lt.s32.totalorder %s2780_s27, %s2780_s27 }
  0x43   : > { %p2638_p10 = scmp.ne.s32.totalorder %s2780_s27, %s2637_s24  ;;  %p2646_p0 = scmp.lt.s32.totalorder %s2637_s24, %s2637_s24 }
  0x45   : > { %p2640_p11 = pnand %p2638_p10, %p2790_p7  ;;  %p2647_p1 = por %p2646_p0, %p2645_p13 }
  0x47   : > { %p2641_p12 = pneg %p2640_p11 }
  0x49   : > { %p2648_p4 = pnand %p2647_p1, %p2641_p12 }
  0x4b   : > { %2651 = shalt.err (!%p2648_p4)
}
  0x4c   : > { %s2721_s17 = smov 64   ;;  %s2722_s19 = smov 4  }
  0x4d   : > { %2491 = dma.hbm_to_vmem [thread:$0]  (!%p2776_p5), %s3143_s3, 2304, %s2780_s27, [#allocation7], %s2721_s17, %s2721_s17, %s2722_s19  }
  0x4e   : > { %s2723_s28 = smov [#allocation9]   ;;  %s2652_s6 = scalar_lea.hbm %s3144_s4, 16 }
  0x4f   : > { %s209_s20 = sshll.u32 %s2723_s28, 4  ;;  %p2653_p6 = scmp.ne.s32.totalorder %s3144_s4, %s2652_s6  ;;  %s210_s20 = int_to_ptr.vmem [resolvable:$true] %s209_s20 }
  0x50   : > { %p2659_p2 = scmp.lt.u32.totalorder %s2652_s6, %s3144_s4 }
  0x51   : > { %p2655_p8 = pnand %p2653_p6, %p2790_p7 }
  0x53   : > { %p2656_p9 = pneg %p2655_p8 }
  0x55   : > { %p2661_p3 = pnand %p2659_p2, %p2656_p9 }
  0x57   : > { %2664 = shalt.err (!%p2661_p3)
}
  0x58   : > { %s2665_s27 = scalar_lea.vmem %s210_s20, 16  ;;  %s2672_s12 = scalar_lea.vmem %s210_s20, 32 }
  0x59   : > { %p2666_p10 = scmp.ne.s32.totalorder %s210_s20, %s2665_s27  ;;  %p2673_p13 = scmp.lt.s32.totalorder %s210_s20, %s210_s20 }
  0x5a   : > { %p2674_p0 = scmp.lt.s32.totalorder %s2672_s12, %s2665_s27 }
  0x5b   : > { %p2668_p11 = pnand %p2666_p10, %p2790_p7 }
  0x5c   : > { %p2675_p1 = por %p2674_p0, %p2673_p13 }
  0x5d   : > { %p2669_p12 = pneg %p2668_p11 }
  0x5f   : > { %p2676_p4 = pnand %p2675_p1, %p2669_p12 }
  0x61   : > { %2679 = shalt.err (!%p2676_p4)
}
  0x62   : > { %2494 = dma.hbm_to_vmem [thread:$0]  (!%p2776_p5), %s3144_s4, 16, %s210_s20, [#allocation10]  }
  0x63   : > { %p3151_p6 = scmp.ne.s32.totalorder %s3148_s22, 0 }
  0x64   : > { %p3152_p8 = scmp.eq.s32.totalorder (!%p3151_p6), %s2761_s21, 0 }
  0x65   : > { %230 = sbr.rel (%p3151_p6) target bundleno = 610 (0x262), region = 40 }
  0x6c   : > { %2693 = dma.done.wait (%p3152_p8), [#allocation5], 144   ;;  %p3153_p7 = pmov %p3152_p8 }
  0x6e   : > { %2695 = vsyncadd (%p3153_p7), [#allocation5], 4294967152  ;;  %p3154_p9 = pmov %p3153_p7 }
  0x6f   : > { %p3155_p2 = pmov %p3153_p7 }
  0x70   : > { %2697 = dma.done.wait (%p3154_p9), [#allocation7], 2320  }
  0x71   : > { %2699 = vsyncadd (%p3155_p2), [#allocation7], 4294964976  ;;  %p3156_p3 = pmov %p3155_p2 }
  0x72   : > { %p3157_p5 = pmov %p3155_p2 }
  0x73   : > { %2701 = dma.done.wait (%p3156_p3), [#allocation10], 16  }
  0x74   : > { %2703 = vsyncadd (%p3157_p5), [#allocation10], 4294967280  ;;  %p270_p10 = scmp.lt.s32.totalorder %s2761_s21, 1  ;;  %s2897_s23 = smov 0  }
  0x76   : > { %s3159_s21 = smov (!%p270_p10, %s2761_s21), 1 }
  0x77   : > { %s2464_s22 = smul.u32 896, %s3159_s21 }
  0x78   : > { %s2465_s25 = smul.u32 96, %s3159_s21 }
  0x79   : > { %s2890_s16 = scalar_lea.vmem %s3140_s0, %s2464_s22 }
  0x7a   : > { %s2895_s19 = scalar_lea.vmem %s3145_s5, %s2465_s25 }
  0x7b LB: >> { %v2724_v0 = vmov 0   ;;  %s2115_s21 = sshll.u32 %s2710_s23, 5  ;;  %v2117_v13 = vld [vmem:[#allocation4 + $0x1] ss:$0 sm:$0xff]  ;;  %v2118_v14 = vld [vmem:[#allocation4 + $0x2] ss:$0 sm:$0xff]  ;;  %s2710_s23 = sphi %s2897_s23, %s286_s23  }
  0x7c   : >> { %2537 = vset.pattern.permute.xlu1 %v2724_v0  ;;  %2536 = vset.pattern.permute.xlu0 %v2724_v0  ;;  %s288_s26 = scalar_lea.vmem %s2890_s16, %s2115_s21  ;;  %v2116_v17 = vld [vmem:[#allocation4] ss:$0 sm:$0xff]  ;;  %vm344_vm0 = vcmask 1046528   ;;  %vm376_vm1 = vcmask 1045504   ;;  %v2125_v30 = vld [vmem:[#allocation4 + $0x4] ss:$0 sm:$0xff] }
  0x7d   : >> { %v291_v1 = vld [vmem:[%s288_s26 + $0x10] sm:$0xff]  ;;  %v289_v2 = vld [vmem:[%s288_s26] sm:$0xff]  ;;  %v292_v3 = vld [vmem:[%s288_s26 + $0x18] sm:$0xf]  ;;  %s2239_s28 = sshll.u32 %s2710_s23, 4  ;;  %vm636_vm2 = vcmask 257024  }
  0x7e   : >> { %306 = vperm.xlu1 %2537, %v291_v1   ;;  %296 = vperm.xlu0 %2536, %v289_v2   ;;  %v290_v4 = vld [vmem:[%s288_s26 + $0x8] sm:$0xff]  ;;  %v2120_v6 = vld [vmem:[%s288_s26 + $0x20] sm:$0xff]  ;;  %v2123_v7 = vld [vmem:[%s288_s26 + $0x38] sm:$0xf]  ;;  %vm640_vm3 = vcmask 253952   ;;  %s635_s20 = scalar_lea.vmem [#allocation2], %s2239_s28 }
  0x7f   : >> { %v2121_v5 = vld [vmem:[%s288_s26 + $0x28] sm:$0xff]  ;;  %v2122_v8 = vld [vmem:[%s288_s26 + $0x30] sm:$0xff]  ;;  %v2128_v10 = vld [vmem:[%s288_s26 + $0x40] sm:$0xff]  ;;  %s286_s23 = sadd.s32 1, %s2710_s23  }
  0x80   : >> { %v2129_v9 = vld [vmem:[%s288_s26 + $0x48] sm:$0xff]  ;;  %v2131_v11 = vld [vmem:[%s288_s26 + $0x58] sm:$0xf]  ;;  %v2130_v12 = vld [vmem:[%s288_s26 + $0x50] sm:$0xff]  ;;  %p283_p11 = scmp.ge.s32.totalorder %s286_s23, 26  }
  0x81   : >> { %v2124_v35 = vld [vmem:[#allocation4 + $0x3] ss:$0 sm:$0xff]  ;;  %v2126_v40 = vld [vmem:[#allocation4 + $0x5] ss:$0 sm:$0xff]  ;;  %s2929_s29 = smov (%p283_p11), 0  }
  0x82   : >> { %311 = vperm.xlu1 %2537, %v292_v3   ;;  %301 = vperm.xlu0 %2536, %v290_v4  }
  0x86   : >> { %408 = vperm.xlu1 %2537, %v2121_v5   ;;  %403 = vperm.xlu0 %2536, %v2120_v6  }
  0x8a   : >> { %418 = vperm.xlu1 %2537, %v2123_v7   ;;  %413 = vperm.xlu0 %2536, %v2122_v8  }
  0x8e   : >> { %513 = vperm.xlu1 %2537, %v2129_v9   ;;  %508 = vperm.xlu0 %2536, %v2128_v10   ;;  %v2133_v9 = vld [vmem:[#allocation4 + $0x7] ss:$0 sm:$0xff] }
  0x92   : >> { %523 = vperm.xlu1 %2537, %v2131_v11   ;;  %518 = vperm.xlu0 %2536, %v2130_v12  }
  0xfd   : >> { %v307_v15 = vpop.permute.xlu1 %306  ;;  %v297_v16 = vpop.permute.xlu0 %296 }
  0xfe   : >> { %v338_v18 = vmul.f32 %v2117_v13, %v307_v15  ;;  %v370_v19 = vmul.f32 %v2118_v14, %v307_v15  ;;  %v336_v20 = vmul.f32 %v2117_v13, %v297_v16  ;;  %v368_v21 = vmul.f32 %v2118_v14, %v297_v16 }
  0xff   : >> { %v322_v26 = vmul.f32 %v2116_v17, %v307_v15  ;;  %v320_v27 = vmul.f32 %v2116_v17, %v297_v16 }
 0x100   : >> { %v348_v31 = vrot.slane %v338_v18, 1  ;;  %v380_v32 = vrot.slane %v370_v19, 2  ;;  %v345_v36 = vrot.slane %v336_v20, 1  ;;  %v377_v37 = vrot.slane %v368_v21, 2  ;;  %v2132_v20 = vld [vmem:[#allocation4 + $0x6] ss:$0 sm:$0xff] }
 0x101   : >> { %v312_v22 = vpop.permute.xlu1 %311  ;;  %v302_v23 = vpop.permute.xlu0 %301 }
 0x102   : >> { %v339_v24 = vmul.f32 %v2117_v13, %v312_v22  ;;  %v371_v25 = vmul.f32 %v2118_v14, %v312_v22  ;;  %v337_v28 = vmul.f32 %v2117_v13, %v302_v23  ;;  %v369_v29 = vmul.f32 %v2118_v14, %v302_v23  ;;  %v2134_v14 = vld [vmem:[#allocation4 + $0x8] ss:$0 sm:$0xff] }
 0x103   : >> { %v323_v33 = vmul.f32 %v2116_v17, %v312_v22  ;;  %v321_v45 = vmul.f32 %v2116_v17, %v302_v23 }
 0x104   : >> { %v350_v34 = vrot.slane %v339_v24, 1  ;;  %v346_v38 = vrot.slane %v337_v28, 1  ;;  %v378_v39 = vrot.slane %v369_v29, 2  ;;  %v382_v44 = vrot.slane %v371_v25, 2 }
 0x105   : >> { %v409_v41 = vpop.permute.xlu1 %408  ;;  %v404_v42 = vpop.permute.xlu0 %403 }
 0x106   : >> { %v359_v43 = vadd.f32 %v350_v34, %v323_v33  ;;  %v444_v46 = vmul.f32 %v2125_v30, %v409_v41  ;;  %v351_v47 = vsel %vm344_vm0, %v348_v31, %v350_v34  ;;  %v347_v48 = vsel %vm344_vm0, %v345_v36, %v346_v38 }
 0x107   : >> { %v349_v49 = vsel %vm344_vm0, %v346_v38, %v348_v31  ;;  %v428_v50 = vmul.f32 %v2124_v35, %v409_v41  ;;  %v381_v52 = vsel %vm376_vm1, %v378_v39, %v380_v32  ;;  %v475_v53 = vmul.f32 %v2126_v40, %v409_v41 }
 0x108   : >> { %v357_v51 = vadd.f32 %v349_v49, %v321_v45  ;;  %v356_v54 = vadd.f32 %v347_v48, %v320_v27  ;;  %v391_v55 = vadd.f32 %v382_v44, %v359_v43  ;;  %v452_v56 = vrot.slane %v444_v46, 1 }
 0x109   : >> { %v379_v57 = vsel %vm376_vm1, %v377_v37, %v378_v39  ;;  %v443_v58 = vmul.f32 %v2125_v30, %v404_v42  ;;  %v419_v59 = vpop.permute.xlu1 %418  ;;  %v414_v60 = vpop.permute.xlu0 %413  ;;  %v427_v62 = vmul.f32 %v2124_v35, %v404_v42  ;;  %v474_v63 = vmul.f32 %v2126_v40, %v404_v42 }
 0x10a   : >> { %v388_v61 = vadd.f32 %v379_v57, %v356_v54  ;;  %v430_v0 = vmul.f32 %v2124_v35, %v419_v59  ;;  %v389_v1 = vadd.f32 %v381_v52, %v357_v51  ;;  %v446_v3 = vmul.f32 %v2125_v30, %v419_v59 }
 0x10b   : >> { %v451_v2 = vrot.slane %v443_v58, 1  ;;  %v358_v4 = vadd.f32 %v351_v47, %v322_v26  ;;  %v483_v5 = vrot.slane %v475_v53, 2  ;;  %v482_v7 = vrot.slane %v474_v63, 2 }
 0x10c   : >> { %v431_v6 = vadd.f32 %v427_v62, %v388_v61  ;;  %v434_v8 = vadd.f32 %v430_v0, %v391_v55  ;;  %v456_v11 = vrot.slane %v446_v3, 1  ;;  %v477_v12 = vmul.f32 %v2126_v40, %v419_v59 }
 0x10d   : >> { %v453_v10 = vsel %vm344_vm0, %v451_v2, %v452_v56  ;;  %v383_v13 = vsel %vm376_vm1, %v380_v32, %v382_v44  ;;  %v514_v15 = vpop.permute.xlu1 %513  ;;  %v429_v18 = vmul.f32 %v2124_v35, %v414_v60  ;;  %v445_v19 = vmul.f32 %v2125_v30, %v414_v60  ;;  %v509_v21 = vpop.permute.xlu0 %508 }
 0x10e   : >> { %v462_v16 = vadd.f32 %v453_v10, %v431_v6  ;;  %v390_v17 = vadd.f32 %v383_v13, %v358_v4  ;;  %v432_v22 = vadd.f32 %v428_v50, %v389_v1  ;;  %v465_v23 = vadd.f32 %v456_v11, %v434_v8 }
 0x10f   : >> { %v476_v24 = vmul.f32 %v2126_v40, %v414_v60  ;;  %v549_v25 = vmul.f32 %v2133_v9, %v514_v15  ;;  %v454_v27 = vrot.slane %v445_v19, 1  ;;  %v580_v28 = vmul.f32 %v2134_v14, %v514_v15  ;;  %v2135_v60 = vld [vmem:[#allocation6] ss:$0 sm:$0xff] }
 0x110   : >> { %v433_v26 = vadd.f32 %v429_v18, %v390_v17  ;;  %v484_v29 = vsel %vm376_vm1, %v482_v7, %v483_v5  ;;  %v487_v31 = vrot.slane %v477_v12, 2  ;;  %v532_v34 = vmul.f32 %v2132_v20, %v509_v21 }
 0x111   : >> { %v485_v33 = vrot.slane %v476_v24, 2  ;;  %v493_v32 = vadd.f32 %v484_v29, %v462_v16  ;;  %v524_v36 = vpop.permute.xlu1 %523  ;;  %v455_v37 = vsel %vm344_vm0, %v452_v56, %v454_v27  ;;  %v457_v30 = vsel %vm344_vm0, %v454_v27, %v456_v11  ;;  %v519_v51 = vpop.permute.xlu0 %518 }
 0x112   : >> { %v557_v35 = vrot.slane %v549_v25, 1  ;;  %v548_v38 = vmul.f32 %v2133_v9, %v509_v21  ;;  %v464_v39 = vadd.f32 %v457_v30, %v433_v26  ;;  %v463_v41 = vadd.f32 %v455_v37, %v432_v22 }
 0x113   : >> { %v588_v40 = vrot.slane %v580_v28, 2  ;;  %v536_v42 = vadd.f32 %v532_v34, %v493_v32  ;;  %v579_v44 = vmul.f32 %v2134_v14, %v509_v21  ;;  %v496_v45 = vadd.f32 %v487_v31, %v465_v23 }
 0x114   : >> { %v556_v43 = vrot.slane %v548_v38, 1  ;;  %v535_v46 = vmul.f32 %v2132_v20, %v524_v36  ;;  %v486_v47 = vsel %vm376_vm1, %v483_v5, %v485_v33  ;;  %v551_v48 = vmul.f32 %v2133_v9, %v524_v36 }
 0x115   : >> { %v582_v49 = vmul.f32 %v2134_v14, %v524_v36  ;;  %v488_v50 = vsel %vm376_vm1, %v485_v33, %v487_v31  ;;  %v587_v53 = vrot.slane %v579_v44, 2  ;;  %v494_v56 = vadd.f32 %v486_v47, %v463_v41 }
 0x116   : >> { %v558_v52 = vsel %vm344_vm0, %v556_v43, %v557_v35  ;;  %v539_v54 = vadd.f32 %v535_v46, %v496_v45  ;;  %v495_v55 = vadd.f32 %v488_v50, %v464_v39  ;;  %v561_v58 = vrot.slane %v551_v48, 1 }
 0x117   : >> { %v567_v57 = vadd.f32 %v558_v52, %v536_v42  ;;  %v589_v59 = vsel %vm376_vm1, %v587_v53, %v588_v40  ;;  %v534_v61 = vmul.f32 %v2132_v20, %v519_v51  ;;  %v550_v62 = vmul.f32 %v2133_v9, %v519_v51 }
 0x118   : >> { %v581_v63 = vmul.f32 %v2134_v14, %v519_v51  ;;  %v533_v0 = vmul.f32 %v2132_v20, %v514_v15  ;;  %v570_v2 = vadd.f32 %v561_v58, %v539_v54  ;;  %v592_v3 = vrot.slane %v582_v49, 2 }
 0x119   : >> { %v598_v1 = vadd.f32 %v589_v59, %v567_v57  ;;  %v538_v4 = vadd.f32 %v534_v61, %v495_v55  ;;  %v559_v5 = vrot.slane %v550_v62, 1 }
 0x11a   : >> { %v590_v6 = vrot.slane %v581_v63, 2  ;;  %v537_v7 = vadd.f32 %v533_v0, %v494_v56  ;;  %v601_v8 = vadd.f32 %v592_v3, %v570_v2 }
 0x11b   : >> { %v609_v10 = vadd.f32 %v2135_v60, %v598_v1  ;;  %v560_v11 = vsel %vm344_vm0, %v557_v35, %v559_v5  ;;  %v562_v12 = vsel %vm344_vm0, %v559_v5, %v561_v58 }
 0x11c   : >> { %v612_v13 = vadd.f32 %v2135_v60, %v601_v8  ;;  %v568_v17 = vadd.f32 %v560_v11, %v537_v7  ;;  %v569_v9 = vadd.f32 %v562_v12, %v538_v4  ;;  %v591_v14 = vsel %vm376_vm1, %v588_v40, %v590_v6 }
 0x11d   : >> { %v613_v16 = vmax.f32 %v609_v10, 0.0  ;;  %v593_v15 = vsel %vm376_vm1, %v590_v6, %v592_v3 }
 0x11e   : >> { %v616_v18 = vmax.f32 %v612_v13, 0.0  ;;  %v599_v20 = vadd.f32 %v591_v14, %v568_v17  ;;  %v600_v21 = vadd.f32 %v593_v15, %v569_v9 }
 0x11f   : >> { %v2235_v19 = vpack.c.bf16 %v613_v16, %v613_v16 }
 0x120   : >> { %v2238_v22 = vpack.c.bf16 %v616_v18, %v616_v18  ;;  %v610_v23 = vadd.f32 %v2135_v60, %v599_v20  ;;  %v611_v24 = vadd.f32 %v2135_v60, %v600_v21  ;;  %285 = sbr.rel (!%p283_p11) target bundleno = 123 (0x7b), region = 129 }
 0x121   : >> { %637 = vst.msk [vmem:[%s635_s20] sm:$0xf] %vm636_vm2, %v2235_v19 }
 0x122   : >> { %641 = vst.msk [vmem:[%s635_s20 + $0xc] sm:$0x1] %vm640_vm3, %v2238_v22  ;;  %v614_v25 = vmax.f32 %v610_v23, 0.0  ;;  %v615_v26 = vmax.f32 %v611_v24, 0.0 }
 0x124   : >> { %v2236_v27 = vpack.c.bf16 %v614_v25, %v614_v25  ;;  %v2237_v28 = vpack.c.bf16 %v615_v26, %v615_v26 }
 0x126   : >> { %638 = vst.msk [vmem:[%s635_s20 + $0x4] sm:$0xf] %vm636_vm2, %v2236_v27  ;;  %639 = vst.msk [vmem:[%s635_s20 + $0x8] sm:$0xf] %vm636_vm2, %v2237_v28 }
 0x127 LB: >> { %v2934_v29 = vld [vmem:[#allocation8 + $0x10] sm:$0xff]   ;;  %v2936_v31 = vld [vmem:[#allocation8] sm:$0xff]   ;;  %vm703_vm4 = vcmask 261120   ;;  %v2939_v33 = vld [vmem:[#allocation8 + $0x18] sm:$0xff]   ;;  %s2241_s30 = sshll.u32 %s2714_s29, 5  ;;  %vm1941_vm6 = vcmask 523264   ;;  %s2714_s29 = sphi %s2929_s29, %s647_s29  }
 0x128   : >> { %2320 = vmatprep.subr.bf16.mxu0 %v2934_v29  ;;  %2328 = vmatprep.subr.bf16.mxu1 %v2936_v31  ;;  %v2944_v32 = vld [vmem:[#allocation8 + $0x8] sm:$0xff]   ;;  %s2948_s6 = scalar_lea.vmem [#allocation2], %s2241_s30  ;;  %vm675_vm5 = vsmask.f32 7424  ;;  %v2956_v41 = vld [vmem:[#allocation8 + $0x20] sm:$0xff]   ;;  %v2959_v45 = vld [vmem:[#allocation8 + $0x30] sm:$0xff]  }
 0x129   : >> { %2321 = vmatpush3.bf16.msra.mxu0 %v2934_v29  ;;  %2329 = vmatpush3.bf16.msra.mxu1 %v2936_v31  ;;  %v2963_v49 = vld [vmem:[#allocation8 + $0x38] sm:$0xff]   ;;  %v2966_v50 = vld [vmem:[#allocation8 + $0x28] sm:$0xff]   ;;  %v2977_v56 = vld [vmem:[#allocation8 + $0x50] sm:$0xff]   ;;  %s2247_s7 = sshll.u32 %s2714_s29, 3  ;;  %vm1966_vm7 = vcmask 517120   ;;  %vm1964_vm8 = vcmask 519168  }
 0x12a   : >> { %2322 = vmatprep.subr.bf16.mxu0 %v2939_v33  ;;  %2330 = vmatprep.subr.bf16.mxu1 %v2944_v32  ;;  %v2982_v57 = vld [vmem:[#allocation8 + $0x40] sm:$0xff]   ;;  %v2995_v63 = vld [vmem:[#allocation8 + $0x58] sm:$0xff]   ;;  %v3000_v2 = vld [vmem:[#allocation8 + $0x48] sm:$0xff]   ;;  %s1963_s9 = scalar_lea.vmem %s2895_s19, %s2247_s7  ;;  %s647_s29 = sadd.s32 1, %s2714_s29  }
 0x12b   : >> { %v3006_v7 = vld [vmem:[#allocation8 + $0x70] sm:$0xff]   ;;  %v3022_v9 = vld [vmem:[#allocation8 + $0x60] sm:$0xff]   ;;  %v3028_v18 = vld [vmem:[#allocation8 + $0x78] sm:$0xff]   ;;  %p644_p12 = scmp.ge.s32.totalorder %s647_s29, 12  }
 0x12c   : >> { %v3035_v24 = vld [vmem:[#allocation8 + $0x68] sm:$0xff]   ;;  %v3044_v28 = vld [vmem:[#allocation8 + $0x80] sm:$0xff]  }
 0x12d   : >> { %v2542_v34 = vld [vmem:[%s2948_s6] sm:$0xff]   ;;  %v654_v36 = vld [vmem:[%s2948_s6 + $0x8] sm:$0xf]  ;;  %v655_v37 = vld [vmem:[%s2948_s6 + $0xc] sm:$0x1]  ;;  %2323 = vmatpush3.bf16.msra.mxu0 %v2939_v33  ;;  %2331 = vmatpush3.bf16.msra.mxu1 %v2944_v32 }
 0x12e   : >> { %2332 = vmatprep.mubr.msk.bf16.mxu1 %vm703_vm4, %v2542_v34  ;;  %v2146_v30 = vcombine.low %v654_v36, %v655_v37  ;;  %v677_v35 = vshrl.u32 %v2542_v34, 16  ;;  %v679_v38 = vshll.u32 %v2542_v34, 16  ;;  %v2151_v39 = vcombine.low %v654_v36, %v654_v36  ;;  %2336 = vmatprep.subr.bf16.mxu0 %v2956_v41  ;;  %v2969_v51 = vld [vmem:[%s2948_s6 + $0x10] sm:$0xff]   ;;  %v2164_v55 = vld [vmem:[%s2948_s6 + $0x18] sm:$0xf]  ;;  %v3013_v12 = vld [vmem:[%s2948_s6 + $0x20] sm:$0xff]  }
 0x12f   : >> { %v830_v40 = vrot.slane %v2542_v34, 1  ;;  %2344 = vmatprep.subr.bf16.mxu1 %v2959_v45  ;;  %v1088_v58 = vrot.slane %v2969_v51, 1  ;;  %v2987_v59 = vcombine.low %v2164_v55, %v2164_v55  ;;  %v1000_v60 = vshrl.u32 %v2969_v51, 16  ;;  %v2165_v62 = vld [vmem:[%s2948_s6 + $0x1c] sm:$0x1] }
 0x130   : >> { %v681_v42 = vrot.slane %v679_v38, 1  ;;  %v684_v43 = vshll.u32 %v2146_v30, 16  ;;  %v688_v44 = vshrl.u32 %v2146_v30, 16  ;;  %v831_v46 = vrot.slane %v2146_v30, 1  ;;  %2333 = vmatmul.mubr.msk.bf16.vlgmr.msra.gmra.mrb[0].mxu1 %vm703_vm4, %v2151_v39  ;;  %v2185_v11 = vld [vmem:[%s2948_s6 + $0x28] sm:$0xf] }
 0x131   : >> { %2345 = vmatpush3.bf16.msra.mxu1 %v2959_v45  ;;  %2348 = vmatprep.mubr.msk.bf16.mxu1 %vm703_vm4, %v2969_v51  ;;  %v1002_v61 = vshll.u32 %v2969_v51, 16  ;;  %v2172_v0 = vcombine.low %v2164_v55, %v2165_v62  ;;  %v2186_v13 = vld [vmem:[%s2948_s6 + $0x2c] sm:$0x1]  ;;  %v1258_v14 = vshrl.u32 %v3013_v12, 16  ;;  %v1260_v15 = vshll.u32 %v3013_v12, 16 }
 0x132   : >> { %v682_v47 = vor.u32 %v681_v42, %v677_v35  ;;  %v686_v48 = vrot.slane %v684_v43, 1  ;;  %v832_v54 = vsel %vm344_vm0, %v830_v40, %v831_v46  ;;  %2346 = vmatprep.subr.bf16.mxu1 %v2963_v49  ;;  %v2193_v17 = vcombine.low %v2185_v11, %v2186_v13  ;;  %v3056_v30 = vld [vmem:[#allocation8 + $0x88] sm:$0xff]  }
 0x133   : >> { %v1004_v1 = vrot.slane %v1002_v61, 1  ;;  %v3002_v3 = vrot.slane %v2172_v0, 1  ;;  %v1007_v5 = vshll.u32 %v2172_v0, 16  ;;  %v1011_v6 = vshrl.u32 %v2172_v0, 16 }
 0x134   : >> { %v687_v52 = vsel %vm675_vm5, %v682_v47, %v686_v48  ;;  %v690_v53 = vor.u32 %v688_v44, %v686_v48  ;;  %v1265_v19 = vshll.u32 %v2193_v17, 16  ;;  %v1262_v21 = vrot.slane %v1260_v15, 1 }
 0x135   : >> { %2324 = vmatprep.mubr.msk.bf16.mxu0 %vm703_vm4, %v687_v52  ;;  %2347 = vmatpush3.bf16.msra.mxu1 %v2963_v49  ;;  %v1005_v4 = vor.u32 %v1004_v1, %v1000_v60  ;;  %v1090_v8 = vsel %vm344_vm0, %v1088_v58, %v3002_v3  ;;  %v1009_v10 = vrot.slane %v1007_v5, 1  ;;  %v1269_v23 = vshrl.u32 %v2193_v17, 16 }
 0x136   : >> { %2325 = vmatmul.mubr.msk.bf16.vlgmr.msra.gmra.mrb[0].mxu0 %vm703_vm4, %v690_v53  ;;  %2360 = vmatprep.subr.bf16.mxu1 %v2977_v56  ;;  %v1267_v22 = vrot.slane %v1265_v19, 1  ;;  %v1263_v25 = vor.u32 %v1262_v21, %v1258_v14  ;;  %v1346_v34 = vrot.slane %v3013_v12, 1  ;;  %v3047_v36 = vrot.slane %v2193_v17, 1 }
 0x137   : >> { %2337 = vmatpush3.bf16.msra.mxu0 %v2956_v41  ;;  %2340 = vmatprep.mubr.msk.bf16.mxu0 %vm703_vm4, %v832_v54  ;;  %v1010_v16 = vsel %vm675_vm5, %v1005_v4, %v1009_v10  ;;  %v1013_v20 = vor.u32 %v1011_v6, %v1009_v10  ;;  %v2188_v37 = vcombine.low %v2185_v11, %v2185_v11 }
 0x138   : >> { %2338 = vmatprep.subr.bf16.mxu0 %v2966_v50  ;;  %2349 = vmatmul.mubr.msk.bf16.vlgmr.msra.gmra.mrb[4].mxu1 %vm703_vm4, %v2987_v59  ;;  %v1268_v26 = vsel %vm675_vm5, %v1263_v25, %v1267_v22  ;;  %v1271_v27 = vor.u32 %v1269_v23, %v1267_v22  ;;  %v1348_v35 = vsel %vm344_vm0, %v1346_v34, %v3047_v36 }
 0x139   : >> { %2361 = vmatpush3.bf16.msra.mxu1 %v2977_v56  ;;  %2364 = vmatprep.mubr.msk.bf16.mxu1 %vm703_vm4, %v1090_v8 }
 0x13a   : >> { %2362 = vmatprep.subr.bf16.mxu1 %v2995_v63 }
 0x13b   : >> { %2339 = vmatpush3.bf16.msra.mxu0 %v2966_v50 }
 0x13c   : >> { %2352 = vmatprep.subr.bf16.mxu0 %v2982_v57 }
 0x13d   : >> { %2363 = vmatpush3.bf16.msra.mxu1 %v2995_v63 }
 0x13e   : >> { %2341 = vmatmul.mubr.msk.bf16.vlgmr.msra.gmra.mrb[4].mxu0 %vm703_vm4, %v831_v46  ;;  %2376 = vmatprep.subr.bf16.mxu1 %v3006_v7 }
 0x13f   : >> { %2353 = vmatpush3.bf16.msra.mxu0 %v2982_v57  ;;  %2356 = vmatprep.mubr.msk.bf16.mxu0 %vm703_vm4, %v1010_v16 }
 0x140   : >> { %2354 = vmatprep.subr.bf16.mxu0 %v3000_v2  ;;  %2365 = vmatmul.mubr.msk.bf16.vlgmr.msra.gmra.mrb[8].mxu1 %vm703_vm4, %v3002_v3 }
 0x141   : >> { %2377 = vmatpush3.bf16.msra.mxu1 %v3006_v7  ;;  %2380 = vmatprep.mubr.msk.bf16.mxu1 %vm703_vm4, %v1268_v26 }
 0x142   : >> { %2378 = vmatprep.subr.bf16.mxu1 %v3028_v18 }
 0x143   : >> { %2355 = vmatpush3.bf16.msra.mxu0 %v3000_v2 }
 0x144   : >> { %2368 = vmatprep.subr.bf16.mxu0 %v3022_v9 }
 0x145   : >> { %2379 = vmatpush3.bf16.msra.mxu1 %v3028_v18 }
 0x146   : >> { %2357 = vmatmul.mubr.msk.bf16.vlgmr.msra.gmra.mrb[8].mxu0 %vm703_vm4, %v1013_v20  ;;  %2392 = vmatprep.subr.bf16.mxu1 %v2934_v29 }
 0x147   : >> { %2369 = vmatpush3.bf16.msra.mxu0 %v3022_v9  ;;  %2372 = vmatprep.mubr.msk.bf16.mxu0 %vm703_vm4, %v3013_v12 }
 0x148   : >> { %2370 = vmatprep.subr.bf16.mxu0 %v3035_v24  ;;  %2381 = vmatmul.mubr.msk.bf16.vlgmr.msra.gmra.mrb[12].mxu1 %vm703_vm4, %v1271_v27 }
 0x149   : >> { %2393 = vmatpush3.bf16.msra.mxu1 %v2934_v29  ;;  %2396 = vmatprep.mubr.msk.bf16.mxu1 %vm703_vm4, %v1010_v16  ;;  %v2220_v29 = vld [vmem:[%s2948_s6 + $0x3c] sm:$0x1] }
 0x14a   : >> { %2394 = vmatprep.subr.bf16.mxu1 %v2939_v33 }
 0x14b   : >> { %2371 = vmatpush3.bf16.msra.mxu0 %v3035_v24 }
 0x14c   : >> { %2384 = vmatprep.subr.bf16.mxu0 %v3044_v28 }
 0x14d   : >> { %2395 = vmatpush3.bf16.msra.mxu1 %v2939_v33  ;;  %v2219_v33 = vld [vmem:[%s2948_s6 + $0x38] sm:$0xf] }
 0x14e   : >> { %2373 = vmatmul.mubr.msk.bf16.vlgmr.msra.gmra.mrb[12].mxu0 %vm703_vm4, %v2188_v37  ;;  %2408 = vmatprep.subr.bf16.mxu1 %v2956_v41  ;;  %v2222_v44 = vcombine.low %v2219_v33, %v2219_v33 }
 0x14f   : >> { %2385 = vmatpush3.bf16.msra.mxu0 %v3044_v28  ;;  %2388 = vmatprep.mubr.msk.bf16.mxu0 %vm703_vm4, %v1348_v35 }
 0x150   : >> { %2386 = vmatprep.subr.bf16.mxu0 %v3056_v30  ;;  %2397 = vmatmul.mubr.msk.bf16.vlgmr.msra.gmra.mrb[16].mxu1 %vm703_vm4, %v1013_v20 }
 0x151   : >> { %2409 = vmatpush3.bf16.msra.mxu1 %v2956_v41  ;;  %2412 = vmatprep.mubr.msk.bf16.mxu1 %vm703_vm4, %v1090_v8 }
 0x152   : >> { %2410 = vmatprep.subr.bf16.mxu1 %v2966_v50 }
 0x153   : >> { %2387 = vmatpush3.bf16.msra.mxu0 %v3056_v30 }
 0x154   : >> { %2400 = vmatprep.subr.bf16.mxu0 %v2936_v31 }
 0x155   : >> { %2411 = vmatpush3.bf16.msra.mxu1 %v2966_v50 }
 0x156   : >> { %2389 = vmatmul.mubr.msk.bf16.vlgmr.msra.gmra.mrb[16].mxu0 %vm703_vm4, %v3047_v36  ;;  %2424 = vmatprep.subr.bf16.mxu1 %v2982_v57 }
 0x157   : >> { %2401 = vmatpush3.bf16.msra.mxu0 %v2936_v31  ;;  %2404 = vmatprep.mubr.msk.bf16.mxu0 %vm703_vm4, %v2969_v51  ;;  %v2565_v31 = vld [vmem:[%s2948_s6 + $0x30] sm:$0xff]  }
 0x158   : >> { %2402 = vmatprep.subr.bf16.mxu0 %v2944_v32  ;;  %2413 = vmatmul.mubr.msk.bf16.vlgmr.msra.gmra.mrb[20].mxu1 %vm703_vm4, %v3002_v3  ;;  %v1806_v38 = vshll.u32 %v2565_v31, 16  ;;  %v1804_v39 = vshrl.u32 %v2565_v31, 16  ;;  %v1875_v42 = vrot.slane %v2565_v31, 1 }
 0x159   : >> { %2425 = vmatpush3.bf16.msra.mxu1 %v2982_v57  ;;  %2428 = vmatprep.mubr.msk.bf16.mxu1 %vm703_vm4, %v1268_v26 }
 0x15a   : >> { %2426 = vmatprep.subr.bf16.mxu1 %v3000_v2  ;;  %v1808_v41 = vrot.slane %v1806_v38, 1 }
 0x15b   : >> { %2403 = vmatpush3.bf16.msra.mxu0 %v2944_v32  ;;  %v2225_v32 = vcombine.low %v2219_v33, %v2220_v29 }
 0x15c   : >> { %2416 = vmatprep.subr.bf16.mxu0 %v2959_v45 }
 0x15d   : >> { %2427 = vmatpush3.bf16.msra.mxu1 %v3000_v2  ;;  %v1811_v40 = vshll.u32 %v2225_v32, 16  ;;  %v1876_v43 = vrot.slane %v2225_v32, 1 }
 0x15e   : >> { %2405 = vmatmul.mubr.msk.bf16.vlgmr.msra.gmra.mrb[20].mxu0 %vm703_vm4, %v2987_v59  ;;  %2440 = vmatprep.subr.bf16.mxu1 %v3022_v9 }
 0x15f   : >> { %2417 = vmatpush3.bf16.msra.mxu0 %v2959_v45  ;;  %2420 = vmatprep.mubr.msk.bf16.mxu0 %vm703_vm4, %v3013_v12  ;;  %v1809_v45 = vor.u32 %v1808_v41, %v1804_v39  ;;  %v1813_v46 = vrot.slane %v1811_v40, 1  ;;  %v1877_v47 = vsel %vm344_vm0, %v1875_v42, %v1876_v43 }
 0x160   : >> { %2418 = vmatprep.subr.bf16.mxu0 %v2963_v49  ;;  %2429 = vmatmul.mubr.msk.bf16.vlgmr.msra.gmra.mrb[24].mxu1 %vm703_vm4, %v1271_v27 }
 0x161   : >> { %2441 = vmatpush3.bf16.msra.mxu1 %v3022_v9  ;;  %2444 = vmatprep.mubr.msk.bf16.mxu1 %vm703_vm4, %v2565_v31  ;;  %v1814_v48 = vsel %vm675_vm5, %v1809_v45, %v1813_v46 }
 0x162   : >> { %2442 = vmatprep.subr.bf16.mxu1 %v3035_v24 }
 0x163   : >> { %2419 = vmatpush3.bf16.msra.mxu0 %v2963_v49  ;;  %v1815_v49 = vshrl.u32 %v2225_v32, 16 }
 0x164   : >> { %2432 = vmatprep.subr.bf16.mxu0 %v2977_v56 }
 0x165   : >> { %2443 = vmatpush3.bf16.msra.mxu1 %v3035_v24  ;;  %v1817_v50 = vor.u32 %v1815_v49, %v1813_v46 }
 0x166   : >> { %2421 = vmatmul.mubr.msk.bf16.vlgmr.msra.gmra.mrb[24].mxu0 %vm703_vm4, %v2188_v37  ;;  %2456 = vmatprep.subr.bf16.mxu1 %v3044_v28 }
 0x167   : >> { %2433 = vmatpush3.bf16.msra.mxu0 %v2977_v56  ;;  %2436 = vmatprep.mubr.msk.bf16.mxu0 %vm703_vm4, %v1348_v35 }
 0x168   : >> { %2434 = vmatprep.subr.bf16.mxu0 %v2995_v63  ;;  %2445 = vmatmul.mubr.msk.bf16.vlgmr.msra.gmra.mrb[28].mxu1 %vm703_vm4, %v2222_v44 }
 0x169   : >> { %2457 = vmatpush3.bf16.msra.mxu1 %v3044_v28  ;;  %2460 = vmatprep.mubr.msk.bf16.mxu1 %vm703_vm4, %v1877_v47 }
 0x16a   : >> { %2458 = vmatprep.subr.bf16.mxu1 %v3056_v30 }
 0x16b   : >> { %2435 = vmatpush3.bf16.msra.mxu0 %v2995_v63 }
 0x16c   : >> { %2448 = vmatprep.subr.bf16.mxu0 %v3006_v7 }
 0x16d   : >> { %2459 = vmatpush3.bf16.msra.mxu1 %v3056_v30 }
 0x16e   : >> { %2437 = vmatmul.mubr.msk.bf16.vlgmr.msra.gmra.mrb[28].mxu0 %vm703_vm4, %v3047_v36 }
 0x16f   : >> { %2449 = vmatpush3.bf16.msra.mxu0 %v3006_v7  ;;  %2452 = vmatprep.mubr.msk.bf16.mxu0 %vm703_vm4, %v1814_v48 }
 0x170   : >> { %2450 = vmatprep.subr.bf16.mxu0 %v3028_v18  ;;  %2461 = vmatmul.mubr.msk.bf16.vlgmr.msra.gmra.mrb[32].mxu1 %vm703_vm4, %v1876_v43 }
 0x173   : >> { %2451 = vmatpush3.bf16.msra.mxu0 %v3028_v18 }
 0x176   : >> { %2453 = vmatmul.mubr.msk.bf16.vlgmr.msra.gmra.mrb[32].mxu0 %vm703_vm4, %v1817_v50 }
 0x203   : >> { %v2334_v51 = vpop.f32.mrb[0].mxu1 }
 0x204   : >> { %v810_v52 = vpop.f32.mrb[1].mxu1 }
 0x205   : >> { %v2335_v53 = vpop.f32.mrb[2].mxu1 }
 0x206   : >> { %v813_v55 = vpop.f32.mrb[3].mxu1 }
 0x209   : >> { %v2326_v54 = vpop.f32.mrb[0].mxu0 }
 0x20a   : >> { %v819_v56 = vadd.f32 %v2334_v51, %v2326_v54  ;;  %v744_v57 = vpop.f32.mrb[1].mxu0 }
 0x20b   : >> { %v811_v58 = vadd.f32 %v810_v52, %v744_v57  ;;  %v2327_v59 = vpop.f32.mrb[2].mxu0  ;;  %v2350_v62 = vpop.f32.mrb[4].mxu1 }
 0x20c   : >> { %v747_v60 = vpop.f32.mrb[3].mxu0  ;;  %v975_v63 = vpop.f32.mrb[5].mxu1 }
 0x20d   : >> { %v814_v61 = vadd.f32 %v813_v55, %v747_v60  ;;  %v2351_v0 = vpop.f32.mrb[6].mxu1 }
 0x20e   : >> { %v978_v2 = vpop.f32.mrb[7].mxu1 }
 0x211   : >> { %v2342_v1 = vpop.f32.mrb[4].mxu0 }
 0x212   : >> { %v901_v3 = vadd.f32 %v2342_v1, %v819_v56  ;;  %v885_v4 = vpop.f32.mrb[5].mxu0 }
 0x213   : >> { %v899_v5 = vadd.f32 %v885_v4, %v811_v58  ;;  %v2343_v6 = vpop.f32.mrb[6].mxu0  ;;  %v2366_v12 = vpop.f32.mrb[8].mxu1 }
 0x214   : >> { %v888_v7 = vpop.f32.mrb[7].mxu0  ;;  %v991_v8 = vadd.f32 %v2350_v62, %v901_v3  ;;  %v1143_v13 = vpop.f32.mrb[9].mxu1 }
 0x215   : >> { %v900_v10 = vadd.f32 %v888_v7, %v814_v61  ;;  %v989_v11 = vadd.f32 %v975_v63, %v899_v5  ;;  %v2367_v17 = vpop.f32.mrb[10].mxu1 }
 0x216   : >> { %v1146_v14 = vpop.f32.mrb[11].mxu1 }
 0x217   : >> { %v990_v16 = vadd.f32 %v978_v2, %v900_v10 }
 0x219   : >> { %v2358_v9 = vpop.f32.mrb[8].mxu0 }
 0x21a   : >> { %v1082_v15 = vadd.f32 %v2358_v9, %v991_v8  ;;  %v1066_v18 = vpop.f32.mrb[9].mxu0 }
 0x21b   : >> { %v1080_v19 = vadd.f32 %v1066_v18, %v989_v11  ;;  %v2359_v20 = vpop.f32.mrb[10].mxu0  ;;  %v2382_v25 = vpop.f32.mrb[12].mxu1 }
 0x21c   : >> { %v1069_v21 = vpop.f32.mrb[11].mxu0  ;;  %v1159_v22 = vadd.f32 %v2366_v12, %v1082_v15  ;;  %v1324_v26 = vpop.f32.mrb[13].mxu1 }
 0x21d   : >> { %v1081_v23 = vadd.f32 %v1069_v21, %v990_v16  ;;  %v1157_v24 = vadd.f32 %v1143_v13, %v1080_v19  ;;  %v2383_v28 = vpop.f32.mrb[14].mxu1 }
 0x21e   : >> { %v1327_v36 = vpop.f32.mrb[15].mxu1 }
 0x21f   : >> { %v1158_v27 = vadd.f32 %v1146_v14, %v1081_v23 }
 0x221   : >> { %v2374_v34 = vpop.f32.mrb[12].mxu0 }
 0x222   : >> { %v1249_v37 = vadd.f32 %v2374_v34, %v1159_v22  ;;  %v1233_v30 = vpop.f32.mrb[13].mxu0 }
 0x223   : >> { %v1247_v35 = vadd.f32 %v1233_v30, %v1157_v24  ;;  %v2375_v29 = vpop.f32.mrb[14].mxu0  ;;  %v2398_v39 = vpop.f32.mrb[16].mxu1 }
 0x224   : >> { %v1236_v31 = vpop.f32.mrb[15].mxu0  ;;  %v1340_v33 = vadd.f32 %v2382_v25, %v1249_v37  ;;  %v1462_v41 = vpop.f32.mrb[17].mxu1 }
 0x225   : >> { %v1248_v32 = vadd.f32 %v1236_v31, %v1158_v27  ;;  %v1338_v38 = vadd.f32 %v1324_v26, %v1247_v35  ;;  %v2399_v42 = vpop.f32.mrb[18].mxu1 }
 0x226   : >> { %v1465_v44 = vpop.f32.mrb[19].mxu1 }
 0x227   : >> { %v1339_v40 = vadd.f32 %v1327_v36, %v1248_v32 }
 0x229   : >> { %v2390_v43 = vpop.f32.mrb[16].mxu0 }
 0x22a   : >> { %v1417_v45 = vadd.f32 %v2390_v43, %v1340_v33  ;;  %v1401_v46 = vpop.f32.mrb[17].mxu0  ;;  %v2202_v33 = vld [vmem:[#allocation9] ss:$0 sm:$0xff] }
 0x22b   : >> { %v1415_v47 = vadd.f32 %v1401_v46, %v1338_v38  ;;  %v2391_v48 = vpop.f32.mrb[18].mxu0  ;;  %v2414_v51 = vpop.f32.mrb[20].mxu1 }
 0x22c   : >> { %v1404_v49 = vpop.f32.mrb[19].mxu0  ;;  %v1558_v52 = vpop.f32.mrb[21].mxu1  ;;  %v1427_v43 = vadd.f32 %v2202_v33, %v1417_v45 }
 0x22d   : >> { %v3129_v50 = vadd.f32 %v1404_v49, %v1339_v40  ;;  %v2415_v53 = vpop.f32.mrb[22].mxu1  ;;  %v1425_v46 = vadd.f32 %v2202_v33, %v1415_v47 }
 0x22e   : >> { %v1561_v55 = vpop.f32.mrb[23].mxu1 }
 0x231   : >> { %v2406_v54 = vpop.f32.mrb[20].mxu0 }
 0x232   : >> { %v1519_v56 = vadd.f32 %v2406_v54, %v2398_v39  ;;  %v1510_v57 = vpop.f32.mrb[21].mxu0 }
 0x233   : >> { %v1511_v58 = vadd.f32 %v1510_v57, %v1462_v41  ;;  %v2407_v59 = vpop.f32.mrb[22].mxu0  ;;  %v2430_v0 = vpop.f32.mrb[24].mxu1 }
 0x234   : >> { %v1513_v60 = vpop.f32.mrb[23].mxu0  ;;  %v1574_v61 = vadd.f32 %v2414_v51, %v1519_v56  ;;  %v1660_v1 = vpop.f32.mrb[25].mxu1 }
 0x235   : >> { %v1514_v62 = vadd.f32 %v1513_v60, %v1465_v44  ;;  %v1572_v63 = vadd.f32 %v1558_v52, %v1511_v58  ;;  %v2431_v3 = vpop.f32.mrb[26].mxu1  ;;  %v1426_v52 = vadd.f32 %v2202_v33, %v3129_v50 }
 0x236   : >> { %v1663_v5 = vpop.f32.mrb[27].mxu1 }
 0x237   : >> { %v1573_v2 = vadd.f32 %v1561_v55, %v1514_v62 }
 0x239   : >> { %v2422_v4 = vpop.f32.mrb[24].mxu0 }
 0x23a   : >> { %v1625_v6 = vadd.f32 %v2422_v4, %v1574_v61  ;;  %v1609_v7 = vpop.f32.mrb[25].mxu0 }
 0x23b   : >> { %v1623_v8 = vadd.f32 %v1609_v7, %v1572_v63  ;;  %v2423_v10 = vpop.f32.mrb[26].mxu0  ;;  %v2446_v17 = vpop.f32.mrb[28].mxu1 }
 0x23c   : >> { %v1612_v11 = vpop.f32.mrb[27].mxu0  ;;  %v1676_v12 = vadd.f32 %v2430_v0, %v1625_v6  ;;  %v1784_v9 = vpop.f32.mrb[29].mxu1 }
 0x23d   : >> { %v1624_v13 = vadd.f32 %v1612_v11, %v1573_v2  ;;  %v1674_v16 = vadd.f32 %v1660_v1, %v1623_v8  ;;  %v2447_v15 = vpop.f32.mrb[30].mxu1 }
 0x23e   : >> { %v1787_v19 = vpop.f32.mrb[31].mxu1 }
 0x23f   : >> { %v1675_v14 = vadd.f32 %v1663_v5, %v1624_v13 }
 0x241   : >> { %v2438_v18 = vpop.f32.mrb[28].mxu0 }
 0x242   : >> { %v1727_v20 = vadd.f32 %v2438_v18, %v1676_v12  ;;  %v1711_v21 = vpop.f32.mrb[29].mxu0 }
 0x243   : >> { %v1725_v22 = vadd.f32 %v1711_v21, %v1674_v16  ;;  %v2439_v23 = vpop.f32.mrb[30].mxu0  ;;  %v2462_v28 = vpop.f32.mrb[32].mxu1 }
 0x244   : >> { %v1714_v24 = vpop.f32.mrb[31].mxu0  ;;  %v1800_v25 = vadd.f32 %v2446_v17, %v1727_v20  ;;  %v1918_v34 = vpop.f32.mrb[33].mxu1 }
 0x245   : >> { %v1726_v26 = vadd.f32 %v1714_v24, %v1675_v14  ;;  %v1798_v27 = vadd.f32 %v1784_v9, %v1725_v22  ;;  %v2463_v37 = vpop.f32.mrb[34].mxu1 }
 0x246   : >> { %v1921_v35 = vpop.f32.mrb[35].mxu1 }
 0x247   : >> { %v1799_v36 = vadd.f32 %v1787_v19, %v1726_v26 }
 0x249   : >> { %v2454_v30 = vpop.f32.mrb[32].mxu0 }
 0x24a   : >> { %v1874_v29 = vadd.f32 %v2454_v30, %v1800_v25  ;;  %v1858_v31 = vpop.f32.mrb[33].mxu0 }
 0x24b   : >> { %v1872_v32 = vadd.f32 %v1858_v31, %v1798_v27  ;;  %v2455_v38 = vpop.f32.mrb[34].mxu0 }
 0x24c   : >> { %v1934_v39 = vadd.f32 %v2462_v28, %v1874_v29  ;;  %v1861_v41 = vpop.f32.mrb[35].mxu0 }
 0x24d   : >> { %v1932_v40 = vadd.f32 %v1918_v34, %v1872_v32  ;;  %v1873_v42 = vadd.f32 %v1861_v41, %v1799_v36 }
 0x24e   : >> { %v1937_v44 = vadd.f32 %v2202_v33, %v1934_v39 }
 0x24f   : >> { %v1935_v48 = vadd.f32 %v2202_v33, %v1932_v40  ;;  %v1933_v49 = vadd.f32 %v1921_v35, %v1873_v42 }
 0x250   : >> { %v1940_v51 = vmax.f32 %v1427_v43, %v1937_v44 }
 0x251   : >> { %v1938_v53 = vmax.f32 %v1425_v46, %v1935_v48  ;;  %v1936_v54 = vadd.f32 %v2202_v33, %v1933_v49 }
 0x252   : >> { %1944 = vst.msk [vmem:[#allocation3 + $0x10] sm:$0xff] %vm1941_vm6, %v1940_v51 }
 0x253   : >> { %1942 = vst.msk [vmem:[#allocation3] sm:$0xff] %vm1941_vm6, %v1938_v53  ;;  %v1939_v55 = vmax.f32 %v1426_v52, %v1936_v54 }
 0x255   : >> { %1943 = vst.msk [vmem:[#allocation3 + $0x8] sm:$0xff] %vm1941_vm6, %v1939_v55 }
 0x259   : >> { %v1947_v56 = vld [vmem:[#allocation3 + $0x10] ss:$2 sm:$0xf]  ;;  %v1951_v57 = vld [vmem:[#allocation3 + $0x11] ss:$2 sm:$0xf] }
 0x25a   : >> { %v1953_v58 = vmax.f32 %v1947_v56, %v1951_v57 }
 0x25b   : > { %646 = sbr.rel (!%p644_p12) target bundleno = 295 (0x127), region = 140 }
 0x25c   : >> { %v2246_v45 = vpack.c.bf16 %v1953_v58, %v1953_v58  ;;  %v1945_v47 = vld [vmem:[#allocation3] ss:$2 sm:$0xff]  ;;  %v1949_v59 = vld [vmem:[#allocation3 + $0x1] ss:$2 sm:$0xff] }
 0x25d   : >> { %v1952_v60 = vmax.f32 %v1945_v47, %v1949_v59 }
 0x25e   : >> { %1967 = vst.msk [vmem:[%s1963_s9 + $0x4] sm:$0x3] %vm1966_vm7, %v2246_v45 }
 0x25f   : >> { %v2245_v61 = vpack.c.bf16 %v1952_v60, %v1952_v60 }
 0x261   : >> { %1965 = vst.msk [vmem:[%s1963_s9] sm:$0xf] %vm1964_vm8, %v2245_v61 }
 0x262 PF: > { %s18_s18 = sadd.s32 1, %s2706_s18  }
 0x263   : > { %p15_p13 = scmp.ge.s32.totalorder %s18_s18, 4  }
 0x265   :  { %17 = sbr.rel (!%p15_p13) target bundleno = 3 (0x3), region = 151 }
 0x26c   :  { %1989 = vsyncpa [#allocation5], 1 }
 0x26d   :  { %1991 = vsyncpa [#allocation5 + $0x1], 1 }
 0x26e   :  { %1992 = vsyncpa [#allocation7], 1 }
 0x26f   :  { %1993 = vsyncpa [#allocation10], 1 }

// kernel: net_forward.3
= control target key start
LH: loop header
LB: loop body
LE: loop exit
PB: predicated region body
PF: predicated region fallthrough
CT: control target
= control target key end

     0   :  { %vm8634_vm0 = vmmov 0   ;;  %s10564_s1 = inlined_call_operand.vmem [shape: bf16[9216,128], index: 1, kind: input, shape index: {}]   ;;  %s10565_s0 = inlined_call_operand.vmem [shape: bf16[8,9216], index: 0, kind: input, shape index: {}]   ;;  %s10566_s2 = inlined_call_operand.vmem [shape: f32[1,128], index: 2, kind: input, shape index: {}]   ;;  %s10567_s3 = inlined_call_operand.vmem [shape: bf16[128,128], index: 3, kind: input, shape index: {}]   ;;  %s10568_s4 = inlined_call_operand.vmem [shape: f32[1,128], index: 4, kind: input, shape index: {}]   ;;  %s10569_s5 = inlined_call_operand.vmem [shape: f32[8,128], index: 5, kind: output, shape index: {}]  }
   0x1   :  { %v7973_v0 = vld [vmem:[%s10564_s1 + $0x40] sm:$0xff]   ;;  %v7977_v4 = vld [vmem:[%s10564_s1 + $0x48] sm:$0xff]   ;;  %v7981_v8 = vld [vmem:[%s10564_s1 + $0x50] sm:$0xff]  }
   0x2   :  { %v7974_v1 = vld [vmem:[%s10564_s1 + $0xc0] sm:$0xff]   ;;  %7150 = vmatprep.subr.bf16.mxu0 %v7973_v0  ;;  %v7978_v5 = vld [vmem:[%s10564_s1 + $0xc8] sm:$0xff]   ;;  %v7982_v9 = vld [vmem:[%s10564_s1 + $0xd0] sm:$0xff]  }
   0x3   :  { %v7975_v2 = vld [vmem:[%s10564_s1] sm:$0xff]   ;;  %7172 = vmatprep.subr.bf16.mxu1 %v7974_v1  ;;  %v7979_v6 = vld [vmem:[%s10564_s1 + $0x8] sm:$0xff]   ;;  %v7983_v10 = vld [vmem:[%s10564_s1 + $0x10] sm:$0xff]  }
   0x4   :  { %v7976_v3 = vld [vmem:[%s10564_s1 + $0x80] sm:$0xff]   ;;  %7151 = vmatpush3.bf16.msra.mxu0 %v7975_v2  ;;  %v7980_v7 = vld [vmem:[%s10564_s1 + $0x88] sm:$0xff]   ;;  %v7984_v11 = vld [vmem:[%s10564_s1 + $0x90] sm:$0xff]  }
   0x5   :  { %7173 = vmatpush3.bf16.msra.mxu1 %v7976_v3  ;;  %7152 = vmatprep.subr.bf16.mxu0 %v7977_v4  ;;  %v7985_v12 = vld [vmem:[%s10564_s1 + $0x58] sm:$0xff]   ;;  %v7989_v16 = vld [vmem:[%s10564_s1 + $0x60] sm:$0xff]   ;;  %v7993_v20 = vld [vmem:[%s10564_s1 + $0x68] sm:$0xff]  }
   0x6   :  { %7174 = vmatprep.subr.bf16.mxu1 %v7978_v5  ;;  %v7986_v13 = vld [vmem:[%s10564_s1 + $0xd8] sm:$0xff]   ;;  %v7990_v17 = vld [vmem:[%s10564_s1 + $0xe0] sm:$0xff]   ;;  %v7994_v21 = vld [vmem:[%s10564_s1 + $0xe8] sm:$0xff]  }
   0x7   :  { %v7987_v14 = vld [vmem:[%s10564_s1 + $0x18] sm:$0xff]   ;;  %v7991_v18 = vld [vmem:[%s10564_s1 + $0x20] sm:$0xff]   ;;  %v7995_v22 = vld [vmem:[%s10564_s1 + $0x28] sm:$0xff]  }
   0x8   :  { %7153 = vmatpush3.bf16.msra.mxu0 %v7979_v6  ;;  %v7988_v15 = vld [vmem:[%s10564_s1 + $0x98] sm:$0xff]   ;;  %v7992_v19 = vld [vmem:[%s10564_s1 + $0xa0] sm:$0xff]   ;;  %v7996_v23 = vld [vmem:[%s10564_s1 + $0xa8] sm:$0xff]  }
   0x9   :  { %7175 = vmatpush3.bf16.msra.mxu1 %v7980_v7  ;;  %7154 = vmatprep.subr.bf16.mxu0 %v7981_v8  ;;  %v7997_v24 = vld [vmem:[%s10564_s1 + $0x70] sm:$0xff]   ;;  %v8001_v28 = vld [vmem:[%s10564_s1 + $0x78] sm:$0xff]   ;;  %v21_v32 = vld [vmem:[%s10565_s0] sm:$0xff] }
   0xa   :  { %7176 = vmatprep.subr.bf16.mxu1 %v7982_v9  ;;  %v7998_v25 = vld [vmem:[%s10564_s1 + $0xf0] sm:$0xff]   ;;  %v8002_v29 = vld [vmem:[%s10564_s1 + $0xf8] sm:$0xff]   ;;  %v22_v33 = vld [vmem:[%s10565_s0 + $0x8] sm:$0xff]  ;;  %v6493_v34 = vcombine.low %v21_v32, %v21_v32  ;;  %v6494_v35 = vcombine.high %v21_v32, %v21_v32 }
   0xb   :  { %v7999_v26 = vld [vmem:[%s10564_s1 + $0x30] sm:$0xff]   ;;  %v8003_v30 = vld [vmem:[%s10564_s1 + $0x38] sm:$0xff]   ;;  %v6495_v36 = vcombine.low %v22_v33, %v22_v33  ;;  %v6496_v37 = vcombine.high %v22_v33, %v22_v33  ;;  %v8009_v38 = vld [vmem:[%s10564_s1 + $0x140] sm:$0xff]  }
   0xc   :  { %7155 = vmatpush3.bf16.msra.mxu0 %v7983_v10  ;;  %v8000_v27 = vld [vmem:[%s10564_s1 + $0xb0] sm:$0xff]   ;;  %v8004_v31 = vld [vmem:[%s10564_s1 + $0xb8] sm:$0xff]   ;;  %v8010_v39 = vld [vmem:[%s10564_s1 + $0x1c0] sm:$0xff]   ;;  %4956 = vmatprep.mubr.bf16.mxu0 %v6494_v35 }
   0xd   :  { %7177 = vmatpush3.bf16.msra.mxu1 %v7984_v11  ;;  %7156 = vmatprep.subr.bf16.mxu0 %v7985_v12  ;;  %v8011_v40 = vld [vmem:[%s10564_s1 + $0x100] sm:$0xff]   ;;  %v8013_v42 = vld [vmem:[%s10564_s1 + $0x148] sm:$0xff]   ;;  %v8017_v46 = vld [vmem:[%s10564_s1 + $0x150] sm:$0xff]  }
   0xe   :  { %7178 = vmatprep.subr.bf16.mxu1 %v7986_v13  ;;  %4996 = vmatprep.mubr.bf16.mxu1 %v6496_v37  ;;  %v8012_v41 = vld [vmem:[%s10564_s1 + $0x180] sm:$0xff]   ;;  %v8014_v43 = vld [vmem:[%s10564_s1 + $0x1c8] sm:$0xff]   ;;  %v8018_v47 = vld [vmem:[%s10564_s1 + $0x1d0] sm:$0xff]  }
   0xf   :  { %v8015_v44 = vld [vmem:[%s10564_s1 + $0x108] sm:$0xff]   ;;  %v8019_v48 = vld [vmem:[%s10564_s1 + $0x110] sm:$0xff]   ;;  %v8021_v50 = vld [vmem:[%s10564_s1 + $0x158] sm:$0xff]  }
  0x10   :  { %7157 = vmatpush3.bf16.msra.mxu0 %v7987_v14  ;;  %v8016_v45 = vld [vmem:[%s10564_s1 + $0x188] sm:$0xff]   ;;  %v8020_v49 = vld [vmem:[%s10564_s1 + $0x190] sm:$0xff]   ;;  %v8022_v51 = vld [vmem:[%s10564_s1 + $0x1d8] sm:$0xff]  }
  0x11   :  { %7179 = vmatpush3.bf16.msra.mxu1 %v7988_v15  ;;  %7158 = vmatprep.subr.bf16.mxu0 %v7989_v16  ;;  %v8023_v52 = vld [vmem:[%s10564_s1 + $0x118] sm:$0xff]   ;;  %v8025_v54 = vld [vmem:[%s10564_s1 + $0x160] sm:$0xff]   ;;  %v8029_v58 = vld [vmem:[%s10564_s1 + $0x168] sm:$0xff]  }
  0x12   :  { %7180 = vmatprep.subr.bf16.mxu1 %v7990_v17  ;;  %v8024_v53 = vld [vmem:[%s10564_s1 + $0x198] sm:$0xff]   ;;  %v8026_v55 = vld [vmem:[%s10564_s1 + $0x1e0] sm:$0xff]   ;;  %v8030_v59 = vld [vmem:[%s10564_s1 + $0x1e8] sm:$0xff]  }
  0x13   :  { %v8027_v56 = vld [vmem:[%s10564_s1 + $0x120] sm:$0xff]   ;;  %v8031_v60 = vld [vmem:[%s10564_s1 + $0x128] sm:$0xff]   ;;  %v8033_v62 = vld [vmem:[%s10564_s1 + $0x170] sm:$0xff]  }
  0x14   :  { %7159 = vmatpush3.bf16.msra.mxu0 %v7991_v18  ;;  %v8028_v57 = vld [vmem:[%s10564_s1 + $0x1a0] sm:$0xff]   ;;  %v8032_v61 = vld [vmem:[%s10564_s1 + $0x1a8] sm:$0xff]   ;;  %v8034_v63 = vld [vmem:[%s10564_s1 + $0x1f0] sm:$0xff]  }
  0x15   :  { %7181 = vmatpush3.bf16.msra.mxu1 %v7992_v19  ;;  %7160 = vmatprep.subr.bf16.mxu0 %v7993_v20  ;;  %v8035_v0 = vld [vmem:[%s10564_s1 + $0x130] sm:$0xff]   ;;  %v8037_v2 = vld [vmem:[%s10564_s1 + $0x178] sm:$0xff]   ;;  %v8045_v12 = vld [vmem:[%s10564_s1 + $0x240] sm:$0xff]  }
  0x16   :  { %7182 = vmatprep.subr.bf16.mxu1 %v7994_v21  ;;  %v8036_v1 = vld [vmem:[%s10564_s1 + $0x1b0] sm:$0xff]   ;;  %v8038_v3 = vld [vmem:[%s10564_s1 + $0x1f8] sm:$0xff]   ;;  %v8046_v13 = vld [vmem:[%s10564_s1 + $0x2c0] sm:$0xff]  }
  0x17   :  { %v8039_v4 = vld [vmem:[%s10564_s1 + $0x138] sm:$0xff]   ;;  %v23_v6 = vld [vmem:[%s10565_s0 + $0x10] sm:$0xff]  ;;  %v8047_v14 = vld [vmem:[%s10564_s1 + $0x200] sm:$0xff]  }
  0x18   :  { %7161 = vmatpush3.bf16.msra.mxu0 %v7995_v22  ;;  %v8040_v5 = vld [vmem:[%s10564_s1 + $0x1b8] sm:$0xff]   ;;  %v6497_v7 = vcombine.low %v23_v6, %v23_v6  ;;  %v6498_v8 = vcombine.high %v23_v6, %v23_v6  ;;  %v8048_v15 = vld [vmem:[%s10564_s1 + $0x280] sm:$0xff]   ;;  %v8049_v16 = vld [vmem:[%s10564_s1 + $0x248] sm:$0xff]  }
  0x19   :  { %7183 = vmatpush3.bf16.msra.mxu1 %v7996_v23  ;;  %7162 = vmatprep.subr.bf16.mxu0 %v7997_v24  ;;  %v24_v9 = vld [vmem:[%s10565_s0 + $0x18] sm:$0xff]  ;;  %v8050_v17 = vld [vmem:[%s10564_s1 + $0x2c8] sm:$0xff]   ;;  %v8053_v20 = vld [vmem:[%s10564_s1 + $0x250] sm:$0xff]  }
  0x1a   :  { %7184 = vmatprep.subr.bf16.mxu1 %v7998_v25  ;;  %v6499_v10 = vcombine.low %v24_v9, %v24_v9  ;;  %v6500_v11 = vcombine.high %v24_v9, %v24_v9  ;;  %v8051_v18 = vld [vmem:[%s10564_s1 + $0x208] sm:$0xff]   ;;  %v8054_v21 = vld [vmem:[%s10564_s1 + $0x2d0] sm:$0xff]   ;;  %v8057_v24 = vld [vmem:[%s10564_s1 + $0x258] sm:$0xff]  }
  0x1b   :  { %v8052_v19 = vld [vmem:[%s10564_s1 + $0x288] sm:$0xff]   ;;  %v8055_v22 = vld [vmem:[%s10564_s1 + $0x210] sm:$0xff]   ;;  %v8058_v25 = vld [vmem:[%s10564_s1 + $0x2d8] sm:$0xff]  }
  0x1c   :  { %7163 = vmatpush3.bf16.msra.mxu0 %v7999_v26  ;;  %v8056_v23 = vld [vmem:[%s10564_s1 + $0x290] sm:$0xff]   ;;  %v8059_v26 = vld [vmem:[%s10564_s1 + $0x218] sm:$0xff]   ;;  %v8065_v32 = vld [vmem:[%s10564_s1 + $0x268] sm:$0xff]  }
  0x1d   :  { %7185 = vmatpush3.bf16.msra.mxu1 %v8000_v27  ;;  %7164 = vmatprep.subr.bf16.mxu0 %v8001_v28  ;;  %v8060_v27 = vld [vmem:[%s10564_s1 + $0x298] sm:$0xff]   ;;  %v8061_v28 = vld [vmem:[%s10564_s1 + $0x260] sm:$0xff]   ;;  %v8066_v33 = vld [vmem:[%s10564_s1 + $0x2e8] sm:$0xff]  }
  0x1e   :  { %7186 = vmatprep.subr.bf16.mxu1 %v8002_v29  ;;  %v8062_v29 = vld [vmem:[%s10564_s1 + $0x2e0] sm:$0xff]   ;;  %v8068_v35 = vld [vmem:[%s10564_s1 + $0x2a8] sm:$0xff]   ;;  %v8070_v37 = vld [vmem:[%s10564_s1 + $0x2f0] sm:$0xff]  }
  0x1f   :  { %v8101_v6 = vld [vmem:[%s10564_s1 + $0x368] sm:$0xff]  }
  0x20   :  { %7165 = vmatpush3.bf16.msra.mxu0 %v8003_v30  ;;  %v8063_v30 = vld [vmem:[%s10564_s1 + $0x220] sm:$0xff]   ;;  %v8104_v9 = vld [vmem:[%s10564_s1 + $0x3a8] sm:$0xff]  }
  0x21   :  { %7187 = vmatpush3.bf16.msra.mxu1 %v8004_v31  ;;  %7194 = vmatprep.subr.bf16.mxu0 %v8009_v38  ;;  %v8064_v31 = vld [vmem:[%s10564_s1 + $0x2a0] sm:$0xff]   ;;  %v8071_v38 = vld [vmem:[%s10564_s1 + $0x230] sm:$0xff]  }
  0x22   :  { %7216 = vmatprep.subr.bf16.mxu1 %v8010_v39  ;;  %v8072_v39 = vld [vmem:[%s10564_s1 + $0x2b0] sm:$0xff]  }
  0x23   :  { %4957 = vmatmul.mubr.bf16.vlgmr.msra.gmra.mrb[0].mxu0 %v6493_v34  ;;  %v8067_v34 = vld [vmem:[%s10564_s1 + $0x228] sm:$0xff]  }
  0x24   :  { %4997 = vmatmul.mubr.bf16.vlgmr.msra.gmra.mrb[0].mxu1 %v6495_v36  ;;  %7195 = vmatpush3.bf16.msra.mxu0 %v8011_v40  ;;  %v8069_v36 = vld [vmem:[%s10564_s1 + $0x270] sm:$0xff]   ;;  %v8073_v40 = vld [vmem:[%s10564_s1 + $0x278] sm:$0xff]  }
  0x25   :  { %7217 = vmatpush3.bf16.msra.mxu1 %v8012_v41  ;;  %7196 = vmatprep.subr.bf16.mxu0 %v8013_v42  ;;  %v8074_v41 = vld [vmem:[%s10564_s1 + $0x2f8] sm:$0xff]  }
  0x26   :  { %7218 = vmatprep.subr.bf16.mxu1 %v8014_v43  ;;  %5036 = vmatprep.mubr.bf16.mxu0 %v6498_v8  ;;  %v8075_v42 = vld [vmem:[%s10564_s1 + $0x238] sm:$0xff]   ;;  %v8103_v8 = vld [vmem:[%s10564_s1 + $0x328] sm:$0xff]  }
  0x27   :  { %5076 = vmatprep.mubr.bf16.mxu1 %v6500_v11  ;;  %v8076_v43 = vld [vmem:[%s10564_s1 + $0x2b8] sm:$0xff]   ;;  %v8106_v11 = vld [vmem:[%s10564_s1 + $0x3f0] sm:$0xff]  }
  0x28   :  { %7197 = vmatpush3.bf16.msra.mxu0 %v8015_v44  ;;  %v25_v44 = vld [vmem:[%s10565_s0 + $0x20] sm:$0xff] }
  0x29   :  { %7219 = vmatpush3.bf16.msra.mxu1 %v8016_v45  ;;  %7198 = vmatprep.subr.bf16.mxu0 %v8017_v46  ;;  %v26_v45 = vld [vmem:[%s10565_s0 + $0x28] sm:$0xff]  ;;  %v6501_v46 = vcombine.low %v25_v44, %v25_v44 }
  0x2a   :  { %7220 = vmatprep.subr.bf16.mxu1 %v8018_v47  ;;  %v6502_v47 = vcombine.high %v25_v44, %v25_v44  ;;  %v8137_v44 = vld [vmem:[%s10564_s1 + $0x468] sm:$0xff]  }
  0x2c   :  { %7199 = vmatpush3.bf16.msra.mxu0 %v8019_v48  ;;  %v6503_v48 = vcombine.low %v26_v45, %v26_v45 }
  0x2d   :  { %7221 = vmatpush3.bf16.msra.mxu1 %v8020_v49  ;;  %7200 = vmatprep.subr.bf16.mxu0 %v8021_v50  ;;  %v6504_v49 = vcombine.high %v26_v45, %v26_v45  ;;  %v8081_v50 = vld [vmem:[%s10564_s1 + $0x340] sm:$0xff]   ;;  %v8138_v45 = vld [vmem:[%s10564_s1 + $0x4e8] sm:$0xff]  }
  0x2e   :  { %7222 = vmatprep.subr.bf16.mxu1 %v8022_v51  ;;  %v8082_v51 = vld [vmem:[%s10564_s1 + $0x3c0] sm:$0xff]  }
  0x30   :  { %7201 = vmatpush3.bf16.msra.mxu0 %v8023_v52  ;;  %v8083_v52 = vld [vmem:[%s10564_s1 + $0x300] sm:$0xff]  }
  0x31   :  { %7223 = vmatpush3.bf16.msra.mxu1 %v8024_v53  ;;  %7202 = vmatprep.subr.bf16.mxu0 %v8025_v54  ;;  %v8084_v53 = vld [vmem:[%s10564_s1 + $0x380] sm:$0xff]   ;;  %v8085_v54 = vld [vmem:[%s10564_s1 + $0x348] sm:$0xff]  }
  0x32   :  { %7224 = vmatprep.subr.bf16.mxu1 %v8026_v55  ;;  %v8086_v55 = vld [vmem:[%s10564_s1 + $0x3c8] sm:$0xff]  }
  0x34   :  { %7203 = vmatpush3.bf16.msra.mxu0 %v8027_v56  ;;  %v8087_v56 = vld [vmem:[%s10564_s1 + $0x308] sm:$0xff]  }
  0x35   :  { %7225 = vmatpush3.bf16.msra.mxu1 %v8028_v57  ;;  %7204 = vmatprep.subr.bf16.mxu0 %v8029_v58  ;;  %v8088_v57 = vld [vmem:[%s10564_s1 + $0x388] sm:$0xff]   ;;  %v8089_v58 = vld [vmem:[%s10564_s1 + $0x350] sm:$0xff]  }
  0x36   :  { %7226 = vmatprep.subr.bf16.mxu1 %v8030_v59  ;;  %v8090_v59 = vld [vmem:[%s10564_s1 + $0x3d0] sm:$0xff]  }
  0x38   :  { %7205 = vmatpush3.bf16.msra.mxu0 %v8031_v60  ;;  %v8091_v60 = vld [vmem:[%s10564_s1 + $0x310] sm:$0xff]  }
  0x39   :  { %7227 = vmatpush3.bf16.msra.mxu1 %v8032_v61  ;;  %7206 = vmatprep.subr.bf16.mxu0 %v8033_v62  ;;  %v8092_v61 = vld [vmem:[%s10564_s1 + $0x390] sm:$0xff]   ;;  %v8093_v62 = vld [vmem:[%s10564_s1 + $0x358] sm:$0xff]  }
  0x3a   :  { %7228 = vmatprep.subr.bf16.mxu1 %v8034_v63  ;;  %v8094_v63 = vld [vmem:[%s10564_s1 + $0x3d8] sm:$0xff]  }
  0x3c   :  { %7207 = vmatpush3.bf16.msra.mxu0 %v8035_v0  ;;  %v8095_v0 = vld [vmem:[%s10564_s1 + $0x318] sm:$0xff]  }
  0x3d   :  { %7229 = vmatpush3.bf16.msra.mxu1 %v8036_v1  ;;  %7208 = vmatprep.subr.bf16.mxu0 %v8037_v2  ;;  %v8096_v1 = vld [vmem:[%s10564_s1 + $0x398] sm:$0xff]   ;;  %v8097_v2 = vld [vmem:[%s10564_s1 + $0x360] sm:$0xff]  }
  0x3e   :  { %7230 = vmatprep.subr.bf16.mxu1 %v8038_v3  ;;  %v8098_v3 = vld [vmem:[%s10564_s1 + $0x3e0] sm:$0xff]  }
  0x40   :  { %7209 = vmatpush3.bf16.msra.mxu0 %v8039_v4  ;;  %v8099_v4 = vld [vmem:[%s10564_s1 + $0x320] sm:$0xff]  }
  0x41   :  { %7231 = vmatpush3.bf16.msra.mxu1 %v8040_v5  ;;  %7238 = vmatprep.subr.bf16.mxu0 %v8045_v12  ;;  %v8100_v5 = vld [vmem:[%s10564_s1 + $0x3a0] sm:$0xff]   ;;  %v8107_v12 = vld [vmem:[%s10564_s1 + $0x330] sm:$0xff]  }
  0x42   :  { %7260 = vmatprep.subr.bf16.mxu1 %v8046_v13  ;;  %v8108_v13 = vld [vmem:[%s10564_s1 + $0x3b0] sm:$0xff]  }
  0x43   :  { %5037 = vmatmul.mubr.bf16.vlgmr.msra.gmra.mrb[4].mxu0 %v6497_v7  ;;  %v8102_v7 = vld [vmem:[%s10564_s1 + $0x3e8] sm:$0xff]  }
  0x44   :  { %5077 = vmatmul.mubr.bf16.vlgmr.msra.gmra.mrb[4].mxu1 %v6499_v10  ;;  %7239 = vmatpush3.bf16.msra.mxu0 %v8047_v14  ;;  %v8105_v10 = vld [vmem:[%s10564_s1 + $0x370] sm:$0xff]   ;;  %v8109_v14 = vld [vmem:[%s10564_s1 + $0x378] sm:$0xff]  }
  0x45   :  { %7261 = vmatpush3.bf16.msra.mxu1 %v8048_v15  ;;  %7240 = vmatprep.subr.bf16.mxu0 %v8049_v16  ;;  %v8110_v15 = vld [vmem:[%s10564_s1 + $0x3f8] sm:$0xff]  }
  0x46   :  { %7262 = vmatprep.subr.bf16.mxu1 %v8050_v17  ;;  %5116 = vmatprep.mubr.bf16.mxu0 %v6502_v47  ;;  %v8111_v16 = vld [vmem:[%s10564_s1 + $0x338] sm:$0xff]   ;;  %v8140_v47 = vld [vmem:[%s10564_s1 + $0x4a8] sm:$0xff]  }
  0x47   :  { %5156 = vmatprep.mubr.bf16.mxu1 %v6504_v49  ;;  %v8112_v17 = vld [vmem:[%s10564_s1 + $0x3b8] sm:$0xff]   ;;  %v8142_v49 = vld [vmem:[%s10564_s1 + $0x4f0] sm:$0xff]  }
  0x48   :  { %7241 = vmatpush3.bf16.msra.mxu0 %v8051_v18  ;;  %v27_v18 = vld [vmem:[%s10565_s0 + $0x30] sm:$0xff] }
  0x49   :  { %7263 = vmatpush3.bf16.msra.mxu1 %v8052_v19  ;;  %7242 = vmatprep.subr.bf16.mxu0 %v8053_v20  ;;  %v28_v19 = vld [vmem:[%s10565_s0 + $0x38] sm:$0xff]  ;;  %v6505_v20 = vcombine.low %v27_v18, %v27_v18 }
  0x4a   :  { %7264 = vmatprep.subr.bf16.mxu1 %v8054_v21  ;;  %v6506_v21 = vcombine.high %v27_v18, %v27_v18  ;;  %v8173_v18 = vld [vmem:[%s10564_s1 + $0x568] sm:$0xff]  }
  0x4c   :  { %7243 = vmatpush3.bf16.msra.mxu0 %v8055_v22  ;;  %v6507_v22 = vcombine.low %v28_v19, %v28_v19 }
  0x4d   :  { %7265 = vmatpush3.bf16.msra.mxu1 %v8056_v23  ;;  %7244 = vmatprep.subr.bf16.mxu0 %v8057_v24  ;;  %v8117_v23 = vld [vmem:[%s10564_s1 + $0x440] sm:$0xff]   ;;  %v6508_v24 = vcombine.high %v28_v19, %v28_v19  ;;  %v8174_v19 = vld [vmem:[%s10564_s1 + $0x5e8] sm:$0xff]  }
  0x4e   :  { %7266 = vmatprep.subr.bf16.mxu1 %v8058_v25  ;;  %v8118_v25 = vld [vmem:[%s10564_s1 + $0x4c0] sm:$0xff]  }
  0x50   :  { %7245 = vmatpush3.bf16.msra.mxu0 %v8059_v26  ;;  %v8119_v26 = vld [vmem:[%s10564_s1 + $0x400] sm:$0xff]  }
  0x51   :  { %7267 = vmatpush3.bf16.msra.mxu1 %v8060_v27  ;;  %7246 = vmatprep.subr.bf16.mxu0 %v8061_v28  ;;  %v8120_v27 = vld [vmem:[%s10564_s1 + $0x480] sm:$0xff]   ;;  %v8121_v28 = vld [vmem:[%s10564_s1 + $0x448] sm:$0xff]  }
  0x52   :  { %7268 = vmatprep.subr.bf16.mxu1 %v8062_v29  ;;  %v8122_v29 = vld [vmem:[%s10564_s1 + $0x4c8] sm:$0xff]  }
  0x54   :  { %7247 = vmatpush3.bf16.msra.mxu0 %v8063_v30  ;;  %v8123_v30 = vld [vmem:[%s10564_s1 + $0x408] sm:$0xff]  }
  0x55   :  { %7269 = vmatpush3.bf16.msra.mxu1 %v8064_v31  ;;  %7248 = vmatprep.subr.bf16.mxu0 %v8065_v32  ;;  %v8124_v31 = vld [vmem:[%s10564_s1 + $0x488] sm:$0xff]   ;;  %v8125_v32 = vld [vmem:[%s10564_s1 + $0x450] sm:$0xff]  }
  0x56   :  { %7270 = vmatprep.subr.bf16.mxu1 %v8066_v33  ;;  %v8126_v33 = vld [vmem:[%s10564_s1 + $0x4d0] sm:$0xff]  }
  0x58   :  { %7249 = vmatpush3.bf16.msra.mxu0 %v8067_v34  ;;  %v8127_v34 = vld [vmem:[%s10564_s1 + $0x410] sm:$0xff]  }
  0x59   :  { %7271 = vmatpush3.bf16.msra.mxu1 %v8068_v35  ;;  %7250 = vmatprep.subr.bf16.mxu0 %v8069_v36  ;;  %v8128_v35 = vld [vmem:[%s10564_s1 + $0x490] sm:$0xff]   ;;  %v8129_v36 = vld [vmem:[%s10564_s1 + $0x458] sm:$0xff]  }
  0x5a   :  { %7272 = vmatprep.subr.bf16.mxu1 %v8070_v37  ;;  %v8130_v37 = vld [vmem:[%s10564_s1 + $0x4d8] sm:$0xff]  }
  0x5c   :  { %7251 = vmatpush3.bf16.msra.mxu0 %v8071_v38  ;;  %v8131_v38 = vld [vmem:[%s10564_s1 + $0x418] sm:$0xff]  }
  0x5d   :  { %7273 = vmatpush3.bf16.msra.mxu1 %v8072_v39  ;;  %7252 = vmatprep.subr.bf16.mxu0 %v8073_v40  ;;  %v8132_v39 = vld [vmem:[%s10564_s1 + $0x498] sm:$0xff]   ;;  %v8133_v40 = vld [vmem:[%s10564_s1 + $0x460] sm:$0xff]  }
  0x5e   :  { %7274 = vmatprep.subr.bf16.mxu1 %v8074_v41  ;;  %v8134_v41 = vld [vmem:[%s10564_s1 + $0x4e0] sm:$0xff]  }
  0x60   :  { %7253 = vmatpush3.bf16.msra.mxu0 %v8075_v42  ;;  %v8135_v42 = vld [vmem:[%s10564_s1 + $0x420] sm:$0xff]  }
  0x61   :  { %7275 = vmatpush3.bf16.msra.mxu1 %v8076_v43  ;;  %7282 = vmatprep.subr.bf16.mxu0 %v8081_v50  ;;  %v8136_v43 = vld [vmem:[%s10564_s1 + $0x4a0] sm:$0xff]   ;;  %v8143_v50 = vld [vmem:[%s10564_s1 + $0x430] sm:$0xff]  }
  0x62   :  { %7304 = vmatprep.subr.bf16.mxu1 %v8082_v51  ;;  %v8144_v51 = vld [vmem:[%s10564_s1 + $0x4b0] sm:$0xff]  }
  0x63   :  { %5117 = vmatmul.mubr.bf16.vlgmr.msra.gmra.mrb[8].mxu0 %v6501_v46  ;;  %v8139_v46 = vld [vmem:[%s10564_s1 + $0x428] sm:$0xff]  }
  0x64   :  { %5157 = vmatmul.mubr.bf16.vlgmr.msra.gmra.mrb[8].mxu1 %v6503_v48  ;;  %7283 = vmatpush3.bf16.msra.mxu0 %v8083_v52  ;;  %v8141_v48 = vld [vmem:[%s10564_s1 + $0x470] sm:$0xff]   ;;  %v8145_v52 = vld [vmem:[%s10564_s1 + $0x478] sm:$0xff]  }
  0x65   :  { %7305 = vmatpush3.bf16.msra.mxu1 %v8084_v53  ;;  %7284 = vmatprep.subr.bf16.mxu0 %v8085_v54  ;;  %v8146_v53 = vld [vmem:[%s10564_s1 + $0x4f8] sm:$0xff]  }
  0x66   :  { %7306 = vmatprep.subr.bf16.mxu1 %v8086_v55  ;;  %5196 = vmatprep.mubr.bf16.mxu0 %v6506_v21  ;;  %v8147_v54 = vld [vmem:[%s10564_s1 + $0x438] sm:$0xff]   ;;  %v8176_v21 = vld [vmem:[%s10564_s1 + $0x5a8] sm:$0xff]  }
  0x67   :  { %5236 = vmatprep.mubr.bf16.mxu1 %v6508_v24  ;;  %v8148_v55 = vld [vmem:[%s10564_s1 + $0x4b8] sm:$0xff]   ;;  %v8179_v24 = vld [vmem:[%s10564_s1 + $0x530] sm:$0xff]  }
  0x68   :  { %7285 = vmatpush3.bf16.msra.mxu0 %v8087_v56  ;;  %v29_v56 = vld [vmem:[%s10565_s0 + $0x40] sm:$0xff] }
  0x69   :  { %7307 = vmatpush3.bf16.msra.mxu1 %v8088_v57  ;;  %7286 = vmatprep.subr.bf16.mxu0 %v8089_v58  ;;  %v6509_v57 = vcombine.low %v29_v56, %v29_v56  ;;  %v6510_v58 = vcombine.high %v29_v56, %v29_v56  ;;  %v8209_v56 = vld [vmem:[%s10564_s1 + $0x668] sm:$0xff]  }
  0x6a   :  { %7308 = vmatprep.subr.bf16.mxu1 %v8090_v59  ;;  %v30_v59 = vld [vmem:[%s10565_s0 + $0x48] sm:$0xff] }
  0x6c   :  { %7287 = vmatpush3.bf16.msra.mxu0 %v8091_v60  ;;  %v6511_v60 = vcombine.low %v30_v59, %v30_v59 }
  0x6d   :  { %7309 = vmatpush3.bf16.msra.mxu1 %v8092_v61  ;;  %7288 = vmatprep.subr.bf16.mxu0 %v8093_v62  ;;  %v6512_v61 = vcombine.high %v30_v59, %v30_v59  ;;  %v8153_v62 = vld [vmem:[%s10564_s1 + $0x540] sm:$0xff]   ;;  %v8212_v59 = vld [vmem:[%s10564_s1 + $0x6a8] sm:$0xff]  }
  0x6e   :  { %7310 = vmatprep.subr.bf16.mxu1 %v8094_v63  ;;  %v8154_v63 = vld [vmem:[%s10564_s1 + $0x5c0] sm:$0xff]  }
  0x70   :  { %7289 = vmatpush3.bf16.msra.mxu0 %v8095_v0  ;;  %v8155_v0 = vld [vmem:[%s10564_s1 + $0x500] sm:$0xff]  }
  0x71   :  { %7311 = vmatpush3.bf16.msra.mxu1 %v8096_v1  ;;  %7290 = vmatprep.subr.bf16.mxu0 %v8097_v2  ;;  %v8156_v1 = vld [vmem:[%s10564_s1 + $0x580] sm:$0xff]   ;;  %v8157_v2 = vld [vmem:[%s10564_s1 + $0x548] sm:$0xff]  }
  0x72   :  { %7312 = vmatprep.subr.bf16.mxu1 %v8098_v3  ;;  %v8158_v3 = vld [vmem:[%s10564_s1 + $0x5c8] sm:$0xff]  }
  0x74   :  { %7291 = vmatpush3.bf16.msra.mxu0 %v8099_v4  ;;  %v8159_v4 = vld [vmem:[%s10564_s1 + $0x508] sm:$0xff]  }
  0x75   :  { %7313 = vmatpush3.bf16.msra.mxu1 %v8100_v5  ;;  %7292 = vmatprep.subr.bf16.mxu0 %v8101_v6  ;;  %v8160_v5 = vld [vmem:[%s10564_s1 + $0x588] sm:$0xff]   ;;  %v8161_v6 = vld [vmem:[%s10564_s1 + $0x550] sm:$0xff]  }
  0x76   :  { %7314 = vmatprep.subr.bf16.mxu1 %v8102_v7  ;;  %v8162_v7 = vld [vmem:[%s10564_s1 + $0x5d0] sm:$0xff]  }
  0x78   :  { %7293 = vmatpush3.bf16.msra.mxu0 %v8103_v8  ;;  %v8163_v8 = vld [vmem:[%s10564_s1 + $0x510] sm:$0xff]  }
  0x79   :  { %7315 = vmatpush3.bf16.msra.mxu1 %v8104_v9  ;;  %7294 = vmatprep.subr.bf16.mxu0 %v8105_v10  ;;  %v8164_v9 = vld [vmem:[%s10564_s1 + $0x590] sm:$0xff]   ;;  %v8165_v10 = vld [vmem:[%s10564_s1 + $0x558] sm:$0xff]  }
  0x7a   :  { %7316 = vmatprep.subr.bf16.mxu1 %v8106_v11  ;;  %v8166_v11 = vld [vmem:[%s10564_s1 + $0x5d8] sm:$0xff]  }
  0x7c   :  { %7295 = vmatpush3.bf16.msra.mxu0 %v8107_v12  ;;  %v8167_v12 = vld [vmem:[%s10564_s1 + $0x518] sm:$0xff]  }
  0x7d   :  { %7317 = vmatpush3.bf16.msra.mxu1 %v8108_v13  ;;  %7296 = vmatprep.subr.bf16.mxu0 %v8109_v14  ;;  %v8168_v13 = vld [vmem:[%s10564_s1 + $0x598] sm:$0xff]   ;;  %v8169_v14 = vld [vmem:[%s10564_s1 + $0x560] sm:$0xff]  }
  0x7e   :  { %7318 = vmatprep.subr.bf16.mxu1 %v8110_v15  ;;  %v8170_v15 = vld [vmem:[%s10564_s1 + $0x5e0] sm:$0xff]  }
  0x80   :  { %7297 = vmatpush3.bf16.msra.mxu0 %v8111_v16  ;;  %v8171_v16 = vld [vmem:[%s10564_s1 + $0x520] sm:$0xff]  }
  0x81   :  { %7319 = vmatpush3.bf16.msra.mxu1 %v8112_v17  ;;  %7326 = vmatprep.subr.bf16.mxu0 %v8117_v23  ;;  %v8172_v17 = vld [vmem:[%s10564_s1 + $0x5a0] sm:$0xff]   ;;  %v8178_v23 = vld [vmem:[%s10564_s1 + $0x5f0] sm:$0xff]  }
  0x82   :  { %7348 = vmatprep.subr.bf16.mxu1 %v8118_v25  ;;  %v8180_v25 = vld [vmem:[%s10564_s1 + $0x5b0] sm:$0xff]  }
  0x83   :  { %5197 = vmatmul.mubr.bf16.vlgmr.msra.gmra.mrb[12].mxu0 %v6505_v20  ;;  %v8175_v20 = vld [vmem:[%s10564_s1 + $0x528] sm:$0xff]  }
  0x84   :  { %5237 = vmatmul.mubr.bf16.vlgmr.msra.gmra.mrb[12].mxu1 %v6507_v22  ;;  %7327 = vmatpush3.bf16.msra.mxu0 %v8119_v26  ;;  %v8177_v22 = vld [vmem:[%s10564_s1 + $0x570] sm:$0xff]   ;;  %v8181_v26 = vld [vmem:[%s10564_s1 + $0x578] sm:$0xff]  }
  0x85   :  { %7349 = vmatpush3.bf16.msra.mxu1 %v8120_v27  ;;  %7328 = vmatprep.subr.bf16.mxu0 %v8121_v28  ;;  %v8182_v27 = vld [vmem:[%s10564_s1 + $0x5f8] sm:$0xff]  }
  0x86   :  { %7350 = vmatprep.subr.bf16.mxu1 %v8122_v29  ;;  %5276 = vmatprep.mubr.bf16.mxu0 %v6510_v58  ;;  %v8183_v28 = vld [vmem:[%s10564_s1 + $0x538] sm:$0xff]   ;;  %v8211_v58 = vld [vmem:[%s10564_s1 + $0x628] sm:$0xff]  }
  0x87   :  { %5316 = vmatprep.mubr.bf16.mxu1 %v6512_v61  ;;  %v8184_v29 = vld [vmem:[%s10564_s1 + $0x5b8] sm:$0xff]   ;;  %v8214_v61 = vld [vmem:[%s10564_s1 + $0x6f0] sm:$0xff]  }
  0x88   :  { %7329 = vmatpush3.bf16.msra.mxu0 %v8123_v30  ;;  %v31_v30 = vld [vmem:[%s10565_s0 + $0x50] sm:$0xff] }
  0x89   :  { %7351 = vmatpush3.bf16.msra.mxu1 %v8124_v31  ;;  %7330 = vmatprep.subr.bf16.mxu0 %v8125_v32  ;;  %v32_v31 = vld [vmem:[%s10565_s0 + $0x58] sm:$0xff]  ;;  %v6513_v32 = vcombine.low %v31_v30, %v31_v30 }
  0x8a   :  { %7352 = vmatprep.subr.bf16.mxu1 %v8126_v33  ;;  %v6514_v33 = vcombine.high %v31_v30, %v31_v30  ;;  %v8244_v30 = vld [vmem:[%s10564_s1 + $0x7a0] sm:$0xff]  }
  0x8c   :  { %7331 = vmatpush3.bf16.msra.mxu0 %v8127_v34  ;;  %v6515_v34 = vcombine.low %v32_v31, %v32_v31 }
  0x8d   :  { %7353 = vmatpush3.bf16.msra.mxu1 %v8128_v35  ;;  %7332 = vmatprep.subr.bf16.mxu0 %v8129_v36  ;;  %v6516_v35 = vcombine.high %v32_v31, %v32_v31  ;;  %v8189_v36 = vld [vmem:[%s10564_s1 + $0x640] sm:$0xff]  }
  0x8e   :  { %7354 = vmatprep.subr.bf16.mxu1 %v8130_v37  ;;  %v8190_v37 = vld [vmem:[%s10564_s1 + $0x6c0] sm:$0xff]  }
  0x90   :  { %7333 = vmatpush3.bf16.msra.mxu0 %v8131_v38  ;;  %v8191_v38 = vld [vmem:[%s10564_s1 + $0x600] sm:$0xff]  }
  0x91   :  { %7355 = vmatpush3.bf16.msra.mxu1 %v8132_v39  ;;  %7334 = vmatprep.subr.bf16.mxu0 %v8133_v40  ;;  %v8192_v39 = vld [vmem:[%s10564_s1 + $0x680] sm:$0xff]   ;;  %v8193_v40 = vld [vmem:[%s10564_s1 + $0x648] sm:$0xff]  }
  0x92   :  { %7356 = vmatprep.subr.bf16.mxu1 %v8134_v41  ;;  %v8194_v41 = vld [vmem:[%s10564_s1 + $0x6c8] sm:$0xff]  }
  0x94   :  { %7335 = vmatpush3.bf16.msra.mxu0 %v8135_v42  ;;  %v8195_v42 = vld [vmem:[%s10564_s1 + $0x608] sm:$0xff]  }
  0x95   :  { %7357 = vmatpush3.bf16.msra.mxu1 %v8136_v43  ;;  %7336 = vmatprep.subr.bf16.mxu0 %v8137_v44  ;;  %v8196_v43 = vld [vmem:[%s10564_s1 + $0x688] sm:$0xff]   ;;  %v8197_v44 = vld [vmem:[%s10564_s1 + $0x650] sm:$0xff]  }
  0x96   :  { %7358 = vmatprep.subr.bf16.mxu1 %v8138_v45  ;;  %v8198_v45 = vld [vmem:[%s10564_s1 + $0x6d0] sm:$0xff]  }
  0x98   :  { %7337 = vmatpush3.bf16.msra.mxu0 %v8139_v46  ;;  %v8199_v46 = vld [vmem:[%s10564_s1 + $0x610] sm:$0xff]  }
  0x99   :  { %7359 = vmatpush3.bf16.msra.mxu1 %v8140_v47  ;;  %7338 = vmatprep.subr.bf16.mxu0 %v8141_v48  ;;  %v8200_v47 = vld [vmem:[%s10564_s1 + $0x690] sm:$0xff]   ;;  %v8201_v48 = vld [vmem:[%s10564_s1 + $0x658] sm:$0xff]  }
  0x9a   :  { %7360 = vmatprep.subr.bf16.mxu1 %v8142_v49  ;;  %v8202_v49 = vld [vmem:[%s10564_s1 + $0x6d8] sm:$0xff]  }
  0x9c   :  { %7339 = vmatpush3.bf16.msra.mxu0 %v8143_v50  ;;  %v8203_v50 = vld [vmem:[%s10564_s1 + $0x618] sm:$0xff]  }
  0x9d   :  { %7361 = vmatpush3.bf16.msra.mxu1 %v8144_v51  ;;  %7340 = vmatprep.subr.bf16.mxu0 %v8145_v52  ;;  %v8204_v51 = vld [vmem:[%s10564_s1 + $0x698] sm:$0xff]   ;;  %v8205_v52 = vld [vmem:[%s10564_s1 + $0x660] sm:$0xff]  }
  0x9e   :  { %7362 = vmatprep.subr.bf16.mxu1 %v8146_v53  ;;  %v8206_v53 = vld [vmem:[%s10564_s1 + $0x6e0] sm:$0xff]  }
  0xa0   :  { %7341 = vmatpush3.bf16.msra.mxu0 %v8147_v54  ;;  %v8207_v54 = vld [vmem:[%s10564_s1 + $0x620] sm:$0xff]  }
  0xa1   :  { %7363 = vmatpush3.bf16.msra.mxu1 %v8148_v55  ;;  %7370 = vmatprep.subr.bf16.mxu0 %v8153_v62  ;;  %v8208_v55 = vld [vmem:[%s10564_s1 + $0x6a0] sm:$0xff]   ;;  %v8215_v62 = vld [vmem:[%s10564_s1 + $0x630] sm:$0xff]  }
  0xa2   :  { %7392 = vmatprep.subr.bf16.mxu1 %v8154_v63  ;;  %v8216_v63 = vld [vmem:[%s10564_s1 + $0x6b0] sm:$0xff]  }
  0xa3   :  { %5277 = vmatmul.mubr.bf16.vlgmr.msra.gmra.mrb[16].mxu0 %v6509_v57  ;;  %v8210_v57 = vld [vmem:[%s10564_s1 + $0x6e8] sm:$0xff]  }
  0xa4   :  { %5317 = vmatmul.mubr.bf16.vlgmr.msra.gmra.mrb[16].mxu1 %v6511_v60  ;;  %7371 = vmatpush3.bf16.msra.mxu0 %v8155_v0  ;;  %v8213_v60 = vld [vmem:[%s10564_s1 + $0x670] sm:$0xff]   ;;  %v8217_v0 = vld [vmem:[%s10564_s1 + $0x678] sm:$0xff]  }
  0xa5   :  { %7393 = vmatpush3.bf16.msra.mxu1 %v8156_v1  ;;  %7372 = vmatprep.subr.bf16.mxu0 %v8157_v2  ;;  %v8218_v1 = vld [vmem:[%s10564_s1 + $0x6f8] sm:$0xff]  }
  0xa6   :  { %7394 = vmatprep.subr.bf16.mxu1 %v8158_v3  ;;  %5356 = vmatprep.mubr.bf16.mxu0 %v6514_v33  ;;  %v8219_v2 = vld [vmem:[%s10564_s1 + $0x638] sm:$0xff]  }
  0xa7   :  { %5396 = vmatprep.mubr.bf16.mxu1 %v6516_v35  ;;  %v8220_v3 = vld [vmem:[%s10564_s1 + $0x6b8] sm:$0xff]  }
  0xa8   :  { %7373 = vmatpush3.bf16.msra.mxu0 %v8159_v4  ;;  %v33_v4 = vld [vmem:[%s10565_s0 + $0x60] sm:$0xff] }
  0xa9   :  { %7395 = vmatpush3.bf16.msra.mxu1 %v8160_v5  ;;  %7374 = vmatprep.subr.bf16.mxu0 %v8161_v6  ;;  %v34_v5 = vld [vmem:[%s10565_s0 + $0x68] sm:$0xff]  ;;  %v6517_v6 = vcombine.low %v33_v4, %v33_v4 }
  0xaa   :  { %7396 = vmatprep.subr.bf16.mxu1 %v8162_v7  ;;  %v6518_v7 = vcombine.high %v33_v4, %v33_v4  ;;  %v8268_v4 = vld [vmem:[%s10564_s1 + $0x888] sm:$0xff]  }
  0xac   :  { %7375 = vmatpush3.bf16.msra.mxu0 %v8163_v8  ;;  %v6519_v8 = vcombine.low %v34_v5, %v34_v5 }
  0xad   :  { %7397 = vmatpush3.bf16.msra.mxu1 %v8164_v9  ;;  %7376 = vmatprep.subr.bf16.mxu0 %v8165_v10  ;;  %v8225_v9 = vld [vmem:[%s10564_s1 + $0x740] sm:$0xff]   ;;  %v6520_v10 = vcombine.high %v34_v5, %v34_v5  ;;  %v8269_v5 = vld [vmem:[%s10564_s1 + $0x850] sm:$0xff]  }
  0xae   :  { %7398 = vmatprep.subr.bf16.mxu1 %v8166_v11  ;;  %v8226_v11 = vld [vmem:[%s10564_s1 + $0x7c0] sm:$0xff]  }
  0xb0   :  { %7377 = vmatpush3.bf16.msra.mxu0 %v8167_v12  ;;  %v8227_v12 = vld [vmem:[%s10564_s1 + $0x700] sm:$0xff]  }
  0xb1   :  { %7399 = vmatpush3.bf16.msra.mxu1 %v8168_v13  ;;  %7378 = vmatprep.subr.bf16.mxu0 %v8169_v14  ;;  %v8228_v13 = vld [vmem:[%s10564_s1 + $0x780] sm:$0xff]   ;;  %v8229_v14 = vld [vmem:[%s10564_s1 + $0x748] sm:$0xff]  }
  0xb2   :  { %7400 = vmatprep.subr.bf16.mxu1 %v8170_v15  ;;  %v8230_v15 = vld [vmem:[%s10564_s1 + $0x7c8] sm:$0xff]  }
  0xb4   :  { %7379 = vmatpush3.bf16.msra.mxu0 %v8171_v16  ;;  %v8231_v16 = vld [vmem:[%s10564_s1 + $0x708] sm:$0xff]  }
  0xb5   :  { %7401 = vmatpush3.bf16.msra.mxu1 %v8172_v17  ;;  %7380 = vmatprep.subr.bf16.mxu0 %v8173_v18  ;;  %v8232_v17 = vld [vmem:[%s10564_s1 + $0x788] sm:$0xff]   ;;  %v8233_v18 = vld [vmem:[%s10564_s1 + $0x750] sm:$0xff]  }
  0xb6   :  { %7402 = vmatprep.subr.bf16.mxu1 %v8174_v19  ;;  %v8234_v19 = vld [vmem:[%s10564_s1 + $0x7d0] sm:$0xff]  }
  0xb8   :  { %7381 = vmatpush3.bf16.msra.mxu0 %v8175_v20  ;;  %v8235_v20 = vld [vmem:[%s10564_s1 + $0x710] sm:$0xff]  }
  0xb9   :  { %7403 = vmatpush3.bf16.msra.mxu1 %v8176_v21  ;;  %7382 = vmatprep.subr.bf16.mxu0 %v8177_v22  ;;  %v8236_v21 = vld [vmem:[%s10564_s1 + $0x790] sm:$0xff]   ;;  %v8237_v22 = vld [vmem:[%s10564_s1 + $0x758] sm:$0xff]  }
  0xba   :  { %7404 = vmatprep.subr.bf16.mxu1 %v8178_v23  ;;  %v8238_v23 = vld [vmem:[%s10564_s1 + $0x7d8] sm:$0xff]  }
  0xbc   :  { %7383 = vmatpush3.bf16.msra.mxu0 %v8179_v24  ;;  %v8239_v24 = vld [vmem:[%s10564_s1 + $0x718] sm:$0xff]  }
  0xbd   :  { %7405 = vmatpush3.bf16.msra.mxu1 %v8180_v25  ;;  %7384 = vmatprep.subr.bf16.mxu0 %v8181_v26  ;;  %v8240_v25 = vld [vmem:[%s10564_s1 + $0x798] sm:$0xff]   ;;  %v8241_v26 = vld [vmem:[%s10564_s1 + $0x760] sm:$0xff]  }
  0xbe   :  { %7406 = vmatprep.subr.bf16.mxu1 %v8182_v27  ;;  %v8242_v27 = vld [vmem:[%s10564_s1 + $0x7e0] sm:$0xff]  }
  0xc0   :  { %7385 = vmatpush3.bf16.msra.mxu0 %v8183_v28  ;;  %v8243_v28 = vld [vmem:[%s10564_s1 + $0x720] sm:$0xff]  }
  0xc1   :  { %7407 = vmatpush3.bf16.msra.mxu1 %v8184_v29  ;;  %7414 = vmatprep.subr.bf16.mxu0 %v8189_v36 }
  0xc2   :  { %7436 = vmatprep.subr.bf16.mxu1 %v8190_v37  ;;  %v8245_v37 = vld [vmem:[%s10564_s1 + $0x768] sm:$0xff]  }
  0xc3   :  { %5357 = vmatmul.mubr.bf16.vlgmr.msra.gmra.mrb[20].mxu0 %v6513_v32  ;;  %v6492_v32 = vld [vmem:[%s10566_s2] ss:$0 sm:$0xff] }
  0xc4   :  { %5397 = vmatmul.mubr.bf16.vlgmr.msra.gmra.mrb[20].mxu1 %v6515_v34  ;;  %7415 = vmatpush3.bf16.msra.mxu0 %v8191_v38 }
  0xc5   :  { %7437 = vmatpush3.bf16.msra.mxu1 %v8192_v39  ;;  %7416 = vmatprep.subr.bf16.mxu0 %v8193_v40  ;;  %v8246_v39 = vld [vmem:[%s10564_s1 + $0x7e8] sm:$0xff]  }
  0xc6   :  { %7438 = vmatprep.subr.bf16.mxu1 %v8194_v41  ;;  %5436 = vmatprep.mubr.bf16.mxu0 %v6518_v7  ;;  %v8271_v7 = vld [vmem:[%s10564_s1 + $0x810] sm:$0xff]  }
  0xc7   :  { %5476 = vmatprep.mubr.bf16.mxu1 %v6520_v10  ;;  %v8274_v10 = vld [vmem:[%s10564_s1 + $0x8d8] sm:$0xff]  }
  0xc8   :  { %7417 = vmatpush3.bf16.msra.mxu0 %v8195_v42  ;;  %v8247_v42 = vld [vmem:[%s10564_s1 + $0x728] sm:$0xff]  }
  0xc9   :  { %7439 = vmatpush3.bf16.msra.mxu1 %v8196_v43  ;;  %7418 = vmatprep.subr.bf16.mxu0 %v8197_v44  ;;  %v8248_v44 = vld [vmem:[%s10564_s1 + $0x7a8] sm:$0xff]  }
  0xca   :  { %7440 = vmatprep.subr.bf16.mxu1 %v8198_v45 }
  0xcc   :  { %7419 = vmatpush3.bf16.msra.mxu0 %v8199_v46 }
  0xcd   :  { %7441 = vmatpush3.bf16.msra.mxu1 %v8200_v47  ;;  %7420 = vmatprep.subr.bf16.mxu0 %v8201_v48  ;;  %v8249_v47 = vld [vmem:[%s10564_s1 + $0x770] sm:$0xff]  }
  0xce   :  { %7442 = vmatprep.subr.bf16.mxu1 %v8202_v49  ;;  %v8250_v48 = vld [vmem:[%s10564_s1 + $0x7f0] sm:$0xff]  }
  0xcf   :  { %v8251_v49 = vld [vmem:[%s10564_s1 + $0x730] sm:$0xff]  }
  0xd0   :  { %7421 = vmatpush3.bf16.msra.mxu0 %v8203_v50  ;;  %v8252_v50 = vld [vmem:[%s10564_s1 + $0x7b0] sm:$0xff]  }
  0xd1   :  { %7443 = vmatpush3.bf16.msra.mxu1 %v8204_v51  ;;  %7422 = vmatprep.subr.bf16.mxu0 %v8205_v52  ;;  %v8253_v51 = vld [vmem:[%s10564_s1 + $0x778] sm:$0xff]  }
  0xd2   :  { %7444 = vmatprep.subr.bf16.mxu1 %v8206_v53  ;;  %v8254_v52 = vld [vmem:[%s10564_s1 + $0x7f8] sm:$0xff]  }
  0xd3   :  { %v8255_v53 = vld [vmem:[%s10564_s1 + $0x738] sm:$0xff]  }
  0xd4   :  { %7423 = vmatpush3.bf16.msra.mxu0 %v8207_v54  ;;  %v8256_v54 = vld [vmem:[%s10564_s1 + $0x7b8] sm:$0xff]  }
  0xd5   :  { %7445 = vmatpush3.bf16.msra.mxu1 %v8208_v55  ;;  %7424 = vmatprep.subr.bf16.mxu0 %v8209_v56  ;;  %v35_v55 = vld [vmem:[%s10565_s0 + $0x70] sm:$0xff]  ;;  %v36_v56 = vld [vmem:[%s10565_s0 + $0x78] sm:$0xff] }
  0xd6   :  { %7446 = vmatprep.subr.bf16.mxu1 %v8210_v57  ;;  %v6521_v57 = vcombine.low %v35_v55, %v35_v55 }
  0xd8   :  { %7425 = vmatpush3.bf16.msra.mxu0 %v8211_v58  ;;  %v6522_v58 = vcombine.high %v35_v55, %v35_v55  ;;  %v8305_v55 = vld [vmem:[%s10564_s1 + $0x950] sm:$0xff]  }
  0xd9   :  { %7447 = vmatpush3.bf16.msra.mxu1 %v8212_v59  ;;  %7426 = vmatprep.subr.bf16.mxu0 %v8213_v60  ;;  %v6523_v59 = vcombine.low %v36_v56, %v36_v56  ;;  %v6524_v60 = vcombine.high %v36_v56, %v36_v56  ;;  %v8306_v56 = vld [vmem:[%s10564_s1 + $0x9d0] sm:$0xff]  }
  0xda   :  { %7448 = vmatprep.subr.bf16.mxu1 %v8214_v61  ;;  %v8261_v61 = vld [vmem:[%s10564_s1 + $0x840] sm:$0xff]  }
  0xdc   :  { %7427 = vmatpush3.bf16.msra.mxu0 %v8215_v62  ;;  %v8262_v62 = vld [vmem:[%s10564_s1 + $0x8c0] sm:$0xff]  }
  0xdd   :  { %7449 = vmatpush3.bf16.msra.mxu1 %v8216_v63  ;;  %7428 = vmatprep.subr.bf16.mxu0 %v8217_v0  ;;  %v8263_v63 = vld [vmem:[%s10564_s1 + $0x800] sm:$0xff]  }
  0xde   :  { %7450 = vmatprep.subr.bf16.mxu1 %v8218_v1  ;;  %v8264_v0 = vld [vmem:[%s10564_s1 + $0x880] sm:$0xff]   ;;  %v8265_v1 = vld [vmem:[%s10564_s1 + $0x848] sm:$0xff]  }
  0xe0   :  { %7429 = vmatpush3.bf16.msra.mxu0 %v8219_v2  ;;  %v8266_v2 = vld [vmem:[%s10564_s1 + $0x8c8] sm:$0xff]  }
  0xe1   :  { %7451 = vmatpush3.bf16.msra.mxu1 %v8220_v3  ;;  %7458 = vmatprep.subr.bf16.mxu0 %v8225_v9  ;;  %v8267_v3 = vld [vmem:[%s10564_s1 + $0x808] sm:$0xff]   ;;  %v8273_v9 = vld [vmem:[%s10564_s1 + $0x858] sm:$0xff]  }
  0xe2   :  { %7480 = vmatprep.subr.bf16.mxu1 %v8226_v11  ;;  %v8275_v11 = vld [vmem:[%s10564_s1 + $0x818] sm:$0xff]  }
  0xe3   :  { %5437 = vmatmul.mubr.bf16.vlgmr.msra.gmra.mrb[24].mxu0 %v6517_v6  ;;  %v8270_v6 = vld [vmem:[%s10564_s1 + $0x8d0] sm:$0xff]  }
  0xe4   :  { %5477 = vmatmul.mubr.bf16.vlgmr.msra.gmra.mrb[24].mxu1 %v6519_v8  ;;  %7459 = vmatpush3.bf16.msra.mxu0 %v8227_v12  ;;  %v8272_v8 = vld [vmem:[%s10564_s1 + $0x890] sm:$0xff]   ;;  %v8276_v12 = vld [vmem:[%s10564_s1 + $0x898] sm:$0xff]  }
  0xe5   :  { %7481 = vmatpush3.bf16.msra.mxu1 %v8228_v13  ;;  %7460 = vmatprep.subr.bf16.mxu0 %v8229_v14  ;;  %v8277_v13 = vld [vmem:[%s10564_s1 + $0x860] sm:$0xff]  }
  0xe6   :  { %7482 = vmatprep.subr.bf16.mxu1 %v8230_v15  ;;  %5516 = vmatprep.mubr.bf16.mxu0 %v6522_v58  ;;  %v8278_v14 = vld [vmem:[%s10564_s1 + $0x8e0] sm:$0xff]   ;;  %v8308_v58 = vld [vmem:[%s10564_s1 + $0x990] sm:$0xff]  }
  0xe7   :  { %5556 = vmatprep.mubr.bf16.mxu1 %v6524_v60  ;;  %v8279_v15 = vld [vmem:[%s10564_s1 + $0x820] sm:$0xff]   ;;  %v8310_v60 = vld [vmem:[%s10564_s1 + $0x9d8] sm:$0xff]  }
  0xe8   :  { %7461 = vmatpush3.bf16.msra.mxu0 %v8231_v16 }
  0xe9   :  { %7483 = vmatpush3.bf16.msra.mxu1 %v8232_v17  ;;  %7462 = vmatprep.subr.bf16.mxu0 %v8233_v18  ;;  %v8280_v17 = vld [vmem:[%s10564_s1 + $0x8a0] sm:$0xff]  }
  0xea   :  { %7484 = vmatprep.subr.bf16.mxu1 %v8234_v19 }
  0xec   :  { %7463 = vmatpush3.bf16.msra.mxu0 %v8235_v20 }
  0xed   :  { %7485 = vmatpush3.bf16.msra.mxu1 %v8236_v21  ;;  %7464 = vmatprep.subr.bf16.mxu0 %v8237_v22 }
  0xee   :  { %7486 = vmatprep.subr.bf16.mxu1 %v8238_v23  ;;  %v8281_v23 = vld [vmem:[%s10564_s1 + $0x868] sm:$0xff]  }
  0xf0   :  { %7465 = vmatpush3.bf16.msra.mxu0 %v8239_v24 }
  0xf1   :  { %7487 = vmatpush3.bf16.msra.mxu1 %v8240_v25  ;;  %7466 = vmatprep.subr.bf16.mxu0 %v8241_v26  ;;  %v8282_v25 = vld [vmem:[%s10564_s1 + $0x8e8] sm:$0xff]  }
  0xf2   :  { %7488 = vmatprep.subr.bf16.mxu1 %v8242_v27 }
  0xf4   :  { %7467 = vmatpush3.bf16.msra.mxu0 %v8243_v28  ;;  %v8283_v28 = vld [vmem:[%s10564_s1 + $0x828] sm:$0xff]  }
  0xf5   :  { %7489 = vmatpush3.bf16.msra.mxu1 %v8244_v30  ;;  %7468 = vmatprep.subr.bf16.mxu0 %v8245_v37  ;;  %v8284_v30 = vld [vmem:[%s10564_s1 + $0x8a8] sm:$0xff]   ;;  %v8289_v37 = vld [vmem:[%s10564_s1 + $0x878] sm:$0xff]  }
  0xf6   :  { %v7166_v29 = vpop.f32.mrb[0].mxu0  ;;  %7490 = vmatprep.subr.bf16.mxu1 %v8246_v39  ;;  %v8291_v39 = vld [vmem:[%s10564_s1 + $0x838] sm:$0xff]  }
  0xf7   :  { %v7188_v31 = vpop.f32.mrb[0].mxu1  ;;  %v7167_v33 = vpop.f32.mrb[1].mxu0 }
  0xf8   :  { %v7189_v34 = vpop.f32.mrb[1].mxu1  ;;  %v7168_v35 = vadd.f32 %v7167_v33, %v7166_v29  ;;  %v7169_v38 = vpop.f32.mrb[2].mxu0  ;;  %7469 = vmatpush3.bf16.msra.mxu0 %v8247_v42  ;;  %v8285_v33 = vld [vmem:[%s10564_s1 + $0x870] sm:$0xff]   ;;  %v38_v42 = vld [vmem:[%s10565_s0 + $0x88] sm:$0xff] }
  0xf9   :  { %v7190_v36 = vadd.f32 %v7189_v34, %v7188_v31  ;;  %v7191_v40 = vpop.f32.mrb[2].mxu1  ;;  %v7170_v43 = vpop.f32.mrb[3].mxu0  ;;  %7491 = vmatpush3.bf16.msra.mxu1 %v8248_v44  ;;  %7470 = vmatprep.subr.bf16.mxu0 %v8249_v47  ;;  %v8286_v34 = vld [vmem:[%s10564_s1 + $0x8f0] sm:$0xff]   ;;  %v8290_v38 = vld [vmem:[%s10564_s1 + $0x8f8] sm:$0xff]   ;;  %v8297_v47 = vld [vmem:[%s10564_s1 + $0x940] sm:$0xff]  }
  0xfa   :  { %v4959_v41 = vadd.f32 %v7168_v35, %v6492_v32  ;;  %v7192_v45 = vpop.f32.mrb[3].mxu1  ;;  %7492 = vmatprep.subr.bf16.mxu1 %v8250_v48  ;;  %v8287_v35 = vld [vmem:[%s10564_s1 + $0x830] sm:$0xff]   ;;  %v8292_v40 = vld [vmem:[%s10564_s1 + $0x8b8] sm:$0xff]   ;;  %v8298_v48 = vld [vmem:[%s10564_s1 + $0x9c0] sm:$0xff]  }
  0xfb   :  { %v6527_v45 = vcombine.low %v38_v42, %v38_v42 }
  0xfc   :  { %v9454_v46 = vadd.f32 %v7190_v36, %v4959_v41  ;;  %7471 = vmatpush3.bf16.msra.mxu0 %v8251_v49  ;;  %v8288_v36 = vld [vmem:[%s10564_s1 + $0x8b0] sm:$0xff]   ;;  %v37_v41 = vld [vmem:[%s10565_s0 + $0x80] sm:$0xff] }
  0xfd   :  { %7493 = vmatpush3.bf16.msra.mxu1 %v8252_v50  ;;  %7472 = vmatprep.subr.bf16.mxu0 %v8253_v51  ;;  %v6525_v43 = vcombine.low %v37_v41, %v37_v41  ;;  %v6526_v44 = vcombine.high %v37_v41, %v37_v41  ;;  %v8299_v49 = vld [vmem:[%s10564_s1 + $0x900] sm:$0xff]   ;;  %v8301_v51 = vld [vmem:[%s10564_s1 + $0x948] sm:$0xff]   ;;  %v8341_v41 = vld [vmem:[%s10564_s1 + $0xa50] sm:$0xff]  }
  0xfe   :  { %7494 = vmatprep.subr.bf16.mxu1 %v8254_v52  ;;  %v8300_v50 = vld [vmem:[%s10564_s1 + $0x980] sm:$0xff]   ;;  %v8302_v52 = vld [vmem:[%s10564_s1 + $0x9c8] sm:$0xff]  }
 0x100   :  { %7473 = vmatpush3.bf16.msra.mxu0 %v8255_v53  ;;  %v8303_v53 = vld [vmem:[%s10564_s1 + $0x908] sm:$0xff]  }
 0x101   :  { %7495 = vmatpush3.bf16.msra.mxu1 %v8256_v54  ;;  %7502 = vmatprep.subr.bf16.mxu0 %v8261_v61  ;;  %v8304_v54 = vld [vmem:[%s10564_s1 + $0x988] sm:$0xff]   ;;  %v8311_v61 = vld [vmem:[%s10564_s1 + $0x918] sm:$0xff]  }
 0x102   :  { %7524 = vmatprep.subr.bf16.mxu1 %v8262_v62  ;;  %v8312_v62 = vld [vmem:[%s10564_s1 + $0x998] sm:$0xff]  }
 0x103   :  { %5517 = vmatmul.mubr.bf16.vlgmr.msra.gmra.mrb[28].mxu0 %v6521_v57  ;;  %v8307_v57 = vld [vmem:[%s10564_s1 + $0x910] sm:$0xff]  }
 0x104   :  { %5557 = vmatmul.mubr.bf16.vlgmr.msra.gmra.mrb[28].mxu1 %v6523_v59  ;;  %7503 = vmatpush3.bf16.msra.mxu0 %v8263_v63  ;;  %v8309_v59 = vld [vmem:[%s10564_s1 + $0x958] sm:$0xff]   ;;  %v8313_v63 = vld [vmem:[%s10564_s1 + $0x960] sm:$0xff]  }
 0x105   :  { %7525 = vmatpush3.bf16.msra.mxu1 %v8264_v0  ;;  %7504 = vmatprep.subr.bf16.mxu0 %v8265_v1  ;;  %v8314_v0 = vld [vmem:[%s10564_s1 + $0x9e0] sm:$0xff]  }
 0x106   :  { %7526 = vmatprep.subr.bf16.mxu1 %v8266_v2  ;;  %5596 = vmatprep.mubr.bf16.mxu0 %v6526_v44  ;;  %v8315_v2 = vld [vmem:[%s10564_s1 + $0x920] sm:$0xff]   ;;  %v8344_v44 = vld [vmem:[%s10564_s1 + $0xa90] sm:$0xff]  }
 0x108   :  { %7505 = vmatpush3.bf16.msra.mxu0 %v8267_v3 }
 0x109   :  { %7527 = vmatpush3.bf16.msra.mxu1 %v8268_v4  ;;  %7506 = vmatprep.subr.bf16.mxu0 %v8269_v5  ;;  %v8316_v4 = vld [vmem:[%s10564_s1 + $0x9a0] sm:$0xff]  }
 0x10a   :  { %7528 = vmatprep.subr.bf16.mxu1 %v8270_v6 }
 0x10c   :  { %7507 = vmatpush3.bf16.msra.mxu0 %v8271_v7 }
 0x10d   :  { %7529 = vmatpush3.bf16.msra.mxu1 %v8272_v8  ;;  %7508 = vmatprep.subr.bf16.mxu0 %v8273_v9  ;;  %v8317_v8 = vld [vmem:[%s10564_s1 + $0x968] sm:$0xff]  }
 0x10e   :  { %7530 = vmatprep.subr.bf16.mxu1 %v8274_v10  ;;  %v8318_v10 = vld [vmem:[%s10564_s1 + $0x9e8] sm:$0xff]  }
 0x110   :  { %7509 = vmatpush3.bf16.msra.mxu0 %v8275_v11 }
 0x111   :  { %7531 = vmatpush3.bf16.msra.mxu1 %v8276_v12  ;;  %7510 = vmatprep.subr.bf16.mxu0 %v8277_v13 }
 0x112   :  { %7532 = vmatprep.subr.bf16.mxu1 %v8278_v14  ;;  %v8319_v14 = vld [vmem:[%s10564_s1 + $0x928] sm:$0xff]  }
 0x114   :  { %7511 = vmatpush3.bf16.msra.mxu0 %v8279_v15  ;;  %v8320_v15 = vld [vmem:[%s10564_s1 + $0x9a8] sm:$0xff]  }
 0x115   :  { %7533 = vmatpush3.bf16.msra.mxu1 %v8280_v17  ;;  %7512 = vmatprep.subr.bf16.mxu0 %v8281_v23  ;;  %v8325_v23 = vld [vmem:[%s10564_s1 + $0x978] sm:$0xff]  }
 0x116   :  { %v7210_v16 = vpop.f32.mrb[4].mxu0  ;;  %7534 = vmatprep.subr.bf16.mxu1 %v8282_v25  ;;  %v8327_v25 = vld [vmem:[%s10564_s1 + $0x938] sm:$0xff]  }
 0x117   :  { %v7232_v18 = vpop.f32.mrb[4].mxu1  ;;  %v7211_v19 = vpop.f32.mrb[5].mxu0 }
 0x118   :  { %v7233_v20 = vpop.f32.mrb[5].mxu1  ;;  %v7212_v21 = vadd.f32 %v7211_v19, %v7210_v16  ;;  %v7213_v24 = vpop.f32.mrb[6].mxu0  ;;  %7513 = vmatpush3.bf16.msra.mxu0 %v8283_v28  ;;  %v8321_v19 = vld [vmem:[%s10564_s1 + $0x970] sm:$0xff]   ;;  %v40_v28 = vld [vmem:[%s10565_s0 + $0x98] sm:$0xff] }
 0x119   :  { %v7234_v22 = vadd.f32 %v7233_v20, %v7232_v18  ;;  %v7235_v26 = vpop.f32.mrb[6].mxu1  ;;  %v7214_v29 = vpop.f32.mrb[7].mxu0  ;;  %7535 = vmatpush3.bf16.msra.mxu1 %v8284_v30  ;;  %7514 = vmatprep.subr.bf16.mxu0 %v8285_v33  ;;  %v8322_v20 = vld [vmem:[%s10564_s1 + $0x9f0] sm:$0xff]   ;;  %v8326_v24 = vld [vmem:[%s10564_s1 + $0x9f8] sm:$0xff]   ;;  %v6532_v33 = vcombine.high %v40_v28, %v40_v28 }
 0x11a   :  { %v5039_v27 = vadd.f32 %v7212_v21, %v9454_v46  ;;  %v7236_v31 = vpop.f32.mrb[7].mxu1  ;;  %7536 = vmatprep.subr.bf16.mxu1 %v8286_v34  ;;  %v6528_v46 = vcombine.high %v38_v42, %v38_v42  ;;  %v8323_v21 = vld [vmem:[%s10564_s1 + $0x930] sm:$0xff]   ;;  %v8328_v26 = vld [vmem:[%s10564_s1 + $0x9b8] sm:$0xff]   ;;  %v8334_v34 = vld [vmem:[%s10564_s1 + $0xac0] sm:$0xff]  }
 0x11b   :  { %v6531_v31 = vcombine.low %v40_v28, %v40_v28  ;;  %v8342_v42 = vld [vmem:[%s10564_s1 + $0xad0] sm:$0xff]  }
 0x11c   :  { %v9559_v32 = vadd.f32 %v7234_v22, %v5039_v27  ;;  %7515 = vmatpush3.bf16.msra.mxu0 %v8287_v35  ;;  %5636 = vmatprep.mubr.bf16.mxu1 %v6528_v46  ;;  %v8324_v22 = vld [vmem:[%s10564_s1 + $0x9b0] sm:$0xff]   ;;  %v8335_v35 = vld [vmem:[%s10564_s1 + $0xa00] sm:$0xff]   ;;  %v8346_v46 = vld [vmem:[%s10564_s1 + $0xad8] sm:$0xff]  }
 0x11d   :  { %7537 = vmatpush3.bf16.msra.mxu1 %v8288_v36  ;;  %7516 = vmatprep.subr.bf16.mxu0 %v8289_v37  ;;  %v39_v27 = vld [vmem:[%s10565_s0 + $0x90] sm:$0xff]  ;;  %v8336_v36 = vld [vmem:[%s10564_s1 + $0xa80] sm:$0xff]   ;;  %v8337_v37 = vld [vmem:[%s10564_s1 + $0xa48] sm:$0xff]  }
 0x11e   :  { %7538 = vmatprep.subr.bf16.mxu1 %v8290_v38  ;;  %v6529_v29 = vcombine.low %v39_v27, %v39_v27  ;;  %v6530_v30 = vcombine.high %v39_v27, %v39_v27  ;;  %v8338_v38 = vld [vmem:[%s10564_s1 + $0xac8] sm:$0xff]   ;;  %v8377_v27 = vld [vmem:[%s10564_s1 + $0xb50] sm:$0xff]  }
 0x11f   :  { %v8378_v28 = vld [vmem:[%s10564_s1 + $0xbd0] sm:$0xff]  }
 0x120   :  { %7517 = vmatpush3.bf16.msra.mxu0 %v8291_v39  ;;  %v8339_v39 = vld [vmem:[%s10564_s1 + $0xa08] sm:$0xff]  }
 0x121   :  { %7539 = vmatpush3.bf16.msra.mxu1 %v8292_v40  ;;  %7546 = vmatprep.subr.bf16.mxu0 %v8297_v47  ;;  %v8340_v40 = vld [vmem:[%s10564_s1 + $0xa88] sm:$0xff]   ;;  %v8347_v47 = vld [vmem:[%s10564_s1 + $0xa18] sm:$0xff]  }
 0x122   :  { %7568 = vmatprep.subr.bf16.mxu1 %v8298_v48  ;;  %v8348_v48 = vld [vmem:[%s10564_s1 + $0xa98] sm:$0xff]  }
 0x123   :  { %5597 = vmatmul.mubr.bf16.vlgmr.msra.gmra.mrb[32].mxu0 %v6525_v43  ;;  %v8343_v43 = vld [vmem:[%s10564_s1 + $0xa10] sm:$0xff]  }
 0x124   :  { %5637 = vmatmul.mubr.bf16.vlgmr.msra.gmra.mrb[32].mxu1 %v6527_v45  ;;  %7547 = vmatpush3.bf16.msra.mxu0 %v8299_v49  ;;  %v8345_v45 = vld [vmem:[%s10564_s1 + $0xa58] sm:$0xff]   ;;  %v8349_v49 = vld [vmem:[%s10564_s1 + $0xa60] sm:$0xff]  }
 0x125   :  { %7569 = vmatpush3.bf16.msra.mxu1 %v8300_v50  ;;  %7548 = vmatprep.subr.bf16.mxu0 %v8301_v51  ;;  %v8350_v50 = vld [vmem:[%s10564_s1 + $0xae0] sm:$0xff]  }
 0x126   :  { %7570 = vmatprep.subr.bf16.mxu1 %v8302_v52  ;;  %5676 = vmatprep.mubr.bf16.mxu0 %v6530_v30  ;;  %v8351_v52 = vld [vmem:[%s10564_s1 + $0xa20] sm:$0xff]   ;;  %v8380_v30 = vld [vmem:[%s10564_s1 + $0xb90] sm:$0xff]  }
 0x127   :  { %5716 = vmatprep.mubr.bf16.mxu1 %v6532_v33  ;;  %v8383_v33 = vld [vmem:[%s10564_s1 + $0xb18] sm:$0xff]  }
 0x128   :  { %7549 = vmatpush3.bf16.msra.mxu0 %v8303_v53 }
 0x129   :  { %7571 = vmatpush3.bf16.msra.mxu1 %v8304_v54  ;;  %7550 = vmatprep.subr.bf16.mxu0 %v8305_v55  ;;  %v8352_v54 = vld [vmem:[%s10564_s1 + $0xaa0] sm:$0xff]  }
 0x12a   :  { %7572 = vmatprep.subr.bf16.mxu1 %v8306_v56 }
 0x12c   :  { %7551 = vmatpush3.bf16.msra.mxu0 %v8307_v57  ;;  %v8353_v57 = vld [vmem:[%s10564_s1 + $0xa68] sm:$0xff]  }
 0x12d   :  { %7573 = vmatpush3.bf16.msra.mxu1 %v8308_v58  ;;  %7552 = vmatprep.subr.bf16.mxu0 %v8309_v59 }
 0x12e   :  { %7574 = vmatprep.subr.bf16.mxu1 %v8310_v60  ;;  %v8354_v60 = vld [vmem:[%s10564_s1 + $0xae8] sm:$0xff]  }
 0x130   :  { %7553 = vmatpush3.bf16.msra.mxu0 %v8311_v61 }
 0x131   :  { %7575 = vmatpush3.bf16.msra.mxu1 %v8312_v62  ;;  %7554 = vmatprep.subr.bf16.mxu0 %v8313_v63  ;;  %v8355_v63 = vld [vmem:[%s10564_s1 + $0xa28] sm:$0xff]  }
 0x132   :  { %7576 = vmatprep.subr.bf16.mxu1 %v8314_v0 }
 0x134   :  { %7555 = vmatpush3.bf16.msra.mxu0 %v8315_v2 }
 0x135   :  { %7577 = vmatpush3.bf16.msra.mxu1 %v8316_v4  ;;  %7556 = vmatprep.subr.bf16.mxu0 %v8317_v8  ;;  %v8357_v4 = vld [vmem:[%s10564_s1 + $0xa70] sm:$0xff]  }
 0x136   :  { %v7254_v1 = vpop.f32.mrb[8].mxu0  ;;  %7578 = vmatprep.subr.bf16.mxu1 %v8318_v10  ;;  %v8360_v8 = vld [vmem:[%s10564_s1 + $0xab0] sm:$0xff]   ;;  %v8362_v10 = vld [vmem:[%s10564_s1 + $0xaf8] sm:$0xff]  }
 0x137   :  { %v7276_v3 = vpop.f32.mrb[8].mxu1  ;;  %v7255_v5 = vpop.f32.mrb[9].mxu0 }
 0x138   :  { %v7256_v6 = vadd.f32 %v7255_v5, %v7254_v1  ;;  %v7277_v7 = vpop.f32.mrb[9].mxu1  ;;  %v7257_v11 = vpop.f32.mrb[10].mxu0  ;;  %7557 = vmatpush3.bf16.msra.mxu0 %v8319_v14  ;;  %v8356_v1 = vld [vmem:[%s10564_s1 + $0xaa8] sm:$0xff]  }
 0x139   :  { %v7278_v9 = vadd.f32 %v7277_v7, %v7276_v3  ;;  %v7279_v13 = vpop.f32.mrb[10].mxu1  ;;  %v7258_v16 = vpop.f32.mrb[11].mxu0  ;;  %7579 = vmatpush3.bf16.msra.mxu1 %v8320_v15  ;;  %7558 = vmatprep.subr.bf16.mxu0 %v8321_v19  ;;  %v8359_v7 = vld [vmem:[%s10564_s1 + $0xa30] sm:$0xff]   ;;  %v8363_v11 = vld [vmem:[%s10564_s1 + $0xa38] sm:$0xff]   ;;  %v8369_v19 = vld [vmem:[%s10564_s1 + $0xb40] sm:$0xff]  }
 0x13a   :  { %v5119_v12 = vadd.f32 %v7256_v6, %v9559_v32  ;;  %v7280_v18 = vpop.f32.mrb[11].mxu1  ;;  %7580 = vmatprep.subr.bf16.mxu1 %v8322_v20  ;;  %v8333_v32 = vld [vmem:[%s10564_s1 + $0xa40] sm:$0xff]   ;;  %v8358_v6 = vld [vmem:[%s10564_s1 + $0xaf0] sm:$0xff]   ;;  %v42_v16 = vld [vmem:[%s10565_s0 + $0xa8] sm:$0xff] }
 0x13b   :  { %v41_v13 = vld [vmem:[%s10565_s0 + $0xa0] sm:$0xff]  ;;  %v6536_v18 = vcombine.high %v42_v16, %v42_v16 }
 0x13c   :  { %v9664_v17 = vadd.f32 %v7278_v9, %v5119_v12  ;;  %7559 = vmatpush3.bf16.msra.mxu0 %v8323_v21  ;;  %v8361_v9 = vld [vmem:[%s10564_s1 + $0xa78] sm:$0xff]   ;;  %v6533_v14 = vcombine.low %v41_v13, %v41_v13  ;;  %v6534_v15 = vcombine.high %v41_v13, %v41_v13  ;;  %v8370_v20 = vld [vmem:[%s10564_s1 + $0xbc0] sm:$0xff]   ;;  %v8413_v13 = vld [vmem:[%s10564_s1 + $0xc50] sm:$0xff]  }
 0x13d   :  { %7581 = vmatpush3.bf16.msra.mxu1 %v8324_v22  ;;  %7560 = vmatprep.subr.bf16.mxu0 %v8325_v23  ;;  %v8364_v12 = vld [vmem:[%s10564_s1 + $0xab8] sm:$0xff]   ;;  %v8371_v21 = vld [vmem:[%s10564_s1 + $0xb00] sm:$0xff]   ;;  %v8373_v23 = vld [vmem:[%s10564_s1 + $0xb48] sm:$0xff]  }
 0x13e   :  { %7582 = vmatprep.subr.bf16.mxu1 %v8326_v24  ;;  %v8372_v22 = vld [vmem:[%s10564_s1 + $0xb80] sm:$0xff]   ;;  %v8374_v24 = vld [vmem:[%s10564_s1 + $0xbc8] sm:$0xff]  }
 0x140   :  { %7561 = vmatpush3.bf16.msra.mxu0 %v8327_v25  ;;  %v8375_v25 = vld [vmem:[%s10564_s1 + $0xb08] sm:$0xff]  }
 0x141   :  { %7583 = vmatpush3.bf16.msra.mxu1 %v8328_v26  ;;  %7590 = vmatprep.subr.bf16.mxu0 %v8333_v32  ;;  %v8376_v26 = vld [vmem:[%s10564_s1 + $0xb88] sm:$0xff]   ;;  %v8382_v32 = vld [vmem:[%s10564_s1 + $0xbd8] sm:$0xff]  }
 0x142   :  { %7612 = vmatprep.subr.bf16.mxu1 %v8334_v34  ;;  %v8384_v34 = vld [vmem:[%s10564_s1 + $0xb98] sm:$0xff]  }
 0x143   :  { %5677 = vmatmul.mubr.bf16.vlgmr.msra.gmra.mrb[36].mxu0 %v6529_v29  ;;  %v8379_v29 = vld [vmem:[%s10564_s1 + $0xb10] sm:$0xff]  }
 0x144   :  { %5717 = vmatmul.mubr.bf16.vlgmr.msra.gmra.mrb[36].mxu1 %v6531_v31  ;;  %7591 = vmatpush3.bf16.msra.mxu0 %v8335_v35  ;;  %v8381_v31 = vld [vmem:[%s10564_s1 + $0xb58] sm:$0xff]   ;;  %v8385_v35 = vld [vmem:[%s10564_s1 + $0xb60] sm:$0xff]  }
 0x145   :  { %7613 = vmatpush3.bf16.msra.mxu1 %v8336_v36  ;;  %7592 = vmatprep.subr.bf16.mxu0 %v8337_v37  ;;  %v8386_v36 = vld [vmem:[%s10564_s1 + $0xbe0] sm:$0xff]  }
 0x146   :  { %7614 = vmatprep.subr.bf16.mxu1 %v8338_v38  ;;  %5756 = vmatprep.mubr.bf16.mxu0 %v6534_v15  ;;  %v8387_v38 = vld [vmem:[%s10564_s1 + $0xb20] sm:$0xff]   ;;  %v8415_v15 = vld [vmem:[%s10564_s1 + $0xc10] sm:$0xff]  }
 0x147   :  { %5796 = vmatprep.mubr.bf16.mxu1 %v6536_v18  ;;  %v8418_v18 = vld [vmem:[%s10564_s1 + $0xcd8] sm:$0xff]  }
 0x148   :  { %7593 = vmatpush3.bf16.msra.mxu0 %v8339_v39 }
 0x149   :  { %7615 = vmatpush3.bf16.msra.mxu1 %v8340_v40  ;;  %7594 = vmatprep.subr.bf16.mxu0 %v8341_v41  ;;  %v8388_v40 = vld [vmem:[%s10564_s1 + $0xba0] sm:$0xff]  }
 0x14a   :  { %7616 = vmatprep.subr.bf16.mxu1 %v8342_v42 }
 0x14c   :  { %7595 = vmatpush3.bf16.msra.mxu0 %v8343_v43  ;;  %v8389_v43 = vld [vmem:[%s10564_s1 + $0xb68] sm:$0xff]  }
 0x14d   :  { %7617 = vmatpush3.bf16.msra.mxu1 %v8344_v44  ;;  %7596 = vmatprep.subr.bf16.mxu0 %v8345_v45 }
 0x14e   :  { %7618 = vmatprep.subr.bf16.mxu1 %v8346_v46  ;;  %v8390_v46 = vld [vmem:[%s10564_s1 + $0xbe8] sm:$0xff]  }
 0x150   :  { %7597 = vmatpush3.bf16.msra.mxu0 %v8347_v47 }
 0x151   :  { %7619 = vmatpush3.bf16.msra.mxu1 %v8348_v48  ;;  %7598 = vmatprep.subr.bf16.mxu0 %v8349_v49  ;;  %v8391_v49 = vld [vmem:[%s10564_s1 + $0xb28] sm:$0xff]  }
 0x152   :  { %7620 = vmatprep.subr.bf16.mxu1 %v8350_v50 }
 0x154   :  { %7599 = vmatpush3.bf16.msra.mxu0 %v8351_v52 }
 0x155   :  { %7621 = vmatpush3.bf16.msra.mxu1 %v8352_v54  ;;  %7600 = vmatprep.subr.bf16.mxu0 %v8353_v57  ;;  %v8393_v54 = vld [vmem:[%s10564_s1 + $0xb70] sm:$0xff]  }
 0x156   :  { %v7298_v51 = vpop.f32.mrb[12].mxu0  ;;  %7622 = vmatprep.subr.bf16.mxu1 %v8354_v60  ;;  %v8395_v57 = vld [vmem:[%s10564_s1 + $0xb30] sm:$0xff]   ;;  %v8398_v60 = vld [vmem:[%s10564_s1 + $0xbf8] sm:$0xff]  }
 0x157   :  { %v7320_v53 = vpop.f32.mrb[12].mxu1  ;;  %v7299_v55 = vpop.f32.mrb[13].mxu0 }
 0x158   :  { %v7321_v56 = vpop.f32.mrb[13].mxu1  ;;  %v7300_v58 = vadd.f32 %v7299_v55, %v7298_v51  ;;  %v7301_v61 = vpop.f32.mrb[14].mxu0  ;;  %7601 = vmatpush3.bf16.msra.mxu0 %v8355_v63  ;;  %v8392_v51 = vld [vmem:[%s10564_s1 + $0xba8] sm:$0xff]   ;;  %v43_v63 = vld [vmem:[%s10565_s0 + $0xb0] sm:$0xff] }
 0x159   :  { %v7322_v59 = vadd.f32 %v7321_v56, %v7320_v53  ;;  %v7323_v62 = vpop.f32.mrb[14].mxu1  ;;  %v7302_v2 = vpop.f32.mrb[15].mxu0  ;;  %7623 = vmatpush3.bf16.msra.mxu1 %v8356_v1  ;;  %7602 = vmatprep.subr.bf16.mxu0 %v8357_v4  ;;  %v8394_v56 = vld [vmem:[%s10564_s1 + $0xbf0] sm:$0xff]   ;;  %v8399_v61 = vld [vmem:[%s10564_s1 + $0xb38] sm:$0xff]   ;;  %v6537_v1 = vcombine.low %v43_v63, %v43_v63 }
 0x15a   :  { %v5199_v0 = vadd.f32 %v7300_v58, %v9664_v17  ;;  %v7324_v3 = vpop.f32.mrb[15].mxu1  ;;  %7624 = vmatprep.subr.bf16.mxu1 %v8358_v6  ;;  %v6535_v17 = vcombine.low %v42_v16, %v42_v16  ;;  %v8396_v58 = vld [vmem:[%s10564_s1 + $0xbb0] sm:$0xff]   ;;  %v8400_v62 = vld [vmem:[%s10564_s1 + $0xbb8] sm:$0xff]   ;;  %v6538_v2 = vcombine.high %v43_v63, %v43_v63  ;;  %v8406_v6 = vld [vmem:[%s10564_s1 + $0xcc0] sm:$0xff]  }
 0x15b   :  { %v8416_v16 = vld [vmem:[%s10564_s1 + $0xc90] sm:$0xff]  }
 0x15c   :  { %v9772_v5 = vadd.f32 %v7322_v59, %v5199_v0  ;;  %7603 = vmatpush3.bf16.msra.mxu0 %v8359_v7  ;;  %v8397_v59 = vld [vmem:[%s10564_s1 + $0xb78] sm:$0xff]   ;;  %v8407_v7 = vld [vmem:[%s10564_s1 + $0xc00] sm:$0xff]   ;;  %v8449_v63 = vld [vmem:[%s10564_s1 + $0xd50] sm:$0xff]  }
 0x15d   :  { %7625 = vmatpush3.bf16.msra.mxu1 %v8360_v8  ;;  %7604 = vmatprep.subr.bf16.mxu0 %v8361_v9  ;;  %v44_v0 = vld [vmem:[%s10565_s0 + $0xb8] sm:$0xff]  ;;  %v8408_v8 = vld [vmem:[%s10564_s1 + $0xc80] sm:$0xff]   ;;  %v8409_v9 = vld [vmem:[%s10564_s1 + $0xc48] sm:$0xff]  }
 0x15e   :  { %7626 = vmatprep.subr.bf16.mxu1 %v8362_v10  ;;  %v6539_v3 = vcombine.low %v44_v0, %v44_v0  ;;  %v6540_v4 = vcombine.high %v44_v0, %v44_v0  ;;  %v8410_v10 = vld [vmem:[%s10564_s1 + $0xcc8] sm:$0xff]   ;;  %v8450_v0 = vld [vmem:[%s10564_s1 + $0xdd0] sm:$0xff]  }
 0x160   :  { %7605 = vmatpush3.bf16.msra.mxu0 %v8363_v11  ;;  %v8411_v11 = vld [vmem:[%s10564_s1 + $0xc08] sm:$0xff]  }
 0x161   :  { %7627 = vmatpush3.bf16.msra.mxu1 %v8364_v12  ;;  %7634 = vmatprep.subr.bf16.mxu0 %v8369_v19  ;;  %v8412_v12 = vld [vmem:[%s10564_s1 + $0xc88] sm:$0xff]   ;;  %v8419_v19 = vld [vmem:[%s10564_s1 + $0xc18] sm:$0xff]  }
 0x162   :  { %7656 = vmatprep.subr.bf16.mxu1 %v8370_v20  ;;  %v8420_v20 = vld [vmem:[%s10564_s1 + $0xc98] sm:$0xff]  }
 0x163   :  { %5757 = vmatmul.mubr.bf16.vlgmr.msra.gmra.mrb[40].mxu0 %v6533_v14  ;;  %v8414_v14 = vld [vmem:[%s10564_s1 + $0xcd0] sm:$0xff]  }
 0x164   :  { %5797 = vmatmul.mubr.bf16.vlgmr.msra.gmra.mrb[40].mxu1 %v6535_v17  ;;  %7635 = vmatpush3.bf16.msra.mxu0 %v8371_v21  ;;  %v8417_v17 = vld [vmem:[%s10564_s1 + $0xc58] sm:$0xff]   ;;  %v8421_v21 = vld [vmem:[%s10564_s1 + $0xc60] sm:$0xff]  }
 0x165   :  { %7657 = vmatpush3.bf16.msra.mxu1 %v8372_v22  ;;  %7636 = vmatprep.subr.bf16.mxu0 %v8373_v23  ;;  %v8422_v22 = vld [vmem:[%s10564_s1 + $0xce0] sm:$0xff]  }
 0x166   :  { %7658 = vmatprep.subr.bf16.mxu1 %v8374_v24  ;;  %5836 = vmatprep.mubr.bf16.mxu0 %v6538_v2  ;;  %v8423_v24 = vld [vmem:[%s10564_s1 + $0xc20] sm:$0xff]   ;;  %v8452_v2 = vld [vmem:[%s10564_s1 + $0xd90] sm:$0xff]  }
 0x167   :  { %5876 = vmatprep.mubr.bf16.mxu1 %v6540_v4  ;;  %v8454_v4 = vld [vmem:[%s10564_s1 + $0xdd8] sm:$0xff]  }
 0x168   :  { %7637 = vmatpush3.bf16.msra.mxu0 %v8375_v25 }
 0x169   :  { %7659 = vmatpush3.bf16.msra.mxu1 %v8376_v26  ;;  %7638 = vmatprep.subr.bf16.mxu0 %v8377_v27  ;;  %v8424_v26 = vld [vmem:[%s10564_s1 + $0xca0] sm:$0xff]  }
 0x16a   :  { %7660 = vmatprep.subr.bf16.mxu1 %v8378_v28 }
 0x16c   :  { %7639 = vmatpush3.bf16.msra.mxu0 %v8379_v29 }
 0x16d   :  { %7661 = vmatpush3.bf16.msra.mxu1 %v8380_v30  ;;  %7640 = vmatprep.subr.bf16.mxu0 %v8381_v31  ;;  %v8425_v30 = vld [vmem:[%s10564_s1 + $0xc68] sm:$0xff]  }
 0x16e   :  { %7662 = vmatprep.subr.bf16.mxu1 %v8382_v32  ;;  %v8426_v32 = vld [vmem:[%s10564_s1 + $0xce8] sm:$0xff]  }
 0x170   :  { %7641 = vmatpush3.bf16.msra.mxu0 %v8383_v33 }
 0x171   :  { %7663 = vmatpush3.bf16.msra.mxu1 %v8384_v34  ;;  %7642 = vmatprep.subr.bf16.mxu0 %v8385_v35 }
 0x172   :  { %7664 = vmatprep.subr.bf16.mxu1 %v8386_v36  ;;  %v8427_v36 = vld [vmem:[%s10564_s1 + $0xc28] sm:$0xff]  }
 0x174   :  { %7643 = vmatpush3.bf16.msra.mxu0 %v8387_v38 }
 0x175   :  { %7665 = vmatpush3.bf16.msra.mxu1 %v8388_v40  ;;  %7644 = vmatprep.subr.bf16.mxu0 %v8389_v43  ;;  %v8431_v43 = vld [vmem:[%s10564_s1 + $0xc30] sm:$0xff]  }
 0x176   :  { %v7342_v37 = vpop.f32.mrb[16].mxu0  ;;  %7666 = vmatprep.subr.bf16.mxu1 %v8390_v46  ;;  %v8434_v46 = vld [vmem:[%s10564_s1 + $0xcf8] sm:$0xff]  }
 0x177   :  { %v7364_v39 = vpop.f32.mrb[16].mxu1  ;;  %v7343_v41 = vpop.f32.mrb[17].mxu0 }
 0x178   :  { %v7365_v42 = vpop.f32.mrb[17].mxu1  ;;  %v7344_v44 = vadd.f32 %v7343_v41, %v7342_v37  ;;  %v7345_v47 = vpop.f32.mrb[18].mxu0  ;;  %7645 = vmatpush3.bf16.msra.mxu0 %v8391_v49  ;;  %v8428_v37 = vld [vmem:[%s10564_s1 + $0xca8] sm:$0xff]   ;;  %v8429_v41 = vld [vmem:[%s10564_s1 + $0xc70] sm:$0xff]   ;;  %v45_v49 = vld [vmem:[%s10565_s0 + $0xc0] sm:$0xff] }
 0x179   :  { %v7366_v45 = vadd.f32 %v7365_v42, %v7364_v39  ;;  %v7367_v48 = vpop.f32.mrb[18].mxu1  ;;  %v7346_v52 = vpop.f32.mrb[19].mxu0  ;;  %7667 = vmatpush3.bf16.msra.mxu1 %v8392_v51  ;;  %7646 = vmatprep.subr.bf16.mxu0 %v8393_v54  ;;  %v8430_v42 = vld [vmem:[%s10564_s1 + $0xcf0] sm:$0xff]   ;;  %v8435_v47 = vld [vmem:[%s10564_s1 + $0xc38] sm:$0xff]   ;;  %v6541_v51 = vcombine.low %v45_v49, %v45_v49  ;;  %v8441_v54 = vld [vmem:[%s10564_s1 + $0xd40] sm:$0xff]  }
 0x17a   :  { %v5279_v50 = vadd.f32 %v7344_v44, %v9772_v5  ;;  %v7368_v53 = vpop.f32.mrb[19].mxu1  ;;  %7668 = vmatprep.subr.bf16.mxu1 %v8394_v56  ;;  %v8405_v5 = vld [vmem:[%s10564_s1 + $0xc40] sm:$0xff]   ;;  %v8432_v44 = vld [vmem:[%s10564_s1 + $0xcb0] sm:$0xff]   ;;  %v8436_v48 = vld [vmem:[%s10564_s1 + $0xcb8] sm:$0xff]   ;;  %v6542_v52 = vcombine.high %v45_v49, %v45_v49 }
 0x17b   :  { %v8442_v56 = vld [vmem:[%s10564_s1 + $0xdc0] sm:$0xff]   ;;  %v8485_v49 = vld [vmem:[%s10564_s1 + $0xe50] sm:$0xff]  }
 0x17c   :  { %v9877_v55 = vadd.f32 %v7366_v45, %v5279_v50  ;;  %7647 = vmatpush3.bf16.msra.mxu0 %v8395_v57  ;;  %v8433_v45 = vld [vmem:[%s10564_s1 + $0xc78] sm:$0xff]   ;;  %v46_v50 = vld [vmem:[%s10565_s0 + $0xc8] sm:$0xff]  ;;  %v8443_v57 = vld [vmem:[%s10564_s1 + $0xd00] sm:$0xff]  }
 0x17d   :  { %7669 = vmatpush3.bf16.msra.mxu1 %v8396_v58  ;;  %7648 = vmatprep.subr.bf16.mxu0 %v8397_v59  ;;  %v6543_v53 = vcombine.low %v46_v50, %v46_v50  ;;  %v8444_v58 = vld [vmem:[%s10564_s1 + $0xd80] sm:$0xff]   ;;  %v8445_v59 = vld [vmem:[%s10564_s1 + $0xd48] sm:$0xff]  }
 0x17e   :  { %7670 = vmatprep.subr.bf16.mxu1 %v8398_v60  ;;  %v8446_v60 = vld [vmem:[%s10564_s1 + $0xdc8] sm:$0xff]  }
 0x180   :  { %7649 = vmatpush3.bf16.msra.mxu0 %v8399_v61  ;;  %v8447_v61 = vld [vmem:[%s10564_s1 + $0xd08] sm:$0xff]  }
 0x181   :  { %7671 = vmatpush3.bf16.msra.mxu1 %v8400_v62  ;;  %7678 = vmatprep.subr.bf16.mxu0 %v8405_v5  ;;  %v8448_v62 = vld [vmem:[%s10564_s1 + $0xd88] sm:$0xff]   ;;  %v8455_v5 = vld [vmem:[%s10564_s1 + $0xd18] sm:$0xff]  }
 0x182   :  { %7700 = vmatprep.subr.bf16.mxu1 %v8406_v6  ;;  %v8456_v6 = vld [vmem:[%s10564_s1 + $0xd98] sm:$0xff]  }
 0x183   :  { %5837 = vmatmul.mubr.bf16.vlgmr.msra.gmra.mrb[44].mxu0 %v6537_v1  ;;  %v8451_v1 = vld [vmem:[%s10564_s1 + $0xd10] sm:$0xff]  }
 0x184   :  { %5877 = vmatmul.mubr.bf16.vlgmr.msra.gmra.mrb[44].mxu1 %v6539_v3  ;;  %7679 = vmatpush3.bf16.msra.mxu0 %v8407_v7  ;;  %v8453_v3 = vld [vmem:[%s10564_s1 + $0xd58] sm:$0xff]   ;;  %v8457_v7 = vld [vmem:[%s10564_s1 + $0xd60] sm:$0xff]  }
 0x185   :  { %7701 = vmatpush3.bf16.msra.mxu1 %v8408_v8  ;;  %7680 = vmatprep.subr.bf16.mxu0 %v8409_v9  ;;  %v8458_v8 = vld [vmem:[%s10564_s1 + $0xde0] sm:$0xff]  }
 0x186   :  { %7702 = vmatprep.subr.bf16.mxu1 %v8410_v10  ;;  %5916 = vmatprep.mubr.bf16.mxu0 %v6542_v52  ;;  %v8459_v10 = vld [vmem:[%s10564_s1 + $0xd20] sm:$0xff]   ;;  %v8488_v52 = vld [vmem:[%s10564_s1 + $0xe90] sm:$0xff]  }
 0x188   :  { %7681 = vmatpush3.bf16.msra.mxu0 %v8411_v11 }
 0x189   :  { %7703 = vmatpush3.bf16.msra.mxu1 %v8412_v12  ;;  %7682 = vmatprep.subr.bf16.mxu0 %v8413_v13  ;;  %v8460_v12 = vld [vmem:[%s10564_s1 + $0xda0] sm:$0xff]  }
 0x18a   :  { %7704 = vmatprep.subr.bf16.mxu1 %v8414_v14 }
 0x18c   :  { %7683 = vmatpush3.bf16.msra.mxu0 %v8415_v15  ;;  %v8461_v15 = vld [vmem:[%s10564_s1 + $0xd68] sm:$0xff]  }
 0x18d   :  { %7705 = vmatpush3.bf16.msra.mxu1 %v8416_v16  ;;  %7684 = vmatprep.subr.bf16.mxu0 %v8417_v17 }
 0x18e   :  { %7706 = vmatprep.subr.bf16.mxu1 %v8418_v18  ;;  %v8462_v18 = vld [vmem:[%s10564_s1 + $0xde8] sm:$0xff]  }
 0x190   :  { %7685 = vmatpush3.bf16.msra.mxu0 %v8419_v19 }
 0x191   :  { %7707 = vmatpush3.bf16.msra.mxu1 %v8420_v20  ;;  %7686 = vmatprep.subr.bf16.mxu0 %v8421_v21  ;;  %v8463_v21 = vld [vmem:[%s10564_s1 + $0xd28] sm:$0xff]  }
 0x192   :  { %7708 = vmatprep.subr.bf16.mxu1 %v8422_v22 }
 0x194   :  { %7687 = vmatpush3.bf16.msra.mxu0 %v8423_v24 }
 0x195   :  { %7709 = vmatpush3.bf16.msra.mxu1 %v8424_v26  ;;  %7688 = vmatprep.subr.bf16.mxu0 %v8425_v30  ;;  %v8465_v26 = vld [vmem:[%s10564_s1 + $0xd70] sm:$0xff]  }
 0x196   :  { %v7386_v23 = vpop.f32.mrb[20].mxu0  ;;  %7710 = vmatprep.subr.bf16.mxu1 %v8426_v32  ;;  %v8468_v30 = vld [vmem:[%s10564_s1 + $0xdb0] sm:$0xff]   ;;  %v8470_v32 = vld [vmem:[%s10564_s1 + $0xdf8] sm:$0xff]  }
 0x197   :  { %v7408_v25 = vpop.f32.mrb[20].mxu1  ;;  %v7387_v27 = vpop.f32.mrb[21].mxu0 }
 0x198   :  { %v7388_v28 = vadd.f32 %v7387_v27, %v7386_v23  ;;  %v7409_v29 = vpop.f32.mrb[21].mxu1  ;;  %v7389_v33 = vpop.f32.mrb[22].mxu0  ;;  %7689 = vmatpush3.bf16.msra.mxu0 %v8427_v36  ;;  %v8464_v23 = vld [vmem:[%s10564_s1 + $0xda8] sm:$0xff]  }
 0x199   :  { %v7410_v31 = vadd.f32 %v7409_v29, %v7408_v25  ;;  %v7411_v35 = vpop.f32.mrb[22].mxu1  ;;  %v7390_v38 = vpop.f32.mrb[23].mxu0  ;;  %7711 = vmatpush3.bf16.msra.mxu1 %v8428_v37  ;;  %7690 = vmatprep.subr.bf16.mxu0 %v8429_v41  ;;  %v8467_v29 = vld [vmem:[%s10564_s1 + $0xd30] sm:$0xff]   ;;  %v8471_v33 = vld [vmem:[%s10564_s1 + $0xd38] sm:$0xff]   ;;  %v8477_v41 = vld [vmem:[%s10564_s1 + $0xe40] sm:$0xff]  }
 0x19a   :  { %v5359_v34 = vadd.f32 %v7388_v28, %v9877_v55  ;;  %v7412_v40 = vpop.f32.mrb[23].mxu1  ;;  %7712 = vmatprep.subr.bf16.mxu1 %v8430_v42  ;;  %v6544_v55 = vcombine.high %v46_v50, %v46_v50  ;;  %v8466_v28 = vld [vmem:[%s10564_s1 + $0xdf0] sm:$0xff]   ;;  %v48_v38 = vld [vmem:[%s10565_s0 + $0xd8] sm:$0xff]  ;;  %v8478_v42 = vld [vmem:[%s10564_s1 + $0xec0] sm:$0xff]  }
 0x19b   :  { %v47_v35 = vld [vmem:[%s10565_s0 + $0xd0] sm:$0xff]  ;;  %v6548_v40 = vcombine.high %v48_v38, %v48_v38 }
 0x19c   :  { %v9979_v39 = vadd.f32 %v7410_v31, %v5359_v34  ;;  %7691 = vmatpush3.bf16.msra.mxu0 %v8431_v43  ;;  %5956 = vmatprep.mubr.bf16.mxu1 %v6544_v55  ;;  %v8469_v31 = vld [vmem:[%s10564_s1 + $0xd78] sm:$0xff]   ;;  %v6545_v36 = vcombine.low %v47_v35, %v47_v35  ;;  %v6546_v37 = vcombine.high %v47_v35, %v47_v35  ;;  %v8479_v43 = vld [vmem:[%s10564_s1 + $0xe00] sm:$0xff]   ;;  %v8486_v50 = vld [vmem:[%s10564_s1 + $0xed0] sm:$0xff]  }
 0x19d   :  { %7713 = vmatpush3.bf16.msra.mxu1 %v8432_v44  ;;  %7692 = vmatprep.subr.bf16.mxu0 %v8433_v45  ;;  %v8472_v34 = vld [vmem:[%s10564_s1 + $0xdb8] sm:$0xff]   ;;  %v8480_v44 = vld [vmem:[%s10564_s1 + $0xe80] sm:$0xff]   ;;  %v8481_v45 = vld [vmem:[%s10564_s1 + $0xe48] sm:$0xff]  }
 0x19e   :  { %7714 = vmatprep.subr.bf16.mxu1 %v8434_v46  ;;  %v8482_v46 = vld [vmem:[%s10564_s1 + $0xec8] sm:$0xff]   ;;  %v8491_v55 = vld [vmem:[%s10564_s1 + $0xe18] sm:$0xff]   ;;  %v8521_v35 = vld [vmem:[%s10564_s1 + $0xf50] sm:$0xff]  }
 0x1a0   :  { %7693 = vmatpush3.bf16.msra.mxu0 %v8435_v47  ;;  %v8483_v47 = vld [vmem:[%s10564_s1 + $0xe08] sm:$0xff]  }
 0x1a1   :  { %7715 = vmatpush3.bf16.msra.mxu1 %v8436_v48  ;;  %7722 = vmatprep.subr.bf16.mxu0 %v8441_v54  ;;  %v8484_v48 = vld [vmem:[%s10564_s1 + $0xe88] sm:$0xff]   ;;  %v8490_v54 = vld [vmem:[%s10564_s1 + $0xed8] sm:$0xff]  }
 0x1a2   :  { %7744 = vmatprep.subr.bf16.mxu1 %v8442_v56  ;;  %v8492_v56 = vld [vmem:[%s10564_s1 + $0xe98] sm:$0xff]  }
 0x1a3   :  { %5917 = vmatmul.mubr.bf16.vlgmr.msra.gmra.mrb[48].mxu0 %v6541_v51  ;;  %v8487_v51 = vld [vmem:[%s10564_s1 + $0xe10] sm:$0xff]  }
 0x1a4   :  { %5957 = vmatmul.mubr.bf16.vlgmr.msra.gmra.mrb[48].mxu1 %v6543_v53  ;;  %7723 = vmatpush3.bf16.msra.mxu0 %v8443_v57  ;;  %v8489_v53 = vld [vmem:[%s10564_s1 + $0xe58] sm:$0xff]   ;;  %v8493_v57 = vld [vmem:[%s10564_s1 + $0xe60] sm:$0xff]  }
 0x1a5   :  { %7745 = vmatpush3.bf16.msra.mxu1 %v8444_v58  ;;  %7724 = vmatprep.subr.bf16.mxu0 %v8445_v59  ;;  %v8494_v58 = vld [vmem:[%s10564_s1 + $0xee0] sm:$0xff]  }
 0x1a6   :  { %7746 = vmatprep.subr.bf16.mxu1 %v8446_v60  ;;  %5996 = vmatprep.mubr.bf16.mxu0 %v6546_v37  ;;  %v8495_v60 = vld [vmem:[%s10564_s1 + $0xe20] sm:$0xff]   ;;  %v8523_v37 = vld [vmem:[%s10564_s1 + $0xf10] sm:$0xff]  }
 0x1a7   :  { %6036 = vmatprep.mubr.bf16.mxu1 %v6548_v40  ;;  %v8526_v40 = vld [vmem:[%s10564_s1 + $0xfd8] sm:$0xff]  }
 0x1a8   :  { %7725 = vmatpush3.bf16.msra.mxu0 %v8447_v61 }
 0x1a9   :  { %7747 = vmatpush3.bf16.msra.mxu1 %v8448_v62  ;;  %7726 = vmatprep.subr.bf16.mxu0 %v8449_v63  ;;  %v8496_v62 = vld [vmem:[%s10564_s1 + $0xea0] sm:$0xff]  }
 0x1aa   :  { %7748 = vmatprep.subr.bf16.mxu1 %v8450_v0 }
 0x1ac   :  { %7727 = vmatpush3.bf16.msra.mxu0 %v8451_v1  ;;  %v8497_v1 = vld [vmem:[%s10564_s1 + $0xe68] sm:$0xff]  }
 0x1ad   :  { %7749 = vmatpush3.bf16.msra.mxu1 %v8452_v2  ;;  %7728 = vmatprep.subr.bf16.mxu0 %v8453_v3 }
 0x1ae   :  { %7750 = vmatprep.subr.bf16.mxu1 %v8454_v4  ;;  %v8498_v4 = vld [vmem:[%s10564_s1 + $0xee8] sm:$0xff]  }
 0x1b0   :  { %7729 = vmatpush3.bf16.msra.mxu0 %v8455_v5 }
 0x1b1   :  { %7751 = vmatpush3.bf16.msra.mxu1 %v8456_v6  ;;  %7730 = vmatprep.subr.bf16.mxu0 %v8457_v7  ;;  %v8499_v7 = vld [vmem:[%s10564_s1 + $0xe28] sm:$0xff]  }
 0x1b2   :  { %7752 = vmatprep.subr.bf16.mxu1 %v8458_v8 }
 0x1b4   :  { %7731 = vmatpush3.bf16.msra.mxu0 %v8459_v10 }
 0x1b5   :  { %7753 = vmatpush3.bf16.msra.mxu1 %v8460_v12  ;;  %7732 = vmatprep.subr.bf16.mxu0 %v8461_v15  ;;  %v8501_v12 = vld [vmem:[%s10564_s1 + $0xe70] sm:$0xff]  }
 0x1b6   :  { %v7430_v9 = vpop.f32.mrb[24].mxu0  ;;  %7754 = vmatprep.subr.bf16.mxu1 %v8462_v18  ;;  %v8503_v15 = vld [vmem:[%s10564_s1 + $0xe30] sm:$0xff]   ;;  %v8506_v18 = vld [vmem:[%s10564_s1 + $0xef8] sm:$0xff]  }
 0x1b7   :  { %v7452_v11 = vpop.f32.mrb[24].mxu1  ;;  %v7431_v13 = vpop.f32.mrb[25].mxu0 }
 0x1b8   :  { %v7453_v14 = vpop.f32.mrb[25].mxu1  ;;  %v7432_v16 = vadd.f32 %v7431_v13, %v7430_v9  ;;  %v7433_v19 = vpop.f32.mrb[26].mxu0  ;;  %7733 = vmatpush3.bf16.msra.mxu0 %v8463_v21  ;;  %v8500_v9 = vld [vmem:[%s10564_s1 + $0xea8] sm:$0xff]   ;;  %v49_v21 = vld [vmem:[%s10565_s0 + $0xe0] sm:$0xff] }
 0x1b9   :  { %v7454_v17 = vadd.f32 %v7453_v14, %v7452_v11  ;;  %v7455_v20 = vpop.f32.mrb[26].mxu1  ;;  %v7434_v24 = vpop.f32.mrb[27].mxu0  ;;  %7755 = vmatpush3.bf16.msra.mxu1 %v8464_v23  ;;  %7734 = vmatprep.subr.bf16.mxu0 %v8465_v26  ;;  %v8502_v14 = vld [vmem:[%s10564_s1 + $0xef0] sm:$0xff]   ;;  %v8507_v19 = vld [vmem:[%s10564_s1 + $0xe38] sm:$0xff]   ;;  %v6549_v23 = vcombine.low %v49_v21, %v49_v21 }
 0x1ba   :  { %v5439_v22 = vadd.f32 %v7432_v16, %v9979_v39  ;;  %v7456_v25 = vpop.f32.mrb[27].mxu1  ;;  %7756 = vmatprep.subr.bf16.mxu1 %v8466_v28  ;;  %v6547_v39 = vcombine.low %v48_v38, %v48_v38  ;;  %v8504_v16 = vld [vmem:[%s10564_s1 + $0xeb0] sm:$0xff]   ;;  %v8508_v20 = vld [vmem:[%s10564_s1 + $0xeb8] sm:$0xff]   ;;  %v6550_v24 = vcombine.high %v49_v21, %v49_v21  ;;  %v8514_v28 = vld [vmem:[%s10564_s1 + $0xfc0] sm:$0xff]  }
 0x1bb   :  { %v8524_v38 = vld [vmem:[%s10564_s1 + $0xf90] sm:$0xff]  }
 0x1bc   :  { %v10087_v27 = vadd.f32 %v7454_v17, %v5439_v22  ;;  %7735 = vmatpush3.bf16.msra.mxu0 %v8467_v29  ;;  %v8505_v17 = vld [vmem:[%s10564_s1 + $0xe78] sm:$0xff]   ;;  %v50_v22 = vld [vmem:[%s10565_s0 + $0xe8] sm:$0xff]  ;;  %v8515_v29 = vld [vmem:[%s10564_s1 + $0xf00] sm:$0xff]  }
 0x1bd   :  { %7757 = vmatpush3.bf16.msra.mxu1 %v8468_v30  ;;  %7736 = vmatprep.subr.bf16.mxu0 %v8469_v31  ;;  %v6551_v25 = vcombine.low %v50_v22, %v50_v22  ;;  %v6552_v26 = vcombine.high %v50_v22, %v50_v22  ;;  %v8516_v30 = vld [vmem:[%s10564_s1 + $0xf80] sm:$0xff]   ;;  %v8517_v31 = vld [vmem:[%s10564_s1 + $0xf48] sm:$0xff]   ;;  %v8557_v21 = vld [vmem:[%s10564_s1 + $0x1050] sm:$0xff]  }
 0x1be   :  { %7758 = vmatprep.subr.bf16.mxu1 %v8470_v32  ;;  %v8518_v32 = vld [vmem:[%s10564_s1 + $0xfc8] sm:$0xff]   ;;  %v8558_v22 = vld [vmem:[%s10564_s1 + $0x10d0] sm:$0xff]  }
 0x1c0   :  { %7737 = vmatpush3.bf16.msra.mxu0 %v8471_v33  ;;  %v8519_v33 = vld [vmem:[%s10564_s1 + $0xf08] sm:$0xff]  }
 0x1c1   :  { %7759 = vmatpush3.bf16.msra.mxu1 %v8472_v34  ;;  %7766 = vmatprep.subr.bf16.mxu0 %v8477_v41  ;;  %v8520_v34 = vld [vmem:[%s10564_s1 + $0xf88] sm:$0xff]   ;;  %v8527_v41 = vld [vmem:[%s10564_s1 + $0xf18] sm:$0xff]  }
 0x1c2   :  { %7788 = vmatprep.subr.bf16.mxu1 %v8478_v42  ;;  %v8528_v42 = vld [vmem:[%s10564_s1 + $0xf98] sm:$0xff]  }
 0x1c3   :  { %5997 = vmatmul.mubr.bf16.vlgmr.msra.gmra.mrb[52].mxu0 %v6545_v36  ;;  %v8522_v36 = vld [vmem:[%s10564_s1 + $0xfd0] sm:$0xff]  }
 0x1c4   :  { %6037 = vmatmul.mubr.bf16.vlgmr.msra.gmra.mrb[52].mxu1 %v6547_v39  ;;  %7767 = vmatpush3.bf16.msra.mxu0 %v8479_v43  ;;  %v8525_v39 = vld [vmem:[%s10564_s1 + $0xf58] sm:$0xff]   ;;  %v8529_v43 = vld [vmem:[%s10564_s1 + $0xf60] sm:$0xff]  }
 0x1c5   :  { %7789 = vmatpush3.bf16.msra.mxu1 %v8480_v44  ;;  %7768 = vmatprep.subr.bf16.mxu0 %v8481_v45  ;;  %v8530_v44 = vld [vmem:[%s10564_s1 + $0xfe0] sm:$0xff]  }
 0x1c6   :  { %7790 = vmatprep.subr.bf16.mxu1 %v8482_v46  ;;  %6076 = vmatprep.mubr.bf16.mxu0 %v6550_v24  ;;  %v8531_v45 = vld [vmem:[%s10564_s1 + $0xf20] sm:$0xff]   ;;  %v8560_v24 = vld [vmem:[%s10564_s1 + $0x1090] sm:$0xff]  }
 0x1c7   :  { %6116 = vmatprep.mubr.bf16.mxu1 %v6552_v26  ;;  %v8562_v26 = vld [vmem:[%s10564_s1 + $0x10d8] sm:$0xff]  }
 0x1c8   :  { %7769 = vmatpush3.bf16.msra.mxu0 %v8483_v47  ;;  %v8532_v47 = vld [vmem:[%s10564_s1 + $0xfa0] sm:$0xff]  }
 0x1c9   :  { %7791 = vmatpush3.bf16.msra.mxu1 %v8484_v48  ;;  %7770 = vmatprep.subr.bf16.mxu0 %v8485_v49 }
 0x1ca   :  { %7792 = vmatprep.subr.bf16.mxu1 %v8486_v50 }
 0x1cc   :  { %7771 = vmatpush3.bf16.msra.mxu0 %v8487_v51 }
 0x1cd   :  { %7793 = vmatpush3.bf16.msra.mxu1 %v8488_v52  ;;  %7772 = vmatprep.subr.bf16.mxu0 %v8489_v53  ;;  %v8533_v53 = vld [vmem:[%s10564_s1 + $0xf68] sm:$0xff]  }
 0x1ce   :  { %7794 = vmatprep.subr.bf16.mxu1 %v8490_v54 }
 0x1d0   :  { %7773 = vmatpush3.bf16.msra.mxu0 %v8491_v55  ;;  %v8534_v55 = vld [vmem:[%s10564_s1 + $0xfe8] sm:$0xff]  }
 0x1d1   :  { %7795 = vmatpush3.bf16.msra.mxu1 %v8492_v56  ;;  %7774 = vmatprep.subr.bf16.mxu0 %v8493_v57 }
 0x1d2   :  { %7796 = vmatprep.subr.bf16.mxu1 %v8494_v58  ;;  %v8535_v58 = vld [vmem:[%s10564_s1 + $0xf28] sm:$0xff]  }
 0x1d4   :  { %7775 = vmatpush3.bf16.msra.mxu0 %v8495_v60  ;;  %v8536_v60 = vld [vmem:[%s10564_s1 + $0xfa8] sm:$0xff]  }
 0x1d5   :  { %7797 = vmatpush3.bf16.msra.mxu1 %v8496_v62  ;;  %7776 = vmatprep.subr.bf16.mxu0 %v8497_v1  ;;  %v8539_v1 = vld [vmem:[%s10564_s1 + $0xf30] sm:$0xff]  }
 0x1d6   :  { %v7474_v59 = vpop.f32.mrb[28].mxu0  ;;  %7798 = vmatprep.subr.bf16.mxu1 %v8498_v4  ;;  %v8542_v4 = vld [vmem:[%s10564_s1 + $0xff8] sm:$0xff]  }
 0x1d7   :  { %v7496_v61 = vpop.f32.mrb[28].mxu1  ;;  %v7475_v63 = vpop.f32.mrb[29].mxu0 }
 0x1d8   :  { %v7497_v0 = vpop.f32.mrb[29].mxu1  ;;  %v7476_v2 = vadd.f32 %v7475_v63, %v7474_v59  ;;  %v7477_v5 = vpop.f32.mrb[30].mxu0  ;;  %7777 = vmatpush3.bf16.msra.mxu0 %v8499_v7  ;;  %v8537_v63 = vld [vmem:[%s10564_s1 + $0xf70] sm:$0xff]  }
 0x1d9   :  { %v7498_v3 = vadd.f32 %v7497_v0, %v7496_v61  ;;  %v7499_v6 = vpop.f32.mrb[30].mxu1  ;;  %v7478_v10 = vpop.f32.mrb[31].mxu0  ;;  %7799 = vmatpush3.bf16.msra.mxu1 %v8500_v9  ;;  %7778 = vmatprep.subr.bf16.mxu0 %v8501_v12  ;;  %v8538_v0 = vld [vmem:[%s10564_s1 + $0xff0] sm:$0xff]   ;;  %v8543_v5 = vld [vmem:[%s10564_s1 + $0xf38] sm:$0xff]  }
 0x1da   :  { %v5519_v8 = vadd.f32 %v7476_v2, %v10087_v27  ;;  %v7500_v11 = vpop.f32.mrb[31].mxu1  ;;  %7800 = vmatprep.subr.bf16.mxu1 %v8502_v14  ;;  %v8513_v27 = vld [vmem:[%s10564_s1 + $0xf40] sm:$0xff]   ;;  %v8540_v2 = vld [vmem:[%s10564_s1 + $0xfb0] sm:$0xff]   ;;  %v8544_v6 = vld [vmem:[%s10564_s1 + $0xfb8] sm:$0xff]  }
 0x1db   :  { %v51_v7 = vld [vmem:[%s10565_s0 + $0xf0] sm:$0xff]  ;;  %v8550_v14 = vld [vmem:[%s10564_s1 + $0x10c0] sm:$0xff]  }
 0x1dc   :  { %v10192_v13 = vadd.f32 %v7498_v3, %v5519_v8  ;;  %7779 = vmatpush3.bf16.msra.mxu0 %v8503_v15  ;;  %v8541_v3 = vld [vmem:[%s10564_s1 + $0xf78] sm:$0xff]   ;;  %v6553_v9 = vcombine.low %v51_v7, %v51_v7  ;;  %v6554_v10 = vcombine.high %v51_v7, %v51_v7  ;;  %v8551_v15 = vld [vmem:[%s10564_s1 + $0x1000] sm:$0xff]   ;;  %v8593_v7 = vld [vmem:[%s10564_s1 + $0x1150] sm:$0xff]  }
 0x1dd   :  { %7801 = vmatpush3.bf16.msra.mxu1 %v8504_v16  ;;  %7780 = vmatprep.subr.bf16.mxu0 %v8505_v17  ;;  %v52_v8 = vld [vmem:[%s10565_s0 + $0xf8] sm:$0xff]  ;;  %v8552_v16 = vld [vmem:[%s10564_s1 + $0x1080] sm:$0xff]   ;;  %v8553_v17 = vld [vmem:[%s10564_s1 + $0x1048] sm:$0xff]  }
 0x1de   :  { %7802 = vmatprep.subr.bf16.mxu1 %v8506_v18  ;;  %v6555_v11 = vcombine.low %v52_v8, %v52_v8  ;;  %v6556_v12 = vcombine.high %v52_v8, %v52_v8  ;;  %v8554_v18 = vld [vmem:[%s10564_s1 + $0x10c8] sm:$0xff]   ;;  %v8594_v8 = vld [vmem:[%s10564_s1 + $0x11d0] sm:$0xff]  }
 0x1e0   :  { %7781 = vmatpush3.bf16.msra.mxu0 %v8507_v19  ;;  %v8555_v19 = vld [vmem:[%s10564_s1 + $0x1008] sm:$0xff]  }
 0x1e1   :  { %7803 = vmatpush3.bf16.msra.mxu1 %v8508_v20  ;;  %7810 = vmatprep.subr.bf16.mxu0 %v8513_v27  ;;  %v8556_v20 = vld [vmem:[%s10564_s1 + $0x1088] sm:$0xff]   ;;  %v8563_v27 = vld [vmem:[%s10564_s1 + $0x1018] sm:$0xff]  }
 0x1e2   :  { %7832 = vmatprep.subr.bf16.mxu1 %v8514_v28  ;;  %v8564_v28 = vld [vmem:[%s10564_s1 + $0x1098] sm:$0xff]  }
 0x1e3   :  { %6077 = vmatmul.mubr.bf16.vlgmr.msra.gmra.mrb[56].mxu0 %v6549_v23  ;;  %v8559_v23 = vld [vmem:[%s10564_s1 + $0x1010] sm:$0xff]  }
 0x1e4   :  { %6117 = vmatmul.mubr.bf16.vlgmr.msra.gmra.mrb[56].mxu1 %v6551_v25  ;;  %7811 = vmatpush3.bf16.msra.mxu0 %v8515_v29  ;;  %v8561_v25 = vld [vmem:[%s10564_s1 + $0x1058] sm:$0xff]   ;;  %v8565_v29 = vld [vmem:[%s10564_s1 + $0x1060] sm:$0xff]  }
 0x1e5   :  { %7833 = vmatpush3.bf16.msra.mxu1 %v8516_v30  ;;  %7812 = vmatprep.subr.bf16.mxu0 %v8517_v31  ;;  %v8566_v30 = vld [vmem:[%s10564_s1 + $0x10e0] sm:$0xff]  }
 0x1e6   :  { %7834 = vmatprep.subr.bf16.mxu1 %v8518_v32  ;;  %6156 = vmatprep.mubr.bf16.mxu0 %v6554_v10  ;;  %v8567_v31 = vld [vmem:[%s10564_s1 + $0x1020] sm:$0xff]   ;;  %v8596_v10 = vld [vmem:[%s10564_s1 + $0x1190] sm:$0xff]  }
 0x1e7   :  { %6196 = vmatprep.mubr.bf16.mxu1 %v6556_v12  ;;  %v8598_v12 = vld [vmem:[%s10564_s1 + $0x11d8] sm:$0xff]  }
 0x1e8   :  { %7813 = vmatpush3.bf16.msra.mxu0 %v8519_v33  ;;  %v8568_v33 = vld [vmem:[%s10564_s1 + $0x10a0] sm:$0xff]  }
 0x1e9   :  { %7835 = vmatpush3.bf16.msra.mxu1 %v8520_v34  ;;  %7814 = vmatprep.subr.bf16.mxu0 %v8521_v35 }
 0x1ea   :  { %7836 = vmatprep.subr.bf16.mxu1 %v8522_v36 }
 0x1ec   :  { %7815 = vmatpush3.bf16.msra.mxu0 %v8523_v37 }
 0x1ed   :  { %7837 = vmatpush3.bf16.msra.mxu1 %v8524_v38  ;;  %7816 = vmatprep.subr.bf16.mxu0 %v8525_v39  ;;  %v8569_v39 = vld [vmem:[%s10564_s1 + $0x1068] sm:$0xff]  }
 0x1ee   :  { %7838 = vmatprep.subr.bf16.mxu1 %v8526_v40 }
 0x1f0   :  { %7817 = vmatpush3.bf16.msra.mxu0 %v8527_v41  ;;  %v8570_v41 = vld [vmem:[%s10564_s1 + $0x10e8] sm:$0xff]  }
 0x1f1   :  { %7839 = vmatpush3.bf16.msra.mxu1 %v8528_v42  ;;  %7818 = vmatprep.subr.bf16.mxu0 %v8529_v43 }
 0x1f2   :  { %7840 = vmatprep.subr.bf16.mxu1 %v8530_v44  ;;  %v8571_v44 = vld [vmem:[%s10564_s1 + $0x1028] sm:$0xff]  }
 0x1f4   :  { %7819 = vmatpush3.bf16.msra.mxu0 %v8531_v45 }
 0x1f5   :  { %7841 = vmatpush3.bf16.msra.mxu1 %v8532_v47  ;;  %7820 = vmatprep.subr.bf16.mxu0 %v8533_v53  ;;  %v8577_v53 = vld [vmem:[%s10564_s1 + $0x1078] sm:$0xff]  }
 0x1f6   :  { %v7518_v46 = vpop.f32.mrb[32].mxu0  ;;  %7842 = vmatprep.subr.bf16.mxu1 %v8534_v55  ;;  %v8579_v55 = vld [vmem:[%s10564_s1 + $0x1038] sm:$0xff]  }
 0x1f7   :  { %v7540_v48 = vpop.f32.mrb[32].mxu1  ;;  %v7519_v49 = vpop.f32.mrb[33].mxu0 }
 0x1f8   :  { %v7541_v50 = vpop.f32.mrb[33].mxu1  ;;  %v7520_v51 = vadd.f32 %v7519_v49, %v7518_v46  ;;  %v7521_v54 = vpop.f32.mrb[34].mxu0  ;;  %7821 = vmatpush3.bf16.msra.mxu0 %v8535_v58  ;;  %v8572_v46 = vld [vmem:[%s10564_s1 + $0x10a8] sm:$0xff]   ;;  %v8573_v49 = vld [vmem:[%s10564_s1 + $0x1070] sm:$0xff]  }
 0x1f9   :  { %v7542_v52 = vadd.f32 %v7541_v50, %v7540_v48  ;;  %v7543_v56 = vpop.f32.mrb[34].mxu1  ;;  %v7522_v59 = vpop.f32.mrb[35].mxu0  ;;  %7843 = vmatpush3.bf16.msra.mxu1 %v8536_v60  ;;  %7822 = vmatprep.subr.bf16.mxu0 %v8537_v63  ;;  %v8574_v50 = vld [vmem:[%s10564_s1 + $0x10f0] sm:$0xff]   ;;  %v8578_v54 = vld [vmem:[%s10564_s1 + $0x10f8] sm:$0xff]   ;;  %v54_v58 = vld [vmem:[%s10565_s0 + $0x108] sm:$0xff] }
 0x1fa   :  { %v5599_v57 = vadd.f32 %v7520_v51, %v10192_v13  ;;  %v7544_v61 = vpop.f32.mrb[35].mxu1  ;;  %7844 = vmatprep.subr.bf16.mxu1 %v8538_v0  ;;  %v8549_v13 = vld [vmem:[%s10564_s1 + $0x1040] sm:$0xff]   ;;  %v8575_v51 = vld [vmem:[%s10564_s1 + $0x1030] sm:$0xff]   ;;  %v8580_v56 = vld [vmem:[%s10564_s1 + $0x10b8] sm:$0xff]  }
 0x1fb   :  { %v6559_v61 = vcombine.low %v54_v58, %v54_v58  ;;  %v8585_v63 = vld [vmem:[%s10564_s1 + $0x1140] sm:$0xff]  }
 0x1fc   :  { %v10294_v62 = vadd.f32 %v7542_v52, %v5599_v57  ;;  %7823 = vmatpush3.bf16.msra.mxu0 %v8539_v1  ;;  %v8576_v52 = vld [vmem:[%s10564_s1 + $0x10b0] sm:$0xff]   ;;  %v53_v57 = vld [vmem:[%s10565_s0 + $0x100] sm:$0xff] }
 0x1fd   :  { %7845 = vmatpush3.bf16.msra.mxu1 %v8540_v2  ;;  %7824 = vmatprep.subr.bf16.mxu0 %v8541_v3  ;;  %v6557_v59 = vcombine.low %v53_v57, %v53_v57  ;;  %v6558_v60 = vcombine.high %v53_v57, %v53_v57  ;;  %v8586_v0 = vld [vmem:[%s10564_s1 + $0x11c0] sm:$0xff]   ;;  %v8589_v3 = vld [vmem:[%s10564_s1 + $0x1148] sm:$0xff]  }
 0x1fe   :  { %7846 = vmatprep.subr.bf16.mxu1 %v8542_v4  ;;  %v8587_v1 = vld [vmem:[%s10564_s1 + $0x1100] sm:$0xff]   ;;  %v8590_v4 = vld [vmem:[%s10564_s1 + $0x11c8] sm:$0xff]  }
 0x1ff   :  { %v8588_v2 = vld [vmem:[%s10564_s1 + $0x1180] sm:$0xff]  }
 0x200   :  { %7825 = vmatpush3.bf16.msra.mxu0 %v8543_v5  ;;  %v8591_v5 = vld [vmem:[%s10564_s1 + $0x1108] sm:$0xff]  }
 0x201   :  { %7847 = vmatpush3.bf16.msra.mxu1 %v8544_v6  ;;  %7854 = vmatprep.subr.bf16.mxu0 %v8549_v13  ;;  %v8592_v6 = vld [vmem:[%s10564_s1 + $0x1188] sm:$0xff]   ;;  %v8599_v13 = vld [vmem:[%s10564_s1 + $0x1118] sm:$0xff]  }
 0x202   :  { %7876 = vmatprep.subr.bf16.mxu1 %v8550_v14  ;;  %v8600_v14 = vld [vmem:[%s10564_s1 + $0x1198] sm:$0xff]  }
 0x203   :  { %6157 = vmatmul.mubr.bf16.vlgmr.msra.gmra.mrb[60].mxu0 %v6553_v9  ;;  %v8595_v9 = vld [vmem:[%s10564_s1 + $0x1110] sm:$0xff]  }
 0x204   :  { %6197 = vmatmul.mubr.bf16.vlgmr.msra.gmra.mrb[60].mxu1 %v6555_v11  ;;  %7855 = vmatpush3.bf16.msra.mxu0 %v8551_v15  ;;  %v8597_v11 = vld [vmem:[%s10564_s1 + $0x1158] sm:$0xff]   ;;  %v8601_v15 = vld [vmem:[%s10564_s1 + $0x1160] sm:$0xff]  }
 0x205   :  { %7877 = vmatpush3.bf16.msra.mxu1 %v8552_v16  ;;  %7856 = vmatprep.subr.bf16.mxu0 %v8553_v17  ;;  %v8602_v16 = vld [vmem:[%s10564_s1 + $0x11e0] sm:$0xff]  }
 0x206   :  { %7878 = vmatprep.subr.bf16.mxu1 %v8554_v18  ;;  %6236 = vmatprep.mubr.bf16.mxu0 %v6558_v60  ;;  %v8603_v17 = vld [vmem:[%s10564_s1 + $0x1120] sm:$0xff]  }
 0x208   :  { %7857 = vmatpush3.bf16.msra.mxu0 %v8555_v19  ;;  %v8604_v19 = vld [vmem:[%s10564_s1 + $0x11a0] sm:$0xff]  }
 0x209   :  { %7879 = vmatpush3.bf16.msra.mxu1 %v8556_v20  ;;  %7858 = vmatprep.subr.bf16.mxu0 %v8557_v21 }
 0x20a   :  { %7880 = vmatprep.subr.bf16.mxu1 %v8558_v22 }
 0x20c   :  { %7859 = vmatpush3.bf16.msra.mxu0 %v8559_v23 }
 0x20d   :  { %7881 = vmatpush3.bf16.msra.mxu1 %v8560_v24  ;;  %7860 = vmatprep.subr.bf16.mxu0 %v8561_v25  ;;  %v8605_v25 = vld [vmem:[%s10564_s1 + $0x1168] sm:$0xff]  }
 0x20e   :  { %7882 = vmatprep.subr.bf16.mxu1 %v8562_v26 }
 0x210   :  { %7861 = vmatpush3.bf16.msra.mxu0 %v8563_v27  ;;  %v8606_v27 = vld [vmem:[%s10564_s1 + $0x11e8] sm:$0xff]  }
 0x211   :  { %7883 = vmatpush3.bf16.msra.mxu1 %v8564_v28  ;;  %7862 = vmatprep.subr.bf16.mxu0 %v8565_v29 }
 0x212   :  { %7884 = vmatprep.subr.bf16.mxu1 %v8566_v30  ;;  %v8607_v30 = vld [vmem:[%s10564_s1 + $0x1128] sm:$0xff]  }
 0x214   :  { %7863 = vmatpush3.bf16.msra.mxu0 %v8567_v31 }
 0x215   :  { %7885 = vmatpush3.bf16.msra.mxu1 %v8568_v33  ;;  %7864 = vmatprep.subr.bf16.mxu0 %v8569_v39  ;;  %v8613_v39 = vld [vmem:[%s10564_s1 + $0x1178] sm:$0xff]  }
 0x216   :  { %v7562_v32 = vpop.f32.mrb[36].mxu0  ;;  %7886 = vmatprep.subr.bf16.mxu1 %v8570_v41  ;;  %v8615_v41 = vld [vmem:[%s10564_s1 + $0x1138] sm:$0xff]  }
 0x217   :  { %v7584_v34 = vpop.f32.mrb[36].mxu1  ;;  %v7563_v35 = vpop.f32.mrb[37].mxu0 }
 0x218   :  { %v7585_v36 = vpop.f32.mrb[37].mxu1  ;;  %v7564_v37 = vadd.f32 %v7563_v35, %v7562_v32  ;;  %v7565_v40 = vpop.f32.mrb[38].mxu0  ;;  %7865 = vmatpush3.bf16.msra.mxu0 %v8571_v44  ;;  %v8608_v32 = vld [vmem:[%s10564_s1 + $0x11a8] sm:$0xff]   ;;  %v8609_v35 = vld [vmem:[%s10564_s1 + $0x1170] sm:$0xff]   ;;  %v56_v44 = vld [vmem:[%s10565_s0 + $0x118] sm:$0xff] }
 0x219   :  { %v7586_v38 = vadd.f32 %v7585_v36, %v7584_v34  ;;  %v7587_v42 = vpop.f32.mrb[38].mxu1  ;;  %v7566_v45 = vpop.f32.mrb[39].mxu0  ;;  %7887 = vmatpush3.bf16.msra.mxu1 %v8572_v46  ;;  %7866 = vmatprep.subr.bf16.mxu0 %v8573_v49  ;;  %v8610_v36 = vld [vmem:[%s10564_s1 + $0x11f0] sm:$0xff]   ;;  %v8614_v40 = vld [vmem:[%s10564_s1 + $0x11f8] sm:$0xff]  }
 0x21a   :  { %v5679_v43 = vadd.f32 %v7564_v37, %v10294_v62  ;;  %v7588_v47 = vpop.f32.mrb[39].mxu1  ;;  %7888 = vmatprep.subr.bf16.mxu1 %v8574_v50  ;;  %v6560_v62 = vcombine.high %v54_v58, %v54_v58  ;;  %v8611_v37 = vld [vmem:[%s10564_s1 + $0x1130] sm:$0xff]   ;;  %v8616_v42 = vld [vmem:[%s10564_s1 + $0x11b8] sm:$0xff]  }
 0x21b   :  { %v6563_v47 = vcombine.low %v56_v44, %v56_v44 }
 0x21c   :  { %v10399_v48 = vadd.f32 %v7586_v38, %v5679_v43  ;;  %7867 = vmatpush3.bf16.msra.mxu0 %v8575_v51  ;;  %6276 = vmatprep.mubr.bf16.mxu1 %v6560_v62  ;;  %v8612_v38 = vld [vmem:[%s10564_s1 + $0x11b0] sm:$0xff]  }
 0x21d   :  { %7889 = vmatpush3.bf16.msra.mxu1 %v8576_v52  ;;  %7868 = vmatprep.subr.bf16.mxu0 %v8577_v53  ;;  %v55_v43 = vld [vmem:[%s10565_s0 + $0x110] sm:$0xff] }
 0x21e   :  { %7890 = vmatprep.subr.bf16.mxu1 %v8578_v54  ;;  %v6561_v45 = vcombine.low %v55_v43, %v55_v43  ;;  %v6562_v46 = vcombine.high %v55_v43, %v55_v43 }
 0x220   :  { %7869 = vmatpush3.bf16.msra.mxu0 %v8579_v55 }
 0x221   :  { %7891 = vmatpush3.bf16.msra.mxu1 %v8580_v56  ;;  %7898 = vmatprep.subr.bf16.mxu0 %v8585_v63 }
 0x222   :  { %7920 = vmatprep.subr.bf16.mxu1 %v8586_v0 }
 0x223   :  { %6237 = vmatmul.mubr.bf16.vlgmr.msra.gmra.mrb[64].mxu0 %v6557_v59 }
 0x224   :  { %6277 = vmatmul.mubr.bf16.vlgmr.msra.gmra.mrb[64].mxu1 %v6559_v61  ;;  %7899 = vmatpush3.bf16.msra.mxu0 %v8587_v1 }
 0x225   :  { %7921 = vmatpush3.bf16.msra.mxu1 %v8588_v2  ;;  %7900 = vmatprep.subr.bf16.mxu0 %v8589_v3 }
 0x226   :  { %7922 = vmatprep.subr.bf16.mxu1 %v8590_v4  ;;  %6316 = vmatprep.mubr.bf16.mxu0 %v6562_v46 }
 0x228   :  { %7901 = vmatpush3.bf16.msra.mxu0 %v8591_v5 }
 0x229   :  { %7923 = vmatpush3.bf16.msra.mxu1 %v8592_v6  ;;  %7902 = vmatprep.subr.bf16.mxu0 %v8593_v7 }
 0x22a   :  { %7924 = vmatprep.subr.bf16.mxu1 %v8594_v8 }
 0x22c   :  { %7903 = vmatpush3.bf16.msra.mxu0 %v8595_v9  ;;  %v8633_v9 = vmov 0.0  }
 0x22d   :  { %7925 = vmatpush3.bf16.msra.mxu1 %v8596_v10  ;;  %7904 = vmatprep.subr.bf16.mxu0 %v8597_v11  ;;  %v8621_v10 = vld [vmem:[%s10567_s3] sm:$0xff]   ;;  %v8622_v11 = vld [vmem:[%s10567_s3 + $0x8] sm:$0xff]  }
 0x22e   :  { %7926 = vmatprep.subr.bf16.mxu1 %v8598_v12  ;;  %v8623_v12 = vld [vmem:[%s10567_s3 + $0x10] sm:$0xff]  }
 0x230   :  { %7905 = vmatpush3.bf16.msra.mxu0 %v8599_v13  ;;  %v8624_v13 = vld [vmem:[%s10567_s3 + $0x18] sm:$0xff]  }
 0x231   :  { %7927 = vmatpush3.bf16.msra.mxu1 %v8600_v14  ;;  %7906 = vmatprep.subr.bf16.mxu0 %v8601_v15  ;;  %v8625_v14 = vld [vmem:[%s10567_s3 + $0x20] sm:$0xff]  }
 0x232   :  { %7928 = vmatprep.subr.bf16.mxu1 %v8602_v16 }
 0x234   :  { %7907 = vmatpush3.bf16.msra.mxu0 %v8603_v17 }
 0x235   :  { %7929 = vmatpush3.bf16.msra.mxu1 %v8604_v19  ;;  %7908 = vmatprep.subr.bf16.mxu0 %v8605_v25  ;;  %v8626_v25 = vld [vmem:[%s10567_s3 + $0x28] sm:$0xff]  }
 0x236   :  { %v7606_v18 = vpop.f32.mrb[40].mxu0  ;;  %7930 = vmatprep.subr.bf16.mxu1 %v8606_v27 }
 0x237   :  { %v7628_v20 = vpop.f32.mrb[40].mxu1  ;;  %v7607_v21 = vpop.f32.mrb[41].mxu0 }
 0x238   :  { %v7629_v22 = vpop.f32.mrb[41].mxu1  ;;  %v7608_v23 = vadd.f32 %v7607_v21, %v7606_v18  ;;  %v7609_v26 = vpop.f32.mrb[42].mxu0  ;;  %7909 = vmatpush3.bf16.msra.mxu0 %v8607_v30 }
 0x239   :  { %v7630_v24 = vadd.f32 %v7629_v22, %v7628_v20  ;;  %v7631_v28 = vpop.f32.mrb[42].mxu1  ;;  %v7610_v31 = vpop.f32.mrb[43].mxu0  ;;  %7931 = vmatpush3.bf16.msra.mxu1 %v8608_v32  ;;  %7910 = vmatprep.subr.bf16.mxu0 %v8609_v35 }
 0x23a   :  { %v5759_v29 = vadd.f32 %v7608_v23, %v10399_v48  ;;  %v7632_v33 = vpop.f32.mrb[43].mxu1  ;;  %7932 = vmatprep.subr.bf16.mxu1 %v8610_v36  ;;  %v6564_v48 = vcombine.high %v56_v44, %v56_v44  ;;  %v8627_v28 = vld [vmem:[%s10567_s3 + $0x30] sm:$0xff]  }
 0x23c   :  { %v5799_v34 = vadd.f32 %v7630_v24, %v5759_v29  ;;  %7911 = vmatpush3.bf16.msra.mxu0 %v8611_v37  ;;  %6356 = vmatprep.mubr.bf16.mxu1 %v6564_v48  ;;  %v8628_v29 = vld [vmem:[%s10567_s3 + $0x38] sm:$0xff]  }
 0x23d   :  { %7933 = vmatpush3.bf16.msra.mxu1 %v8612_v38  ;;  %7912 = vmatprep.subr.bf16.mxu0 %v8613_v39 }
 0x23e   :  { %7934 = vmatprep.subr.bf16.mxu1 %v8614_v40 }
 0x240   :  { %7913 = vmatpush3.bf16.msra.mxu0 %v8615_v41 }
 0x241   :  { %7935 = vmatpush3.bf16.msra.mxu1 %v8616_v42  ;;  %7951 = vmatprep.subr.bf16.mxu0 %v8633_v9 }
 0x243   :  { %6317 = vmatmul.mubr.bf16.vlgmr.msra.gmra.mrb[68].mxu0 %v6561_v45 }
 0x244   :  { %6357 = vmatmul.mubr.bf16.vlgmr.msra.gmra.mrb[68].mxu1 %v6563_v47  ;;  %7952 = vmatpush3.bf16.msra.mxu0 %v8621_v10 }
 0x245   :  { %7953 = vmatprep.subr.bf16.mxu0 %v8633_v9  ;;  %7967 = vmatprep.mubr.msk.bf16.mxu0 %vm8634_vm0, %v8633_v9 }
 0x248   :  { %7954 = vmatpush3.bf16.msra.mxu0 %v8622_v11 }
 0x249   :  { %7955 = vmatprep.subr.bf16.mxu0 %v8633_v9 }
 0x24c   :  { %7956 = vmatpush3.bf16.msra.mxu0 %v8623_v12 }
 0x24d   :  { %7957 = vmatprep.subr.bf16.mxu0 %v8633_v9 }
 0x250   :  { %7958 = vmatpush3.bf16.msra.mxu0 %v8624_v13 }
 0x251   :  { %7959 = vmatprep.subr.bf16.mxu0 %v8633_v9 }
 0x254   :  { %7960 = vmatpush3.bf16.msra.mxu0 %v8625_v14 }
 0x255   :  { %7961 = vmatprep.subr.bf16.mxu0 %v8633_v9 }
 0x256   :  { %v7650_v49 = vpop.f32.mrb[44].mxu0 }
 0x257   :  { %v7672_v50 = vpop.f32.mrb[44].mxu1  ;;  %v7651_v51 = vpop.f32.mrb[45].mxu0 }
 0x258   :  { %v7652_v52 = vadd.f32 %v7651_v51, %v7650_v49  ;;  %v7673_v53 = vpop.f32.mrb[45].mxu1  ;;  %v7653_v54 = vpop.f32.mrb[46].mxu0  ;;  %7962 = vmatpush3.bf16.msra.mxu0 %v8626_v25 }
 0x259   :  { %v7674_v55 = vadd.f32 %v7673_v53, %v7672_v50  ;;  %v7675_v56 = vpop.f32.mrb[46].mxu1  ;;  %v7654_v57 = vpop.f32.mrb[47].mxu0  ;;  %7963 = vmatprep.subr.bf16.mxu0 %v8633_v9 }
 0x25a   :  { %v5839_v58 = vadd.f32 %v7652_v52, %v5799_v34  ;;  %v7676_v59 = vpop.f32.mrb[47].mxu1 }
 0x25c   :  { %v5879_v60 = vadd.f32 %v7674_v55, %v5839_v58  ;;  %7964 = vmatpush3.bf16.msra.mxu0 %v8627_v28 }
 0x25d   :  { %7965 = vmatprep.subr.bf16.mxu0 %v8633_v9 }
 0x260   :  { %7966 = vmatpush3.bf16.msra.mxu0 %v8628_v29 }
 0x276   :  { %v7694_v61 = vpop.f32.mrb[48].mxu0 }
 0x277   :  { %v7716_v62 = vpop.f32.mrb[48].mxu1  ;;  %v7695_v63 = vpop.f32.mrb[49].mxu0 }
 0x278   :  { %v7696_v0 = vadd.f32 %v7695_v63, %v7694_v61  ;;  %v7717_v1 = vpop.f32.mrb[49].mxu1  ;;  %v7697_v2 = vpop.f32.mrb[50].mxu0 }
 0x279   :  { %v7718_v3 = vadd.f32 %v7717_v1, %v7716_v62  ;;  %v7719_v4 = vpop.f32.mrb[50].mxu1  ;;  %v7698_v5 = vpop.f32.mrb[51].mxu0 }
 0x27a   :  { %v5919_v6 = vadd.f32 %v7696_v0, %v5879_v60  ;;  %v7720_v7 = vpop.f32.mrb[51].mxu1 }
 0x27c   :  { %v5959_v8 = vadd.f32 %v7718_v3, %v5919_v6 }
 0x296   :  { %v7738_v15 = vpop.f32.mrb[52].mxu0 }
 0x297   :  { %v7760_v16 = vpop.f32.mrb[52].mxu1  ;;  %v7739_v17 = vpop.f32.mrb[53].mxu0 }
 0x298   :  { %v7761_v18 = vpop.f32.mrb[53].mxu1  ;;  %v7740_v19 = vadd.f32 %v7739_v17, %v7738_v15  ;;  %v7741_v21 = vpop.f32.mrb[54].mxu0 }
 0x299   :  { %v7762_v20 = vadd.f32 %v7761_v18, %v7760_v16  ;;  %v7763_v22 = vpop.f32.mrb[54].mxu1  ;;  %v7742_v23 = vpop.f32.mrb[55].mxu0  ;;  %v7141_v16 = vld [vmem:[%s10568_s4] ss:$0 sm:$0xff] }
 0x29a   :  { %v7764_v24 = vpop.f32.mrb[55].mxu1  ;;  %v5999_v26 = vadd.f32 %v7740_v19, %v5959_v8 }
 0x29c   :  { %v6039_v27 = vadd.f32 %v7762_v20, %v5999_v26 }
 0x2b6   :  { %v7782_v30 = vpop.f32.mrb[56].mxu0 }
 0x2b7   :  { %v7804_v31 = vpop.f32.mrb[56].mxu1  ;;  %v7783_v32 = vpop.f32.mrb[57].mxu0 }
 0x2b8   :  { %v7784_v33 = vadd.f32 %v7783_v32, %v7782_v30  ;;  %v7805_v34 = vpop.f32.mrb[57].mxu1  ;;  %v7785_v35 = vpop.f32.mrb[58].mxu0 }
 0x2b9   :  { %v7806_v36 = vadd.f32 %v7805_v34, %v7804_v31  ;;  %v7807_v37 = vpop.f32.mrb[58].mxu1  ;;  %v7786_v38 = vpop.f32.mrb[59].mxu0 }
 0x2ba   :  { %v6079_v39 = vadd.f32 %v7784_v33, %v6039_v27  ;;  %v7808_v40 = vpop.f32.mrb[59].mxu1 }
 0x2bc   :  { %v6119_v41 = vadd.f32 %v7806_v36, %v6079_v39 }
 0x2d6   :  { %v7826_v42 = vpop.f32.mrb[60].mxu0 }
 0x2d7   :  { %v7848_v43 = vpop.f32.mrb[60].mxu1  ;;  %v7827_v44 = vpop.f32.mrb[61].mxu0 }
 0x2d8   :  { %v7828_v45 = vadd.f32 %v7827_v44, %v7826_v42  ;;  %v7849_v46 = vpop.f32.mrb[61].mxu1  ;;  %v7829_v47 = vpop.f32.mrb[62].mxu0 }
 0x2d9   :  { %v7850_v48 = vadd.f32 %v7849_v46, %v7848_v43  ;;  %v7851_v49 = vpop.f32.mrb[62].mxu1  ;;  %v7830_v50 = vpop.f32.mrb[63].mxu0 }
 0x2da   :  { %v6159_v51 = vadd.f32 %v7828_v45, %v6119_v41  ;;  %v7852_v52 = vpop.f32.mrb[63].mxu1 }
 0x2dc   :  { %v6199_v53 = vadd.f32 %v7850_v48, %v6159_v51 }
 0x2f6   :  { %v7870_v54 = vpop.f32.mrb[64].mxu0 }
 0x2f7   :  { %v7892_v55 = vpop.f32.mrb[64].mxu1  ;;  %v7871_v56 = vpop.f32.mrb[65].mxu0 }
 0x2f8   :  { %v7872_v57 = vadd.f32 %v7871_v56, %v7870_v54  ;;  %v7893_v58 = vpop.f32.mrb[65].mxu1  ;;  %v7873_v59 = vpop.f32.mrb[66].mxu0 }
 0x2f9   :  { %v7894_v60 = vadd.f32 %v7893_v58, %v7892_v55  ;;  %v7895_v61 = vpop.f32.mrb[66].mxu1  ;;  %v7874_v62 = vpop.f32.mrb[67].mxu0 }
 0x2fa   :  { %v6239_v63 = vadd.f32 %v7872_v57, %v6199_v53  ;;  %v7896_v0 = vpop.f32.mrb[67].mxu1 }
 0x2fc   :  { %v6279_v1 = vadd.f32 %v7894_v60, %v6239_v63 }
 0x316   :  { %v7914_v2 = vpop.f32.mrb[68].mxu0 }
 0x317   :  { %v7936_v3 = vpop.f32.mrb[68].mxu1  ;;  %v7915_v4 = vpop.f32.mrb[69].mxu0 }
 0x318   :  { %v7916_v5 = vadd.f32 %v7915_v4, %v7914_v2  ;;  %v7937_v6 = vpop.f32.mrb[69].mxu1  ;;  %v7917_v7 = vpop.f32.mrb[70].mxu0 }
 0x319   :  { %v7938_v8 = vadd.f32 %v7937_v6, %v7936_v3  ;;  %v7939_v9 = vpop.f32.mrb[70].mxu1  ;;  %v7918_v10 = vpop.f32.mrb[71].mxu0 }
 0x31a   :  { %v6319_v11 = vadd.f32 %v7916_v5, %v6279_v1  ;;  %v7940_v12 = vpop.f32.mrb[71].mxu1 }
 0x31c   :  { %v6359_v13 = vadd.f32 %v7938_v8, %v6319_v11 }
 0x31e   :  { %v6364_v14 = vmax.f32 %v6359_v13, 0.0 }
 0x320   :  { %v6365_v15 = vpack.c.bf16 %v6364_v14, %v6364_v14 }
 0x322   :  { %7968 = vmatmul.mubr.bf16.vlgmr.msra.gmra.mrb[72].mxu0 %v6365_v15 }
 0x3f5   :  { %v6471_v17 = vpop.f32.mrb[72].mxu0 }
 0x3f6   :  { %v6472_v18 = vadd.f32 %v7141_v16, %v6471_v17  ;;  %v7969_v19 = vpop.f32.mrb[73].mxu0 }
 0x3f7   :  { %v6474_v20 = vpop.f32.mrb[74].mxu0 }
 0x3f8   :  { %6477 = vmax.xlane.f32.xlu0 %v6472_v18  ;;  %v7970_v21 = vpop.f32.mrb[75].mxu0 }
 0x485   :  { %v6478_v22 = vpop.xlane.xlu0 %6477 }
 0x486   :  { %v6479_v23 = vsub.f32 %v6472_v18, %v6478_v22 }
 0x488   :  { %v6480_v24 = vmul.f32 1.442695, %v6479_v23 }
 0x48a   :  { %8629 = vpow2.f32 %v6480_v24 }
 0x494   :  { %v8630_v25 = vpop.eup %8629 }
 0x495   :  { %6482 = vadd.xlane.f32.xlu0 %v8630_v25 }
 0x522   :  { %v6483_v26 = vpop.xlane.xlu0 %6482 }
 0x523   :  { %8631 = vlog2.f32 %v6483_v26 }
 0x52d   :  { %v8632_v27 = vpop.eup %8631 }
 0x52e   :  { %v6485_v28 = vmul.f32 0.6931472, %v8632_v27 }
 0x530   :  { %v6486_v29 = vsub.f32 %v6479_v23, %v6485_v28 }
 0x532   :  { %6487 = vst [vmem:[%s10569_s5] sm:$0xff] %v6486_v29 }

</bundles_post_ra>
